<compile_context>
chip_gen: v5e
topology: v5e:2x2
jax: 0.10.0
libtpu: 0.0.40
codegen_flags: <defaults>
</compile_context>

<pallas_src>
import math

import jax
import jax.numpy as jnp
from jax.experimental import pallas as pl
from jax.experimental.pallas import tpu as pltpu  # noqa: F401  (kept for TPU-specific tuning)

# ----------------------------- model config (small, synthetic) -----------------------
B = 2          # batch
S = 8          # max sequence length (incl. special tokens)
H = 32         # hidden size
NH = 4         # attention heads
HD = H // NH   # head dim
F = 64         # FFN intermediate size
L = 2          # number of transformer layers
V = 25         # vocab size (protein alphabet-ish)
T = B * S      # flattened (batch * seq) rows
LN_EPS = 1e-12
NEG = -1e9     # additive mask value for disallowed attention keys


def _ln(x, g, b, eps=LN_EPS):
    mu = jnp.mean(x, axis=-1, keepdims=True)
    var = jnp.mean((x - mu) ** 2, axis=-1, keepdims=True)
    return (x - mu) * jax.lax.rsqrt(var + eps) * g + b


# ----------------------------- fused Pallas kernel ------------------------------------
def encoder_kernel(x_ref, bias_ref, pool_ref, eg_ref, eb_ref,
                   wq_ref, bq_ref, wk_ref, bk_ref, wv_ref, bv_ref,
                   wo_ref, bo_ref, ln1g_ref, ln1b_ref,
                   w1_ref, b1_ref, w2_ref, b2_ref, ln2g_ref, ln2b_ref,
                   o_ref):
    """Embedding LN + L BERT layers + masked mean pooling, fully fused.

    x_ref:    (T, H)     token+position embeddings (pre-LN)
    bias_ref: (T, T)     additive attention bias (0 allowed / NEG masked; blocks padding
                         and cross-batch attention for the flattened layout)
    pool_ref: (B, T)     pooling matrix (valid-mask / per-sequence length)
    wq/wk/wv: (L*NH, H, HD)   per-head projection weights (scale folded into wq/bq)
    wo:       (L*NH, HD, H)   per-head output projection rows
    biases / LN params stacked along a leading layer axis.
    """
    h = _ln(x_ref[...], eg_ref[...], eb_ref[...])        # fused embedding LayerNorm
    bias = bias_ref[...]                                 # (T, T)

    for l in range(L):                                   # static layer loop; all weights in VMEM
        attn = jnp.zeros((T, H), jnp.float32)
        for hh in range(NH):                             # static head loop; no lane slicing
            idx = l * NH + hh
            q = jnp.dot(h, wq_ref[idx], preferred_element_type=jnp.float32) + bq_ref[idx]
            k = jnp.dot(h, wk_ref[idx], preferred_element_type=jnp.float32) + bk_ref[idx]
            v = jnp.dot(h, wv_ref[idx], preferred_element_type=jnp.float32) + bv_ref[idx]
            sc = jnp.einsum('qd,kd->qk', q, k,
                            preferred_element_type=jnp.float32) + bias     # (T, T)
            sc = sc - jnp.max(sc, axis=-1, keepdims=True)
            p = jnp.exp(sc)
            p = p * pl.reciprocal(jnp.sum(p, axis=-1, keepdims=True), approx=True)
            ctx = jnp.dot(p, v, preferred_element_type=jnp.float32)        # (T, HD)
            # fold per-head context straight into the output projection (no lane concat)
            attn = attn + jnp.dot(ctx, wo_ref[idx], preferred_element_type=jnp.float32)

        h1 = _ln(h + attn + bo_ref[l], ln1g_ref[l], ln1b_ref[l])

        mid = jnp.dot(h1, w1_ref[l], preferred_element_type=jnp.float32) + b1_ref[l]
        mid = jax.nn.gelu(mid, approximate=True)  # TODO(synk): HF BERT uses exact (erf) GELU
        ffn = jnp.dot(mid, w2_ref[l], preferred_element_type=jnp.float32) + b2_ref[l]
        h = _ln(h1 + ffn, ln2g_ref[l], ln2b_ref[l])

    # torch.mean(el, 0) per sequence == one (B,T)x(T,H) matmul with mask/len baked in.
    o_ref[...] = jnp.dot(pool_ref[...], h, preferred_element_type=jnp.float32)


def fused_encoder(x_emb, attn_bias, pool, kp):
    # No grid: everything is one block, loaded once into VMEM (total footprint < 100 KB).
    return pl.pallas_call(
        encoder_kernel,
        out_shape=jax.ShapeDtypeStruct((B, H), jnp.float32),
    )(x_emb, attn_bias, pool,
      kp['emb_ln_g'], kp['emb_ln_b'],
      kp['wq'], kp['bq'], kp['wk'], kp['bk'], kp['wv'], kp['bv'],
      kp['wo'], kp['bo'], kp['ln1g'], kp['ln1b'],
      kp['w1'], kp['b1'], kp['w2'], kp['b2'], kp['ln2g'], kp['ln2b'])


# ----------------------------- wrapper -------------------------------------------------
@jax.jit
def antiberty_encoder(token_ids, lengths, kp):
    # Embedding gather stays in XLA (data-dependent gather); LN is fused into the kernel.
    x = kp['word_emb'][token_ids] + kp['pos_emb'][None, :, :]            # (B, S, H)
    x = x.reshape(T, H).astype(jnp.float32)

    valid = (jnp.arange(S)[None, :] < lengths[:, None])                  # (B, S) bool
    valid_t = valid.reshape(T)                                           # (T,)
    row_batch = jnp.repeat(jnp.arange(B), S)                             # (T,)

    # Additive attention bias: key must be in the same sequence AND a valid token.
    allowed = (row_batch[:, None] == row_batch[None, :]) & valid_t[None, :]
    attn_bias = jnp.where(allowed, 0.0, NEG).astype(jnp.float32)         # (T, T)

    # Masked-mean pooling matrix (guard zero-length sequences).
    cnt = jnp.maximum(lengths, 1).astype(jnp.float32)                    # (B,)
    pool = ((row_batch[None, :] == jnp.arange(B)[:, None]) & valid_t[None, :])
    pool = pool.astype(jnp.float32) / cnt[:, None]                       # (B, T)

    return fused_encoder(x, attn_bias, pool, kp)                         # (B, H)


# ----------------------------- parameter init & kernel-layout prep --------------------
def init_params(key):
    def nrm(k, shape, scale=0.02):
        return (scale * jax.random.normal(k, shape)).astype(jnp.float32)

    keys = jax.random.split(key, 4 + L)
    params = {
        'word_emb': nrm(keys[0], (V, H)),
        'pos_emb': nrm(keys[1], (S, H)),
        'emb_ln_g': jnp.ones((1, H), jnp.float32),
        'emb_ln_b': jnp.zeros((1, H), jnp.float32),
        'layers': [],
    }
    for l in range(L):
        lk = jax.random.split(keys[4 + l], 8)
        params['layers'].append({
            'wq': nrm(lk[0], (H, H)), 'bq': jnp.zeros((1, H), jnp.float32),
            'wk': nrm(lk[1], (H, H)), 'bk': jnp.zeros((1, H), jnp.float32),
            'wv': nrm(lk[2], (H, H)), 'bv': jnp.zeros((1, H), jnp.float32),
            'wo': nrm(lk[3], (H, H)), 'bo': jnp.zeros((1, H), jnp.float32),
            'ln1g': jnp.ones((1, H), jnp.float32), 'ln1b': jnp.zeros((1, H), jnp.float32),
            'w1': nrm(lk[4], (H, F)), 'b1': jnp.zeros((1, F), jnp.float32),
            'w2': nrm(lk[5], (F, H)), 'b2': jnp.zeros((1, H), jnp.float32),
            'ln2g': jnp.ones((1, H), jnp.float32), 'ln2b': jnp.zeros((1, H), jnp.float32),
        })
    return params


def prepare_params(params):
    """One-time re-layout: per-head Q/K/V/O weights, scale folded into Q, layers stacked."""
    scale = 1.0 / math.sqrt(HD)

    def split_heads_cols(w, b, fold_scale):
        # w: (H, H) -> (NH, H, HD); b: (1, H) -> (NH, 1, HD)  (column-split per head)
        w = w.reshape(H, NH, HD).transpose(1, 0, 2)
        b = b.reshape(1, NH, HD).transpose(1, 0, 2)
        if fold_scale:
            w = w * scale
            b = b * scale
        return w, b

    names = ['wq', 'bq', 'wk', 'bk', 'wv', 'bv', 'wo', 'bo',
             'ln1g', 'ln1b', 'w1', 'b1', 'w2', 'b2', 'ln2g', 'ln2b']
    stk = {k: [] for k in names}
    for lp in params['layers']:
        wq, bq = split_heads_cols(lp['wq'], lp['bq'], True)   # 1/sqrt(HD) folded into Q
        wk, bk = split_heads_cols(lp['wk'], lp['bk'], False)
        wv, bv = split_heads_cols(lp['wv'], lp['bv'], False)
        wo = lp['wo'].reshape(NH, HD, H)                      # row-split per head
        stk['wq'].append(wq); stk['bq'].append(bq)
        stk['wk'].append(wk); stk['bk'].append(bk)
        stk['wv'].append(wv); stk['bv'].append(bv)
        stk['wo'].append(wo); stk['bo'].append(lp['bo'])
        stk['ln1g'].append(lp['ln1g']); stk['ln1b'].append(lp['ln1b'])
        stk['w1'].append(lp['w1']); stk['b1'].append(lp['b1'])
        stk['w2'].append(lp['w2']); stk['b2'].append(lp['b2'])
        stk['ln2g'].append(lp['ln2g']); stk['ln2b'].append(lp['ln2b'])

    kp = {
        'word_emb': params['word_emb'],
        'pos_emb': params['pos_emb'],
        'emb_ln_g': params['emb_ln_g'],
        'emb_ln_b': params['emb_ln_b'],
    }
    for k in ['wq', 'bq', 'wk', 'bk', 'wv', 'bv', 'wo']:
        stacked = jnp.stack(stk[k])                           # (L, NH, ...)
        kp[k] = stacked.reshape((L * NH,) + stacked.shape[2:])
    for k in ['bo', 'ln1g', 'ln1b', 'w1', 'b1', 'w2', 'b2', 'ln2g', 'ln2b']:
        kp[k] = jnp.stack(stk[k])                             # (L, ...)
    return kp


if __name__ == "__main__":
    key = jax.random.PRNGKey(0)
    kp_key, tok_key = jax.random.split(key)
    params = init_params(kp_key)
    kparams = prepare_params(params)

    # synthetic "tokenized protein sequences" (ids) with per-sequence valid lengths
    # TODO(synk): real BertTokenizer / AntiBERTy checkpoint not loadable here; weights are synthetic.
    token_ids = jax.random.randint(tok_key, (B, S), 0, V, dtype=jnp.int32)
    lengths = jnp.array([S, S - 2], dtype=jnp.int32)

    out = antiberty_encoder(token_ids, lengths, kparams)
    out = jax.block_until_ready(out)
    assert out.shape == (B, H) and out.dtype == jnp.float32
    assert bool(jnp.all(jnp.isfinite(out)))
    print("KERNEL_OK")
</pallas_src>

<mosaic_0001>
module attributes {stable_mosaic.version = 11 : i64} {
  func.func @encoder_kernel(%arg0: memref<16x32xf32, #tpu.memory_space<vmem>>, %arg1: memref<16x16xf32, #tpu.memory_space<vmem>>, %arg2: memref<2x16xf32, #tpu.memory_space<vmem>>, %arg3: memref<1x32xf32, #tpu.memory_space<vmem>>, %arg4: memref<1x32xf32, #tpu.memory_space<vmem>>, %arg5: memref<8x32x8xf32, #tpu.memory_space<vmem>>, %arg6: memref<8x1x8xf32, #tpu.memory_space<vmem>>, %arg7: memref<8x32x8xf32, #tpu.memory_space<vmem>>, %arg8: memref<8x1x8xf32, #tpu.memory_space<vmem>>, %arg9: memref<8x32x8xf32, #tpu.memory_space<vmem>>, %arg10: memref<8x1x8xf32, #tpu.memory_space<vmem>>, %arg11: memref<8x8x32xf32, #tpu.memory_space<vmem>>, %arg12: memref<2x1x32xf32, #tpu.memory_space<vmem>>, %arg13: memref<2x1x32xf32, #tpu.memory_space<vmem>>, %arg14: memref<2x1x32xf32, #tpu.memory_space<vmem>>, %arg15: memref<2x32x64xf32, #tpu.memory_space<vmem>>, %arg16: memref<2x1x64xf32, #tpu.memory_space<vmem>>, %arg17: memref<2x64x32xf32, #tpu.memory_space<vmem>>, %arg18: memref<2x1x32xf32, #tpu.memory_space<vmem>>, %arg19: memref<2x1x32xf32, #tpu.memory_space<vmem>>, %arg20: memref<2x1x32xf32, #tpu.memory_space<vmem>>, %arg21: memref<2x32xf32, #tpu.memory_space<vmem>>) attributes {dimension_semantics = [], scalar_prefetch = 0 : i64, scratch_operands = 0 : i64, tpu.core_type = #tpu.core_type<tc>} {
    %c0 = arith.constant 0 : index
    %c0_0 = arith.constant 0 : index
    %0 = vector.load %arg0[%c0, %c0_0] : memref<16x32xf32, #tpu.memory_space<vmem>>, vector<16x32xf32>
    %c0_1 = arith.constant 0 : index
    %c0_2 = arith.constant 0 : index
    %1 = vector.load %arg3[%c0_1, %c0_2] : memref<1x32xf32, #tpu.memory_space<vmem>>, vector<1x32xf32>
    %c0_3 = arith.constant 0 : index
    %c0_4 = arith.constant 0 : index
    %2 = vector.load %arg4[%c0_3, %c0_4] : memref<1x32xf32, #tpu.memory_space<vmem>>, vector<1x32xf32>
    %cst = arith.constant dense<0.000000e+00> : vector<16xf32>
    %3 = vector.multi_reduction <add>, %0, %cst [1] : vector<16x32xf32> to vector<16xf32>
    %4 = vector.shape_cast %3 : vector<16xf32> to vector<16x1xf32>
    %cst_5 = arith.constant 3.200000e+01 : f32
    %5 = vector.broadcast %cst_5 : f32 to vector<16x1xf32>
    %6 = arith.divf %4, %5 : vector<16x1xf32>
    %7 = vector.broadcast %6 : vector<16x1xf32> to vector<16x32xf32>
    %8 = arith.subf %0, %7 : vector<16x32xf32>
    %9 = arith.mulf %8, %8 : vector<16x32xf32>
    %cst_6 = arith.constant dense<0.000000e+00> : vector<16xf32>
    %10 = vector.multi_reduction <add>, %9, %cst_6 [1] : vector<16x32xf32> to vector<16xf32>
    %11 = vector.shape_cast %10 : vector<16xf32> to vector<16x1xf32>
    %cst_7 = arith.constant 3.200000e+01 : f32
    %12 = vector.broadcast %cst_7 : f32 to vector<16x1xf32>
    %13 = arith.divf %11, %12 : vector<16x1xf32>
    %14 = vector.broadcast %6 : vector<16x1xf32> to vector<16x32xf32>
    %15 = arith.subf %0, %14 : vector<16x32xf32>
    %cst_8 = arith.constant 9.99999996E-13 : f32
    %16 = vector.broadcast %cst_8 : f32 to vector<16x1xf32>
    %17 = arith.addf %13, %16 : vector<16x1xf32>
    %18 = math.rsqrt %17 : vector<16x1xf32>
    %19 = vector.broadcast %18 : vector<16x1xf32> to vector<16x32xf32>
    %20 = arith.mulf %15, %19 : vector<16x32xf32>
    %21 = vector.broadcast %1 : vector<1x32xf32> to vector<16x32xf32>
    %22 = arith.mulf %20, %21 : vector<16x32xf32>
    %23 = vector.broadcast %2 : vector<1x32xf32> to vector<16x32xf32>
    %24 = arith.addf %22, %23 : vector<16x32xf32>
    %c0_9 = arith.constant 0 : index
    %c0_10 = arith.constant 0 : index
    %25 = vector.load %arg1[%c0_9, %c0_10] : memref<16x16xf32, #tpu.memory_space<vmem>>, vector<16x16xf32>
    %cst_11 = arith.constant 0.000000e+00 : f32
    %26 = vector.broadcast %cst_11 : f32 to vector<16x32xf32>
    %c0_12 = arith.constant 0 : index
    %c0_13 = arith.constant 0 : index
    %c0_14 = arith.constant 0 : index
    %27 = vector.load %arg5[%c0_12, %c0_13, %c0_14] : memref<8x32x8xf32, #tpu.memory_space<vmem>>, vector<1x32x8xf32>
    %28 = vector.shape_cast %27 : vector<1x32x8xf32> to vector<32x8xf32>
    %cst_15 = arith.constant dense<0.000000e+00> : vector<16x8xf32>
    %29 = tpu.matmul %24, %28, %cst_15 {dimension_numbers = #tpu.dot_dimension_numbers<[1], [0], [0], [1], [0, 0, 1, 1], [], []>} : vector<16x32xf32>, vector<32x8xf32>, vector<16x8xf32> -> vector<16x8xf32>
    %c0_16 = arith.constant 0 : index
    %c0_17 = arith.constant 0 : index
    %c0_18 = arith.constant 0 : index
    %30 = vector.load %arg6[%c0_16, %c0_17, %c0_18] : memref<8x1x8xf32, #tpu.memory_space<vmem>>, vector<1x1x8xf32>
    %31 = vector.shape_cast %30 : vector<1x1x8xf32> to vector<1x8xf32>
    %32 = vector.broadcast %31 : vector<1x8xf32> to vector<16x8xf32>
    %33 = arith.addf %29, %32 : vector<16x8xf32>
    %c0_19 = arith.constant 0 : index
    %c0_20 = arith.constant 0 : index
    %c0_21 = arith.constant 0 : index
    %34 = vector.load %arg7[%c0_19, %c0_20, %c0_21] : memref<8x32x8xf32, #tpu.memory_space<vmem>>, vector<1x32x8xf32>
    %35 = vector.shape_cast %34 : vector<1x32x8xf32> to vector<32x8xf32>
    %cst_22 = arith.constant dense<0.000000e+00> : vector<16x8xf32>
    %36 = tpu.matmul %24, %35, %cst_22 {dimension_numbers = #tpu.dot_dimension_numbers<[1], [0], [0], [1], [0, 0, 1, 1], [], []>} : vector<16x32xf32>, vector<32x8xf32>, vector<16x8xf32> -> vector<16x8xf32>
    %c0_23 = arith.constant 0 : index
    %c0_24 = arith.constant 0 : index
    %c0_25 = arith.constant 0 : index
    %37 = vector.load %arg8[%c0_23, %c0_24, %c0_25] : memref<8x1x8xf32, #tpu.memory_space<vmem>>, vector<1x1x8xf32>
    %38 = vector.shape_cast %37 : vector<1x1x8xf32> to vector<1x8xf32>
    %39 = vector.broadcast %38 : vector<1x8xf32> to vector<16x8xf32>
    %40 = arith.addf %36, %39 : vector<16x8xf32>
    %c0_26 = arith.constant 0 : index
    %c0_27 = arith.constant 0 : index
    %c0_28 = arith.constant 0 : index
    %41 = vector.load %arg9[%c0_26, %c0_27, %c0_28] : memref<8x32x8xf32, #tpu.memory_space<vmem>>, vector<1x32x8xf32>
    %42 = vector.shape_cast %41 : vector<1x32x8xf32> to vector<32x8xf32>
    %cst_29 = arith.constant dense<0.000000e+00> : vector<16x8xf32>
    %43 = tpu.matmul %24, %42, %cst_29 {dimension_numbers = #tpu.dot_dimension_numbers<[1], [0], [0], [1], [0, 0, 1, 1], [], []>} : vector<16x32xf32>, vector<32x8xf32>, vector<16x8xf32> -> vector<16x8xf32>
    %c0_30 = arith.constant 0 : index
    %c0_31 = arith.constant 0 : index
    %c0_32 = arith.constant 0 : index
    %44 = vector.load %arg10[%c0_30, %c0_31, %c0_32] : memref<8x1x8xf32, #tpu.memory_space<vmem>>, vector<1x1x8xf32>
    %45 = vector.shape_cast %44 : vector<1x1x8xf32> to vector<1x8xf32>
    %46 = vector.broadcast %45 : vector<1x8xf32> to vector<16x8xf32>
    %47 = arith.addf %43, %46 : vector<16x8xf32>
    "tpu.trace_start"() <{level = 10 : i32, message = "qd,kd->qk"}> : () -> ()
    %cst_33 = arith.constant dense<0.000000e+00> : vector<16x16xf32>
    %48 = tpu.matmul %33, %40, %cst_33 {dimension_numbers = #tpu.dot_dimension_numbers<[1], [1], [0], [0], [0, 0, 1, 0], [], []>} : vector<16x8xf32>, vector<16x8xf32>, vector<16x16xf32> -> vector<16x16xf32>
    "tpu.trace_stop"() : () -> ()
    %49 = arith.addf %48, %25 : vector<16x16xf32>
    %cst_34 = arith.constant dense<0xFF800000> : vector<16xf32>
    %50 = vector.multi_reduction <maximumf>, %49, %cst_34 [1] : vector<16x16xf32> to vector<16xf32>
    %51 = vector.shape_cast %50 : vector<16xf32> to vector<16x1xf32>
    %52 = vector.broadcast %51 : vector<16x1xf32> to vector<16x16xf32>
    %53 = arith.subf %49, %52 : vector<16x16xf32>
    %54 = math.exp %53 : vector<16x16xf32>
    %cst_35 = arith.constant dense<0.000000e+00> : vector<16xf32>
    %55 = vector.multi_reduction <add>, %54, %cst_35 [1] : vector<16x16xf32> to vector<16xf32>
    %56 = vector.shape_cast %55 : vector<16xf32> to vector<16x1xf32>
    %57 = tpu.reciprocal %56 {approx = true} : vector<16x1xf32> -> vector<16x1xf32>
    %58 = vector.broadcast %57 : vector<16x1xf32> to vector<16x16xf32>
    %59 = arith.mulf %54, %58 : vector<16x16xf32>
    %cst_36 = arith.constant dense<0.000000e+00> : vector<16x8xf32>
    %60 = tpu.matmul %59, %47, %cst_36 {dimension_numbers = #tpu.dot_dimension_numbers<[1], [0], [0], [1], [0, 0, 1, 1], [], []>} : vector<16x16xf32>, vector<16x8xf32>, vector<16x8xf32> -> vector<16x8xf32>
    %c0_37 = arith.constant 0 : index
    %c0_38 = arith.constant 0 : index
    %c0_39 = arith.constant 0 : index
    %61 = vector.load %arg11[%c0_37, %c0_38, %c0_39] : memref<8x8x32xf32, #tpu.memory_space<vmem>>, vector<1x8x32xf32>
    %62 = vector.shape_cast %61 : vector<1x8x32xf32> to vector<8x32xf32>
    %cst_40 = arith.constant dense<0.000000e+00> : vector<16x32xf32>
    %63 = tpu.matmul %60, %62, %cst_40 {dimension_numbers = #tpu.dot_dimension_numbers<[1], [0], [0], [1], [0, 0, 1, 1], [], []>} : vector<16x8xf32>, vector<8x32xf32>, vector<16x32xf32> -> vector<16x32xf32>
    %64 = arith.addf %26, %63 : vector<16x32xf32>
    %c1 = arith.constant 1 : index
    %c0_41 = arith.constant 0 : index
    %c0_42 = arith.constant 0 : index
    %65 = vector.load %arg5[%c1, %c0_41, %c0_42] : memref<8x32x8xf32, #tpu.memory_space<vmem>>, vector<1x32x8xf32>
    %66 = vector.shape_cast %65 : vector<1x32x8xf32> to vector<32x8xf32>
    %cst_43 = arith.constant dense<0.000000e+00> : vector<16x8xf32>
    %67 = tpu.matmul %24, %66, %cst_43 {dimension_numbers = #tpu.dot_dimension_numbers<[1], [0], [0], [1], [0, 0, 1, 1], [], []>} : vector<16x32xf32>, vector<32x8xf32>, vector<16x8xf32> -> vector<16x8xf32>
    %c1_44 = arith.constant 1 : index
    %c0_45 = arith.constant 0 : index
    %c0_46 = arith.constant 0 : index
    %68 = vector.load %arg6[%c1_44, %c0_45, %c0_46] : memref<8x1x8xf32, #tpu.memory_space<vmem>>, vector<1x1x8xf32>
    %69 = vector.shape_cast %68 : vector<1x1x8xf32> to vector<1x8xf32>
    %70 = vector.broadcast %69 : vector<1x8xf32> to vector<16x8xf32>
    %71 = arith.addf %67, %70 : vector<16x8xf32>
    %c1_47 = arith.constant 1 : index
    %c0_48 = arith.constant 0 : index
    %c0_49 = arith.constant 0 : index
    %72 = vector.load %arg7[%c1_47, %c0_48, %c0_49] : memref<8x32x8xf32, #tpu.memory_space<vmem>>, vector<1x32x8xf32>
    %73 = vector.shape_cast %72 : vector<1x32x8xf32> to vector<32x8xf32>
    %cst_50 = arith.constant dense<0.000000e+00> : vector<16x8xf32>
    %74 = tpu.matmul %24, %73, %cst_50 {dimension_numbers = #tpu.dot_dimension_numbers<[1], [0], [0], [1], [0, 0, 1, 1], [], []>} : vector<16x32xf32>, vector<32x8xf32>, vector<16x8xf32> -> vector<16x8xf32>
    %c1_51 = arith.constant 1 : index
    %c0_52 = arith.constant 0 : index
    %c0_53 = arith.constant 0 : index
    %75 = vector.load %arg8[%c1_51, %c0_52, %c0_53] : memref<8x1x8xf32, #tpu.memory_space<vmem>>, vector<1x1x8xf32>
    %76 = vector.shape_cast %75 : vector<1x1x8xf32> to vector<1x8xf32>
    %77 = vector.broadcast %76 : vector<1x8xf32> to vector<16x8xf32>
    %78 = arith.addf %74, %77 : vector<16x8xf32>
    %c1_54 = arith.constant 1 : index
    %c0_55 = arith.constant 0 : index
    %c0_56 = arith.constant 0 : index
    %79 = vector.load %arg9[%c1_54, %c0_55, %c0_56] : memref<8x32x8xf32, #tpu.memory_space<vmem>>, vector<1x32x8xf32>
    %80 = vector.shape_cast %79 : vector<1x32x8xf32> to vector<32x8xf32>
    %cst_57 = arith.constant dense<0.000000e+00> : vector<16x8xf32>
    %81 = tpu.matmul %24, %80, %cst_57 {dimension_numbers = #tpu.dot_dimension_numbers<[1], [0], [0], [1], [0, 0, 1, 1], [], []>} : vector<16x32xf32>, vector<32x8xf32>, vector<16x8xf32> -> vector<16x8xf32>
    %c1_58 = arith.constant 1 : index
    %c0_59 = arith.constant 0 : index
    %c0_60 = arith.constant 0 : index
    %82 = vector.load %arg10[%c1_58, %c0_59, %c0_60] : memref<8x1x8xf32, #tpu.memory_space<vmem>>, vector<1x1x8xf32>
    %83 = vector.shape_cast %82 : vector<1x1x8xf32> to vector<1x8xf32>
    %84 = vector.broadcast %83 : vector<1x8xf32> to vector<16x8xf32>
    %85 = arith.addf %81, %84 : vector<16x8xf32>
    "tpu.trace_start"() <{level = 10 : i32, message = "qd,kd->qk"}> : () -> ()
    %cst_61 = arith.constant dense<0.000000e+00> : vector<16x16xf32>
    %86 = tpu.matmul %71, %78, %cst_61 {dimension_numbers = #tpu.dot_dimension_numbers<[1], [1], [0], [0], [0, 0, 1, 0], [], []>} : vector<16x8xf32>, vector<16x8xf32>, vector<16x16xf32> -> vector<16x16xf32>
    "tpu.trace_stop"() : () -> ()
    %87 = arith.addf %86, %25 : vector<16x16xf32>
    %cst_62 = arith.constant dense<0xFF800000> : vector<16xf32>
    %88 = vector.multi_reduction <maximumf>, %87, %cst_62 [1] : vector<16x16xf32> to vector<16xf32>
    %89 = vector.shape_cast %88 : vector<16xf32> to vector<16x1xf32>
    %90 = vector.broadcast %89 : vector<16x1xf32> to vector<16x16xf32>
    %91 = arith.subf %87, %90 : vector<16x16xf32>
    %92 = math.exp %91 : vector<16x16xf32>
    %cst_63 = arith.constant dense<0.000000e+00> : vector<16xf32>
    %93 = vector.multi_reduction <add>, %92, %cst_63 [1] : vector<16x16xf32> to vector<16xf32>
    %94 = vector.shape_cast %93 : vector<16xf32> to vector<16x1xf32>
    %95 = tpu.reciprocal %94 {approx = true} : vector<16x1xf32> -> vector<16x1xf32>
    %96 = vector.broadcast %95 : vector<16x1xf32> to vector<16x16xf32>
    %97 = arith.mulf %92, %96 : vector<16x16xf32>
    %cst_64 = arith.constant dense<0.000000e+00> : vector<16x8xf32>
    %98 = tpu.matmul %97, %85, %cst_64 {dimension_numbers = #tpu.dot_dimension_numbers<[1], [0], [0], [1], [0, 0, 1, 1], [], []>} : vector<16x16xf32>, vector<16x8xf32>, vector<16x8xf32> -> vector<16x8xf32>
    %c1_65 = arith.constant 1 : index
    %c0_66 = arith.constant 0 : index
    %c0_67 = arith.constant 0 : index
    %99 = vector.load %arg11[%c1_65, %c0_66, %c0_67] : memref<8x8x32xf32, #tpu.memory_space<vmem>>, vector<1x8x32xf32>
    %100 = vector.shape_cast %99 : vector<1x8x32xf32> to vector<8x32xf32>
    %cst_68 = arith.constant dense<0.000000e+00> : vector<16x32xf32>
    %101 = tpu.matmul %98, %100, %cst_68 {dimension_numbers = #tpu.dot_dimension_numbers<[1], [0], [0], [1], [0, 0, 1, 1], [], []>} : vector<16x8xf32>, vector<8x32xf32>, vector<16x32xf32> -> vector<16x32xf32>
    %102 = arith.addf %64, %101 : vector<16x32xf32>
    %c2 = arith.constant 2 : index
    %c0_69 = arith.constant 0 : index
    %c0_70 = arith.constant 0 : index
    %103 = vector.load %arg5[%c2, %c0_69, %c0_70] : memref<8x32x8xf32, #tpu.memory_space<vmem>>, vector<1x32x8xf32>
    %104 = vector.shape_cast %103 : vector<1x32x8xf32> to vector<32x8xf32>
    %cst_71 = arith.constant dense<0.000000e+00> : vector<16x8xf32>
    %105 = tpu.matmul %24, %104, %cst_71 {dimension_numbers = #tpu.dot_dimension_numbers<[1], [0], [0], [1], [0, 0, 1, 1], [], []>} : vector<16x32xf32>, vector<32x8xf32>, vector<16x8xf32> -> vector<16x8xf32>
    %c2_72 = arith.constant 2 : index
    %c0_73 = arith.constant 0 : index
    %c0_74 = arith.constant 0 : index
    %106 = vector.load %arg6[%c2_72, %c0_73, %c0_74] : memref<8x1x8xf32, #tpu.memory_space<vmem>>, vector<1x1x8xf32>
    %107 = vector.shape_cast %106 : vector<1x1x8xf32> to vector<1x8xf32>
    %108 = vector.broadcast %107 : vector<1x8xf32> to vector<16x8xf32>
    %109 = arith.addf %105, %108 : vector<16x8xf32>
    %c2_75 = arith.constant 2 : index
    %c0_76 = arith.constant 0 : index
    %c0_77 = arith.constant 0 : index
    %110 = vector.load %arg7[%c2_75, %c0_76, %c0_77] : memref<8x32x8xf32, #tpu.memory_space<vmem>>, vector<1x32x8xf32>
    %111 = vector.shape_cast %110 : vector<1x32x8xf32> to vector<32x8xf32>
    %cst_78 = arith.constant dense<0.000000e+00> : vector<16x8xf32>
    %112 = tpu.matmul %24, %111, %cst_78 {dimension_numbers = #tpu.dot_dimension_numbers<[1], [0], [0], [1], [0, 0, 1, 1], [], []>} : vector<16x32xf32>, vector<32x8xf32>, vector<16x8xf32> -> vector<16x8xf32>
    %c2_79 = arith.constant 2 : index
    %c0_80 = arith.constant 0 : index
    %c0_81 = arith.constant 0 : index
    %113 = vector.load %arg8[%c2_79, %c0_80, %c0_81] : memref<8x1x8xf32, #tpu.memory_space<vmem>>, vector<1x1x8xf32>
    %114 = vector.shape_cast %113 : vector<1x1x8xf32> to vector<1x8xf32>
    %115 = vector.broadcast %114 : vector<1x8xf32> to vector<16x8xf32>
    %116 = arith.addf %112, %115 : vector<16x8xf32>
    %c2_82 = arith.constant 2 : index
    %c0_83 = arith.constant 0 : index
    %c0_84 = arith.constant 0 : index
    %117 = vector.load %arg9[%c2_82, %c0_83, %c0_84] : memref<8x32x8xf32, #tpu.memory_space<vmem>>, vector<1x32x8xf32>
    %118 = vector.shape_cast %117 : vector<1x32x8xf32> to vector<32x8xf32>
    %cst_85 = arith.constant dense<0.000000e+00> : vector<16x8xf32>
    %119 = tpu.matmul %24, %118, %cst_85 {dimension_numbers = #tpu.dot_dimension_numbers<[1], [0], [0], [1], [0, 0, 1, 1], [], []>} : vector<16x32xf32>, vector<32x8xf32>, vector<16x8xf32> -> vector<16x8xf32>
    %c2_86 = arith.constant 2 : index
    %c0_87 = arith.constant 0 : index
    %c0_88 = arith.constant 0 : index
    %120 = vector.load %arg10[%c2_86, %c0_87, %c0_88] : memref<8x1x8xf32, #tpu.memory_space<vmem>>, vector<1x1x8xf32>
    %121 = vector.shape_cast %120 : vector<1x1x8xf32> to vector<1x8xf32>
    %122 = vector.broadcast %121 : vector<1x8xf32> to vector<16x8xf32>
    %123 = arith.addf %119, %122 : vector<16x8xf32>
    "tpu.trace_start"() <{level = 10 : i32, message = "qd,kd->qk"}> : () -> ()
    %cst_89 = arith.constant dense<0.000000e+00> : vector<16x16xf32>
    %124 = tpu.matmul %109, %116, %cst_89 {dimension_numbers = #tpu.dot_dimension_numbers<[1], [1], [0], [0], [0, 0, 1, 0], [], []>} : vector<16x8xf32>, vector<16x8xf32>, vector<16x16xf32> -> vector<16x16xf32>
    "tpu.trace_stop"() : () -> ()
    %125 = arith.addf %124, %25 : vector<16x16xf32>
    %cst_90 = arith.constant dense<0xFF800000> : vector<16xf32>
    %126 = vector.multi_reduction <maximumf>, %125, %cst_90 [1] : vector<16x16xf32> to vector<16xf32>
    %127 = vector.shape_cast %126 : vector<16xf32> to vector<16x1xf32>
    %128 = vector.broadcast %127 : vector<16x1xf32> to vector<16x16xf32>
    %129 = arith.subf %125, %128 : vector<16x16xf32>
    %130 = math.exp %129 : vector<16x16xf32>
    %cst_91 = arith.constant dense<0.000000e+00> : vector<16xf32>
    %131 = vector.multi_reduction <add>, %130, %cst_91 [1] : vector<16x16xf32> to vector<16xf32>
    %132 = vector.shape_cast %131 : vector<16xf32> to vector<16x1xf32>
    %133 = tpu.reciprocal %132 {approx = true} : vector<16x1xf32> -> vector<16x1xf32>
    %134 = vector.broadcast %133 : vector<16x1xf32> to vector<16x16xf32>
    %135 = arith.mulf %130, %134 : vector<16x16xf32>
    %cst_92 = arith.constant dense<0.000000e+00> : vector<16x8xf32>
    %136 = tpu.matmul %135, %123, %cst_92 {dimension_numbers = #tpu.dot_dimension_numbers<[1], [0], [0], [1], [0, 0, 1, 1], [], []>} : vector<16x16xf32>, vector<16x8xf32>, vector<16x8xf32> -> vector<16x8xf32>
    %c2_93 = arith.constant 2 : index
    %c0_94 = arith.constant 0 : index
    %c0_95 = arith.constant 0 : index
    %137 = vector.load %arg11[%c2_93, %c0_94, %c0_95] : memref<8x8x32xf32, #tpu.memory_space<vmem>>, vector<1x8x32xf32>
    %138 = vector.shape_cast %137 : vector<1x8x32xf32> to vector<8x32xf32>
    %cst_96 = arith.constant dense<0.000000e+00> : vector<16x32xf32>
    %139 = tpu.matmul %136, %138, %cst_96 {dimension_numbers = #tpu.dot_dimension_numbers<[1], [0], [0], [1], [0, 0, 1, 1], [], []>} : vector<16x8xf32>, vector<8x32xf32>, vector<16x32xf32> -> vector<16x32xf32>
    %140 = arith.addf %102, %139 : vector<16x32xf32>
    %c3 = arith.constant 3 : index
    %c0_97 = arith.constant 0 : index
    %c0_98 = arith.constant 0 : index
    %141 = vector.load %arg5[%c3, %c0_97, %c0_98] : memref<8x32x8xf32, #tpu.memory_space<vmem>>, vector<1x32x8xf32>
    %142 = vector.shape_cast %141 : vector<1x32x8xf32> to vector<32x8xf32>
    %cst_99 = arith.constant dense<0.000000e+00> : vector<16x8xf32>
    %143 = tpu.matmul %24, %142, %cst_99 {dimension_numbers = #tpu.dot_dimension_numbers<[1], [0], [0], [1], [0, 0, 1, 1], [], []>} : vector<16x32xf32>, vector<32x8xf32>, vector<16x8xf32> -> vector<16x8xf32>
    %c3_100 = arith.constant 3 : index
    %c0_101 = arith.constant 0 : index
    %c0_102 = arith.constant 0 : index
    %144 = vector.load %arg6[%c3_100, %c0_101, %c0_102] : memref<8x1x8xf32, #tpu.memory_space<vmem>>, vector<1x1x8xf32>
    %145 = vector.shape_cast %144 : vector<1x1x8xf32> to vector<1x8xf32>
    %146 = vector.broadcast %145 : vector<1x8xf32> to vector<16x8xf32>
    %147 = arith.addf %143, %146 : vector<16x8xf32>
    %c3_103 = arith.constant 3 : index
    %c0_104 = arith.constant 0 : index
    %c0_105 = arith.constant 0 : index
    %148 = vector.load %arg7[%c3_103, %c0_104, %c0_105] : memref<8x32x8xf32, #tpu.memory_space<vmem>>, vector<1x32x8xf32>
    %149 = vector.shape_cast %148 : vector<1x32x8xf32> to vector<32x8xf32>
    %cst_106 = arith.constant dense<0.000000e+00> : vector<16x8xf32>
    %150 = tpu.matmul %24, %149, %cst_106 {dimension_numbers = #tpu.dot_dimension_numbers<[1], [0], [0], [1], [0, 0, 1, 1], [], []>} : vector<16x32xf32>, vector<32x8xf32>, vector<16x8xf32> -> vector<16x8xf32>
    %c3_107 = arith.constant 3 : index
    %c0_108 = arith.constant 0 : index
    %c0_109 = arith.constant 0 : index
    %151 = vector.load %arg8[%c3_107, %c0_108, %c0_109] : memref<8x1x8xf32, #tpu.memory_space<vmem>>, vector<1x1x8xf32>
    %152 = vector.shape_cast %151 : vector<1x1x8xf32> to vector<1x8xf32>
    %153 = vector.broadcast %152 : vector<1x8xf32> to vector<16x8xf32>
    %154 = arith.addf %150, %153 : vector<16x8xf32>
    %c3_110 = arith.constant 3 : index
    %c0_111 = arith.constant 0 : index
    %c0_112 = arith.constant 0 : index
    %155 = vector.load %arg9[%c3_110, %c0_111, %c0_112] : memref<8x32x8xf32, #tpu.memory_space<vmem>>, vector<1x32x8xf32>
    %156 = vector.shape_cast %155 : vector<1x32x8xf32> to vector<32x8xf32>
    %cst_113 = arith.constant dense<0.000000e+00> : vector<16x8xf32>
    %157 = tpu.matmul %24, %156, %cst_113 {dimension_numbers = #tpu.dot_dimension_numbers<[1], [0], [0], [1], [0, 0, 1, 1], [], []>} : vector<16x32xf32>, vector<32x8xf32>, vector<16x8xf32> -> vector<16x8xf32>
    %c3_114 = arith.constant 3 : index
    %c0_115 = arith.constant 0 : index
    %c0_116 = arith.constant 0 : index
    %158 = vector.load %arg10[%c3_114, %c0_115, %c0_116] : memref<8x1x8xf32, #tpu.memory_space<vmem>>, vector<1x1x8xf32>
    %159 = vector.shape_cast %158 : vector<1x1x8xf32> to vector<1x8xf32>
    %160 = vector.broadcast %159 : vector<1x8xf32> to vector<16x8xf32>
    %161 = arith.addf %157, %160 : vector<16x8xf32>
    "tpu.trace_start"() <{level = 10 : i32, message = "qd,kd->qk"}> : () -> ()
    %cst_117 = arith.constant dense<0.000000e+00> : vector<16x16xf32>
    %162 = tpu.matmul %147, %154, %cst_117 {dimension_numbers = #tpu.dot_dimension_numbers<[1], [1], [0], [0], [0, 0, 1, 0], [], []>} : vector<16x8xf32>, vector<16x8xf32>, vector<16x16xf32> -> vector<16x16xf32>
    "tpu.trace_stop"() : () -> ()
    %163 = arith.addf %162, %25 : vector<16x16xf32>
    %cst_118 = arith.constant dense<0xFF800000> : vector<16xf32>
    %164 = vector.multi_reduction <maximumf>, %163, %cst_118 [1] : vector<16x16xf32> to vector<16xf32>
    %165 = vector.shape_cast %164 : vector<16xf32> to vector<16x1xf32>
    %166 = vector.broadcast %165 : vector<16x1xf32> to vector<16x16xf32>
    %167 = arith.subf %163, %166 : vector<16x16xf32>
    %168 = math.exp %167 : vector<16x16xf32>
    %cst_119 = arith.constant dense<0.000000e+00> : vector<16xf32>
    %169 = vector.multi_reduction <add>, %168, %cst_119 [1] : vector<16x16xf32> to vector<16xf32>
    %170 = vector.shape_cast %169 : vector<16xf32> to vector<16x1xf32>
    %171 = tpu.reciprocal %170 {approx = true} : vector<16x1xf32> -> vector<16x1xf32>
    %172 = vector.broadcast %171 : vector<16x1xf32> to vector<16x16xf32>
    %173 = arith.mulf %168, %172 : vector<16x16xf32>
    %cst_120 = arith.constant dense<0.000000e+00> : vector<16x8xf32>
    %174 = tpu.matmul %173, %161, %cst_120 {dimension_numbers = #tpu.dot_dimension_numbers<[1], [0], [0], [1], [0, 0, 1, 1], [], []>} : vector<16x16xf32>, vector<16x8xf32>, vector<16x8xf32> -> vector<16x8xf32>
    %c3_121 = arith.constant 3 : index
    %c0_122 = arith.constant 0 : index
    %c0_123 = arith.constant 0 : index
    %175 = vector.load %arg11[%c3_121, %c0_122, %c0_123] : memref<8x8x32xf32, #tpu.memory_space<vmem>>, vector<1x8x32xf32>
    %176 = vector.shape_cast %175 : vector<1x8x32xf32> to vector<8x32xf32>
    %cst_124 = arith.constant dense<0.000000e+00> : vector<16x32xf32>
    %177 = tpu.matmul %174, %176, %cst_124 {dimension_numbers = #tpu.dot_dimension_numbers<[1], [0], [0], [1], [0, 0, 1, 1], [], []>} : vector<16x8xf32>, vector<8x32xf32>, vector<16x32xf32> -> vector<16x32xf32>
    %178 = arith.addf %140, %177 : vector<16x32xf32>
    %179 = arith.addf %24, %178 : vector<16x32xf32>
    %c0_125 = arith.constant 0 : index
    %c0_126 = arith.constant 0 : index
    %c0_127 = arith.constant 0 : index
    %180 = vector.load %arg12[%c0_125, %c0_126, %c0_127] : memref<2x1x32xf32, #tpu.memory_space<vmem>>, vector<1x1x32xf32>
    %181 = vector.shape_cast %180 : vector<1x1x32xf32> to vector<1x32xf32>
    %182 = vector.broadcast %181 : vector<1x32xf32> to vector<16x32xf32>
    %183 = arith.addf %179, %182 : vector<16x32xf32>
    %c0_128 = arith.constant 0 : index
    %c0_129 = arith.constant 0 : index
    %c0_130 = arith.constant 0 : index
    %184 = vector.load %arg13[%c0_128, %c0_129, %c0_130] : memref<2x1x32xf32, #tpu.memory_space<vmem>>, vector<1x1x32xf32>
    %185 = vector.shape_cast %184 : vector<1x1x32xf32> to vector<1x32xf32>
    %c0_131 = arith.constant 0 : index
    %c0_132 = arith.constant 0 : index
    %c0_133 = arith.constant 0 : index
    %186 = vector.load %arg14[%c0_131, %c0_132, %c0_133] : memref<2x1x32xf32, #tpu.memory_space<vmem>>, vector<1x1x32xf32>
    %187 = vector.shape_cast %186 : vector<1x1x32xf32> to vector<1x32xf32>
    %cst_134 = arith.constant dense<0.000000e+00> : vector<16xf32>
    %188 = vector.multi_reduction <add>, %183, %cst_134 [1] : vector<16x32xf32> to vector<16xf32>
    %189 = vector.shape_cast %188 : vector<16xf32> to vector<16x1xf32>
    %cst_135 = arith.constant 3.200000e+01 : f32
    %190 = vector.broadcast %cst_135 : f32 to vector<16x1xf32>
    %191 = arith.divf %189, %190 : vector<16x1xf32>
    %192 = vector.broadcast %191 : vector<16x1xf32> to vector<16x32xf32>
    %193 = arith.subf %183, %192 : vector<16x32xf32>
    %194 = arith.mulf %193, %193 : vector<16x32xf32>
    %cst_136 = arith.constant dense<0.000000e+00> : vector<16xf32>
    %195 = vector.multi_reduction <add>, %194, %cst_136 [1] : vector<16x32xf32> to vector<16xf32>
    %196 = vector.shape_cast %195 : vector<16xf32> to vector<16x1xf32>
    %cst_137 = arith.constant 3.200000e+01 : f32
    %197 = vector.broadcast %cst_137 : f32 to vector<16x1xf32>
    %198 = arith.divf %196, %197 : vector<16x1xf32>
    %199 = vector.broadcast %191 : vector<16x1xf32> to vector<16x32xf32>
    %200 = arith.subf %183, %199 : vector<16x32xf32>
    %cst_138 = arith.constant 9.99999996E-13 : f32
    %201 = vector.broadcast %cst_138 : f32 to vector<16x1xf32>
    %202 = arith.addf %198, %201 : vector<16x1xf32>
    %203 = math.rsqrt %202 : vector<16x1xf32>
    %204 = vector.broadcast %203 : vector<16x1xf32> to vector<16x32xf32>
    %205 = arith.mulf %200, %204 : vector<16x32xf32>
    %206 = vector.broadcast %185 : vector<1x32xf32> to vector<16x32xf32>
    %207 = arith.mulf %205, %206 : vector<16x32xf32>
    %208 = vector.broadcast %187 : vector<1x32xf32> to vector<16x32xf32>
    %209 = arith.addf %207, %208 : vector<16x32xf32>
    %c0_139 = arith.constant 0 : index
    %c0_140 = arith.constant 0 : index
    %c0_141 = arith.constant 0 : index
    %210 = vector.load %arg15[%c0_139, %c0_140, %c0_141] : memref<2x32x64xf32, #tpu.memory_space<vmem>>, vector<1x32x64xf32>
    %211 = vector.shape_cast %210 : vector<1x32x64xf32> to vector<32x64xf32>
    %cst_142 = arith.constant dense<0.000000e+00> : vector<16x64xf32>
    %212 = tpu.matmul %209, %211, %cst_142 {dimension_numbers = #tpu.dot_dimension_numbers<[1], [0], [0], [1], [0, 0, 1, 1], [], []>} : vector<16x32xf32>, vector<32x64xf32>, vector<16x64xf32> -> vector<16x64xf32>
    %c0_143 = arith.constant 0 : index
    %c0_144 = arith.constant 0 : index
    %c0_145 = arith.constant 0 : index
    %213 = vector.load %arg16[%c0_143, %c0_144, %c0_145] : memref<2x1x64xf32, #tpu.memory_space<vmem>>, vector<1x1x64xf32>
    %214 = vector.shape_cast %213 : vector<1x1x64xf32> to vector<1x64xf32>
    %215 = vector.broadcast %214 : vector<1x64xf32> to vector<16x64xf32>
    %216 = arith.addf %212, %215 : vector<16x64xf32>
    %217 = arith.mulf %216, %216 : vector<16x64xf32>
    %218 = arith.mulf %216, %217 : vector<16x64xf32>
    %cst_146 = arith.constant 4.471500e-02 : f32
    %219 = vector.broadcast %cst_146 : f32 to vector<16x64xf32>
    %220 = arith.mulf %219, %218 : vector<16x64xf32>
    %221 = arith.addf %216, %220 : vector<16x64xf32>
    %cst_147 = arith.constant 0.797884583 : f32
    %222 = vector.broadcast %cst_147 : f32 to vector<16x64xf32>
    %223 = arith.mulf %222, %221 : vector<16x64xf32>
    %224 = math.tanh %223 : vector<16x64xf32>
    %cst_148 = arith.constant 1.000000e+00 : f32
    %225 = vector.broadcast %cst_148 : f32 to vector<16x64xf32>
    %226 = arith.addf %225, %224 : vector<16x64xf32>
    %cst_149 = arith.constant 5.000000e-01 : f32
    %227 = vector.broadcast %cst_149 : f32 to vector<16x64xf32>
    %228 = arith.mulf %227, %226 : vector<16x64xf32>
    %229 = arith.mulf %216, %228 : vector<16x64xf32>
    %c0_150 = arith.constant 0 : index
    %c0_151 = arith.constant 0 : index
    %c0_152 = arith.constant 0 : index
    %230 = vector.load %arg17[%c0_150, %c0_151, %c0_152] : memref<2x64x32xf32, #tpu.memory_space<vmem>>, vector<1x64x32xf32>
    %231 = vector.shape_cast %230 : vector<1x64x32xf32> to vector<64x32xf32>
    %cst_153 = arith.constant dense<0.000000e+00> : vector<16x32xf32>
    %232 = tpu.matmul %229, %231, %cst_153 {dimension_numbers = #tpu.dot_dimension_numbers<[1], [0], [0], [1], [0, 0, 1, 1], [], []>} : vector<16x64xf32>, vector<64x32xf32>, vector<16x32xf32> -> vector<16x32xf32>
    %c0_154 = arith.constant 0 : index
    %c0_155 = arith.constant 0 : index
    %c0_156 = arith.constant 0 : index
    %233 = vector.load %arg18[%c0_154, %c0_155, %c0_156] : memref<2x1x32xf32, #tpu.memory_space<vmem>>, vector<1x1x32xf32>
    %234 = vector.shape_cast %233 : vector<1x1x32xf32> to vector<1x32xf32>
    %235 = vector.broadcast %234 : vector<1x32xf32> to vector<16x32xf32>
    %236 = arith.addf %232, %235 : vector<16x32xf32>
    %237 = arith.addf %209, %236 : vector<16x32xf32>
    %c0_157 = arith.constant 0 : index
    %c0_158 = arith.constant 0 : index
    %c0_159 = arith.constant 0 : index
    %238 = vector.load %arg19[%c0_157, %c0_158, %c0_159] : memref<2x1x32xf32, #tpu.memory_space<vmem>>, vector<1x1x32xf32>
    %239 = vector.shape_cast %238 : vector<1x1x32xf32> to vector<1x32xf32>
    %c0_160 = arith.constant 0 : index
    %c0_161 = arith.constant 0 : index
    %c0_162 = arith.constant 0 : index
    %240 = vector.load %arg20[%c0_160, %c0_161, %c0_162] : memref<2x1x32xf32, #tpu.memory_space<vmem>>, vector<1x1x32xf32>
    %241 = vector.shape_cast %240 : vector<1x1x32xf32> to vector<1x32xf32>
    %cst_163 = arith.constant dense<0.000000e+00> : vector<16xf32>
    %242 = vector.multi_reduction <add>, %237, %cst_163 [1] : vector<16x32xf32> to vector<16xf32>
    %243 = vector.shape_cast %242 : vector<16xf32> to vector<16x1xf32>
    %cst_164 = arith.constant 3.200000e+01 : f32
    %244 = vector.broadcast %cst_164 : f32 to vector<16x1xf32>
    %245 = arith.divf %243, %244 : vector<16x1xf32>
    %246 = vector.broadcast %245 : vector<16x1xf32> to vector<16x32xf32>
    %247 = arith.subf %237, %246 : vector<16x32xf32>
    %248 = arith.mulf %247, %247 : vector<16x32xf32>
    %cst_165 = arith.constant dense<0.000000e+00> : vector<16xf32>
    %249 = vector.multi_reduction <add>, %248, %cst_165 [1] : vector<16x32xf32> to vector<16xf32>
    %250 = vector.shape_cast %249 : vector<16xf32> to vector<16x1xf32>
    %cst_166 = arith.constant 3.200000e+01 : f32
    %251 = vector.broadcast %cst_166 : f32 to vector<16x1xf32>
    %252 = arith.divf %250, %251 : vector<16x1xf32>
    %253 = vector.broadcast %245 : vector<16x1xf32> to vector<16x32xf32>
    %254 = arith.subf %237, %253 : vector<16x32xf32>
    %cst_167 = arith.constant 9.99999996E-13 : f32
    %255 = vector.broadcast %cst_167 : f32 to vector<16x1xf32>
    %256 = arith.addf %252, %255 : vector<16x1xf32>
    %257 = math.rsqrt %256 : vector<16x1xf32>
    %258 = vector.broadcast %257 : vector<16x1xf32> to vector<16x32xf32>
    %259 = arith.mulf %254, %258 : vector<16x32xf32>
    %260 = vector.broadcast %239 : vector<1x32xf32> to vector<16x32xf32>
    %261 = arith.mulf %259, %260 : vector<16x32xf32>
    %262 = vector.broadcast %241 : vector<1x32xf32> to vector<16x32xf32>
    %263 = arith.addf %261, %262 : vector<16x32xf32>
    %cst_168 = arith.constant 0.000000e+00 : f32
    %264 = vector.broadcast %cst_168 : f32 to vector<16x32xf32>
    %c4 = arith.constant 4 : index
    %c0_169 = arith.constant 0 : index
    %c0_170 = arith.constant 0 : index
    %265 = vector.load %arg5[%c4, %c0_169, %c0_170] : memref<8x32x8xf32, #tpu.memory_space<vmem>>, vector<1x32x8xf32>
    %266 = vector.shape_cast %265 : vector<1x32x8xf32> to vector<32x8xf32>
    %cst_171 = arith.constant dense<0.000000e+00> : vector<16x8xf32>
    %267 = tpu.matmul %263, %266, %cst_171 {dimension_numbers = #tpu.dot_dimension_numbers<[1], [0], [0], [1], [0, 0, 1, 1], [], []>} : vector<16x32xf32>, vector<32x8xf32>, vector<16x8xf32> -> vector<16x8xf32>
    %c4_172 = arith.constant 4 : index
    %c0_173 = arith.constant 0 : index
    %c0_174 = arith.constant 0 : index
    %268 = vector.load %arg6[%c4_172, %c0_173, %c0_174] : memref<8x1x8xf32, #tpu.memory_space<vmem>>, vector<1x1x8xf32>
    %269 = vector.shape_cast %268 : vector<1x1x8xf32> to vector<1x8xf32>
    %270 = vector.broadcast %269 : vector<1x8xf32> to vector<16x8xf32>
    %271 = arith.addf %267, %270 : vector<16x8xf32>
    %c4_175 = arith.constant 4 : index
    %c0_176 = arith.constant 0 : index
    %c0_177 = arith.constant 0 : index
    %272 = vector.load %arg7[%c4_175, %c0_176, %c0_177] : memref<8x32x8xf32, #tpu.memory_space<vmem>>, vector<1x32x8xf32>
    %273 = vector.shape_cast %272 : vector<1x32x8xf32> to vector<32x8xf32>
    %cst_178 = arith.constant dense<0.000000e+00> : vector<16x8xf32>
    %274 = tpu.matmul %263, %273, %cst_178 {dimension_numbers = #tpu.dot_dimension_numbers<[1], [0], [0], [1], [0, 0, 1, 1], [], []>} : vector<16x32xf32>, vector<32x8xf32>, vector<16x8xf32> -> vector<16x8xf32>
    %c4_179 = arith.constant 4 : index
    %c0_180 = arith.constant 0 : index
    %c0_181 = arith.constant 0 : index
    %275 = vector.load %arg8[%c4_179, %c0_180, %c0_181] : memref<8x1x8xf32, #tpu.memory_space<vmem>>, vector<1x1x8xf32>
    %276 = vector.shape_cast %275 : vector<1x1x8xf32> to vector<1x8xf32>
    %277 = vector.broadcast %276 : vector<1x8xf32> to vector<16x8xf32>
    %278 = arith.addf %274, %277 : vector<16x8xf32>
    %c4_182 = arith.constant 4 : index
    %c0_183 = arith.constant 0 : index
    %c0_184 = arith.constant 0 : index
    %279 = vector.load %arg9[%c4_182, %c0_183, %c0_184] : memref<8x32x8xf32, #tpu.memory_space<vmem>>, vector<1x32x8xf32>
    %280 = vector.shape_cast %279 : vector<1x32x8xf32> to vector<32x8xf32>
    %cst_185 = arith.constant dense<0.000000e+00> : vector<16x8xf32>
    %281 = tpu.matmul %263, %280, %cst_185 {dimension_numbers = #tpu.dot_dimension_numbers<[1], [0], [0], [1], [0, 0, 1, 1], [], []>} : vector<16x32xf32>, vector<32x8xf32>, vector<16x8xf32> -> vector<16x8xf32>
    %c4_186 = arith.constant 4 : index
    %c0_187 = arith.constant 0 : index
    %c0_188 = arith.constant 0 : index
    %282 = vector.load %arg10[%c4_186, %c0_187, %c0_188] : memref<8x1x8xf32, #tpu.memory_space<vmem>>, vector<1x1x8xf32>
    %283 = vector.shape_cast %282 : vector<1x1x8xf32> to vector<1x8xf32>
    %284 = vector.broadcast %283 : vector<1x8xf32> to vector<16x8xf32>
    %285 = arith.addf %281, %284 : vector<16x8xf32>
    "tpu.trace_start"() <{level = 10 : i32, message = "qd,kd->qk"}> : () -> ()
    %cst_189 = arith.constant dense<0.000000e+00> : vector<16x16xf32>
    %286 = tpu.matmul %271, %278, %cst_189 {dimension_numbers = #tpu.dot_dimension_numbers<[1], [1], [0], [0], [0, 0, 1, 0], [], []>} : vector<16x8xf32>, vector<16x8xf32>, vector<16x16xf32> -> vector<16x16xf32>
    "tpu.trace_stop"() : () -> ()
    %287 = arith.addf %286, %25 : vector<16x16xf32>
    %cst_190 = arith.constant dense<0xFF800000> : vector<16xf32>
    %288 = vector.multi_reduction <maximumf>, %287, %cst_190 [1] : vector<16x16xf32> to vector<16xf32>
    %289 = vector.shape_cast %288 : vector<16xf32> to vector<16x1xf32>
    %290 = vector.broadcast %289 : vector<16x1xf32> to vector<16x16xf32>
    %291 = arith.subf %287, %290 : vector<16x16xf32>
    %292 = math.exp %291 : vector<16x16xf32>
    %cst_191 = arith.constant dense<0.000000e+00> : vector<16xf32>
    %293 = vector.multi_reduction <add>, %292, %cst_191 [1] : vector<16x16xf32> to vector<16xf32>
    %294 = vector.shape_cast %293 : vector<16xf32> to vector<16x1xf32>
    %295 = tpu.reciprocal %294 {approx = true} : vector<16x1xf32> -> vector<16x1xf32>
    %296 = vector.broadcast %295 : vector<16x1xf32> to vector<16x16xf32>
    %297 = arith.mulf %292, %296 : vector<16x16xf32>
    %cst_192 = arith.constant dense<0.000000e+00> : vector<16x8xf32>
    %298 = tpu.matmul %297, %285, %cst_192 {dimension_numbers = #tpu.dot_dimension_numbers<[1], [0], [0], [1], [0, 0, 1, 1], [], []>} : vector<16x16xf32>, vector<16x8xf32>, vector<16x8xf32> -> vector<16x8xf32>
    %c4_193 = arith.constant 4 : index
    %c0_194 = arith.constant 0 : index
    %c0_195 = arith.constant 0 : index
    %299 = vector.load %arg11[%c4_193, %c0_194, %c0_195] : memref<8x8x32xf32, #tpu.memory_space<vmem>>, vector<1x8x32xf32>
    %300 = vector.shape_cast %299 : vector<1x8x32xf32> to vector<8x32xf32>
    %cst_196 = arith.constant dense<0.000000e+00> : vector<16x32xf32>
    %301 = tpu.matmul %298, %300, %cst_196 {dimension_numbers = #tpu.dot_dimension_numbers<[1], [0], [0], [1], [0, 0, 1, 1], [], []>} : vector<16x8xf32>, vector<8x32xf32>, vector<16x32xf32> -> vector<16x32xf32>
    %302 = arith.addf %264, %301 : vector<16x32xf32>
    %c5 = arith.constant 5 : index
    %c0_197 = arith.constant 0 : index
    %c0_198 = arith.constant 0 : index
    %303 = vector.load %arg5[%c5, %c0_197, %c0_198] : memref<8x32x8xf32, #tpu.memory_space<vmem>>, vector<1x32x8xf32>
    %304 = vector.shape_cast %303 : vector<1x32x8xf32> to vector<32x8xf32>
    %cst_199 = arith.constant dense<0.000000e+00> : vector<16x8xf32>
    %305 = tpu.matmul %263, %304, %cst_199 {dimension_numbers = #tpu.dot_dimension_numbers<[1], [0], [0], [1], [0, 0, 1, 1], [], []>} : vector<16x32xf32>, vector<32x8xf32>, vector<16x8xf32> -> vector<16x8xf32>
    %c5_200 = arith.constant 5 : index
    %c0_201 = arith.constant 0 : index
    %c0_202 = arith.constant 0 : index
    %306 = vector.load %arg6[%c5_200, %c0_201, %c0_202] : memref<8x1x8xf32, #tpu.memory_space<vmem>>, vector<1x1x8xf32>
    %307 = vector.shape_cast %306 : vector<1x1x8xf32> to vector<1x8xf32>
    %308 = vector.broadcast %307 : vector<1x8xf32> to vector<16x8xf32>
    %309 = arith.addf %305, %308 : vector<16x8xf32>
    %c5_203 = arith.constant 5 : index
    %c0_204 = arith.constant 0 : index
    %c0_205 = arith.constant 0 : index
    %310 = vector.load %arg7[%c5_203, %c0_204, %c0_205] : memref<8x32x8xf32, #tpu.memory_space<vmem>>, vector<1x32x8xf32>
    %311 = vector.shape_cast %310 : vector<1x32x8xf32> to vector<32x8xf32>
    %cst_206 = arith.constant dense<0.000000e+00> : vector<16x8xf32>
    %312 = tpu.matmul %263, %311, %cst_206 {dimension_numbers = #tpu.dot_dimension_numbers<[1], [0], [0], [1], [0, 0, 1, 1], [], []>} : vector<16x32xf32>, vector<32x8xf32>, vector<16x8xf32> -> vector<16x8xf32>
    %c5_207 = arith.constant 5 : index
    %c0_208 = arith.constant 0 : index
    %c0_209 = arith.constant 0 : index
    %313 = vector.load %arg8[%c5_207, %c0_208, %c0_209] : memref<8x1x8xf32, #tpu.memory_space<vmem>>, vector<1x1x8xf32>
    %314 = vector.shape_cast %313 : vector<1x1x8xf32> to vector<1x8xf32>
    %315 = vector.broadcast %314 : vector<1x8xf32> to vector<16x8xf32>
    %316 = arith.addf %312, %315 : vector<16x8xf32>
    %c5_210 = arith.constant 5 : index
    %c0_211 = arith.constant 0 : index
    %c0_212 = arith.constant 0 : index
    %317 = vector.load %arg9[%c5_210, %c0_211, %c0_212] : memref<8x32x8xf32, #tpu.memory_space<vmem>>, vector<1x32x8xf32>
    %318 = vector.shape_cast %317 : vector<1x32x8xf32> to vector<32x8xf32>
    %cst_213 = arith.constant dense<0.000000e+00> : vector<16x8xf32>
    %319 = tpu.matmul %263, %318, %cst_213 {dimension_numbers = #tpu.dot_dimension_numbers<[1], [0], [0], [1], [0, 0, 1, 1], [], []>} : vector<16x32xf32>, vector<32x8xf32>, vector<16x8xf32> -> vector<16x8xf32>
    %c5_214 = arith.constant 5 : index
    %c0_215 = arith.constant 0 : index
    %c0_216 = arith.constant 0 : index
    %320 = vector.load %arg10[%c5_214, %c0_215, %c0_216] : memref<8x1x8xf32, #tpu.memory_space<vmem>>, vector<1x1x8xf32>
    %321 = vector.shape_cast %320 : vector<1x1x8xf32> to vector<1x8xf32>
    %322 = vector.broadcast %321 : vector<1x8xf32> to vector<16x8xf32>
    %323 = arith.addf %319, %322 : vector<16x8xf32>
    "tpu.trace_start"() <{level = 10 : i32, message = "qd,kd->qk"}> : () -> ()
    %cst_217 = arith.constant dense<0.000000e+00> : vector<16x16xf32>
    %324 = tpu.matmul %309, %316, %cst_217 {dimension_numbers = #tpu.dot_dimension_numbers<[1], [1], [0], [0], [0, 0, 1, 0], [], []>} : vector<16x8xf32>, vector<16x8xf32>, vector<16x16xf32> -> vector<16x16xf32>
    "tpu.trace_stop"() : () -> ()
    %325 = arith.addf %324, %25 : vector<16x16xf32>
    %cst_218 = arith.constant dense<0xFF800000> : vector<16xf32>
    %326 = vector.multi_reduction <maximumf>, %325, %cst_218 [1] : vector<16x16xf32> to vector<16xf32>
    %327 = vector.shape_cast %326 : vector<16xf32> to vector<16x1xf32>
    %328 = vector.broadcast %327 : vector<16x1xf32> to vector<16x16xf32>
    %329 = arith.subf %325, %328 : vector<16x16xf32>
    %330 = math.exp %329 : vector<16x16xf32>
    %cst_219 = arith.constant dense<0.000000e+00> : vector<16xf32>
    %331 = vector.multi_reduction <add>, %330, %cst_219 [1] : vector<16x16xf32> to vector<16xf32>
    %332 = vector.shape_cast %331 : vector<16xf32> to vector<16x1xf32>
    %333 = tpu.reciprocal %332 {approx = true} : vector<16x1xf32> -> vector<16x1xf32>
    %334 = vector.broadcast %333 : vector<16x1xf32> to vector<16x16xf32>
    %335 = arith.mulf %330, %334 : vector<16x16xf32>
    %cst_220 = arith.constant dense<0.000000e+00> : vector<16x8xf32>
    %336 = tpu.matmul %335, %323, %cst_220 {dimension_numbers = #tpu.dot_dimension_numbers<[1], [0], [0], [1], [0, 0, 1, 1], [], []>} : vector<16x16xf32>, vector<16x8xf32>, vector<16x8xf32> -> vector<16x8xf32>
    %c5_221 = arith.constant 5 : index
    %c0_222 = arith.constant 0 : index
    %c0_223 = arith.constant 0 : index
    %337 = vector.load %arg11[%c5_221, %c0_222, %c0_223] : memref<8x8x32xf32, #tpu.memory_space<vmem>>, vector<1x8x32xf32>
    %338 = vector.shape_cast %337 : vector<1x8x32xf32> to vector<8x32xf32>
    %cst_224 = arith.constant dense<0.000000e+00> : vector<16x32xf32>
    %339 = tpu.matmul %336, %338, %cst_224 {dimension_numbers = #tpu.dot_dimension_numbers<[1], [0], [0], [1], [0, 0, 1, 1], [], []>} : vector<16x8xf32>, vector<8x32xf32>, vector<16x32xf32> -> vector<16x32xf32>
    %340 = arith.addf %302, %339 : vector<16x32xf32>
    %c6 = arith.constant 6 : index
    %c0_225 = arith.constant 0 : index
    %c0_226 = arith.constant 0 : index
    %341 = vector.load %arg5[%c6, %c0_225, %c0_226] : memref<8x32x8xf32, #tpu.memory_space<vmem>>, vector<1x32x8xf32>
    %342 = vector.shape_cast %341 : vector<1x32x8xf32> to vector<32x8xf32>
    %cst_227 = arith.constant dense<0.000000e+00> : vector<16x8xf32>
    %343 = tpu.matmul %263, %342, %cst_227 {dimension_numbers = #tpu.dot_dimension_numbers<[1], [0], [0], [1], [0, 0, 1, 1], [], []>} : vector<16x32xf32>, vector<32x8xf32>, vector<16x8xf32> -> vector<16x8xf32>
    %c6_228 = arith.constant 6 : index
    %c0_229 = arith.constant 0 : index
    %c0_230 = arith.constant 0 : index
    %344 = vector.load %arg6[%c6_228, %c0_229, %c0_230] : memref<8x1x8xf32, #tpu.memory_space<vmem>>, vector<1x1x8xf32>
    %345 = vector.shape_cast %344 : vector<1x1x8xf32> to vector<1x8xf32>
    %346 = vector.broadcast %345 : vector<1x8xf32> to vector<16x8xf32>
    %347 = arith.addf %343, %346 : vector<16x8xf32>
    %c6_231 = arith.constant 6 : index
    %c0_232 = arith.constant 0 : index
    %c0_233 = arith.constant 0 : index
    %348 = vector.load %arg7[%c6_231, %c0_232, %c0_233] : memref<8x32x8xf32, #tpu.memory_space<vmem>>, vector<1x32x8xf32>
    %349 = vector.shape_cast %348 : vector<1x32x8xf32> to vector<32x8xf32>
    %cst_234 = arith.constant dense<0.000000e+00> : vector<16x8xf32>
    %350 = tpu.matmul %263, %349, %cst_234 {dimension_numbers = #tpu.dot_dimension_numbers<[1], [0], [0], [1], [0, 0, 1, 1], [], []>} : vector<16x32xf32>, vector<32x8xf32>, vector<16x8xf32> -> vector<16x8xf32>
    %c6_235 = arith.constant 6 : index
    %c0_236 = arith.constant 0 : index
    %c0_237 = arith.constant 0 : index
    %351 = vector.load %arg8[%c6_235, %c0_236, %c0_237] : memref<8x1x8xf32, #tpu.memory_space<vmem>>, vector<1x1x8xf32>
    %352 = vector.shape_cast %351 : vector<1x1x8xf32> to vector<1x8xf32>
    %353 = vector.broadcast %352 : vector<1x8xf32> to vector<16x8xf32>
    %354 = arith.addf %350, %353 : vector<16x8xf32>
    %c6_238 = arith.constant 6 : index
    %c0_239 = arith.constant 0 : index
    %c0_240 = arith.constant 0 : index
    %355 = vector.load %arg9[%c6_238, %c0_239, %c0_240] : memref<8x32x8xf32, #tpu.memory_space<vmem>>, vector<1x32x8xf32>
    %356 = vector.shape_cast %355 : vector<1x32x8xf32> to vector<32x8xf32>
    %cst_241 = arith.constant dense<0.000000e+00> : vector<16x8xf32>
    %357 = tpu.matmul %263, %356, %cst_241 {dimension_numbers = #tpu.dot_dimension_numbers<[1], [0], [0], [1], [0, 0, 1, 1], [], []>} : vector<16x32xf32>, vector<32x8xf32>, vector<16x8xf32> -> vector<16x8xf32>
    %c6_242 = arith.constant 6 : index
    %c0_243 = arith.constant 0 : index
    %c0_244 = arith.constant 0 : index
    %358 = vector.load %arg10[%c6_242, %c0_243, %c0_244] : memref<8x1x8xf32, #tpu.memory_space<vmem>>, vector<1x1x8xf32>
    %359 = vector.shape_cast %358 : vector<1x1x8xf32> to vector<1x8xf32>
    %360 = vector.broadcast %359 : vector<1x8xf32> to vector<16x8xf32>
    %361 = arith.addf %357, %360 : vector<16x8xf32>
    "tpu.trace_start"() <{level = 10 : i32, message = "qd,kd->qk"}> : () -> ()
    %cst_245 = arith.constant dense<0.000000e+00> : vector<16x16xf32>
    %362 = tpu.matmul %347, %354, %cst_245 {dimension_numbers = #tpu.dot_dimension_numbers<[1], [1], [0], [0], [0, 0, 1, 0], [], []>} : vector<16x8xf32>, vector<16x8xf32>, vector<16x16xf32> -> vector<16x16xf32>
    "tpu.trace_stop"() : () -> ()
    %363 = arith.addf %362, %25 : vector<16x16xf32>
    %cst_246 = arith.constant dense<0xFF800000> : vector<16xf32>
    %364 = vector.multi_reduction <maximumf>, %363, %cst_246 [1] : vector<16x16xf32> to vector<16xf32>
    %365 = vector.shape_cast %364 : vector<16xf32> to vector<16x1xf32>
    %366 = vector.broadcast %365 : vector<16x1xf32> to vector<16x16xf32>
    %367 = arith.subf %363, %366 : vector<16x16xf32>
    %368 = math.exp %367 : vector<16x16xf32>
    %cst_247 = arith.constant dense<0.000000e+00> : vector<16xf32>
    %369 = vector.multi_reduction <add>, %368, %cst_247 [1] : vector<16x16xf32> to vector<16xf32>
    %370 = vector.shape_cast %369 : vector<16xf32> to vector<16x1xf32>
    %371 = tpu.reciprocal %370 {approx = true} : vector<16x1xf32> -> vector<16x1xf32>
    %372 = vector.broadcast %371 : vector<16x1xf32> to vector<16x16xf32>
    %373 = arith.mulf %368, %372 : vector<16x16xf32>
    %cst_248 = arith.constant dense<0.000000e+00> : vector<16x8xf32>
    %374 = tpu.matmul %373, %361, %cst_248 {dimension_numbers = #tpu.dot_dimension_numbers<[1], [0], [0], [1], [0, 0, 1, 1], [], []>} : vector<16x16xf32>, vector<16x8xf32>, vector<16x8xf32> -> vector<16x8xf32>
    %c6_249 = arith.constant 6 : index
    %c0_250 = arith.constant 0 : index
    %c0_251 = arith.constant 0 : index
    %375 = vector.load %arg11[%c6_249, %c0_250, %c0_251] : memref<8x8x32xf32, #tpu.memory_space<vmem>>, vector<1x8x32xf32>
    %376 = vector.shape_cast %375 : vector<1x8x32xf32> to vector<8x32xf32>
    %cst_252 = arith.constant dense<0.000000e+00> : vector<16x32xf32>
    %377 = tpu.matmul %374, %376, %cst_252 {dimension_numbers = #tpu.dot_dimension_numbers<[1], [0], [0], [1], [0, 0, 1, 1], [], []>} : vector<16x8xf32>, vector<8x32xf32>, vector<16x32xf32> -> vector<16x32xf32>
    %378 = arith.addf %340, %377 : vector<16x32xf32>
    %c7 = arith.constant 7 : index
    %c0_253 = arith.constant 0 : index
    %c0_254 = arith.constant 0 : index
    %379 = vector.load %arg5[%c7, %c0_253, %c0_254] : memref<8x32x8xf32, #tpu.memory_space<vmem>>, vector<1x32x8xf32>
    %380 = vector.shape_cast %379 : vector<1x32x8xf32> to vector<32x8xf32>
    %cst_255 = arith.constant dense<0.000000e+00> : vector<16x8xf32>
    %381 = tpu.matmul %263, %380, %cst_255 {dimension_numbers = #tpu.dot_dimension_numbers<[1], [0], [0], [1], [0, 0, 1, 1], [], []>} : vector<16x32xf32>, vector<32x8xf32>, vector<16x8xf32> -> vector<16x8xf32>
    %c7_256 = arith.constant 7 : index
    %c0_257 = arith.constant 0 : index
    %c0_258 = arith.constant 0 : index
    %382 = vector.load %arg6[%c7_256, %c0_257, %c0_258] : memref<8x1x8xf32, #tpu.memory_space<vmem>>, vector<1x1x8xf32>
    %383 = vector.shape_cast %382 : vector<1x1x8xf32> to vector<1x8xf32>
    %384 = vector.broadcast %383 : vector<1x8xf32> to vector<16x8xf32>
    %385 = arith.addf %381, %384 : vector<16x8xf32>
    %c7_259 = arith.constant 7 : index
    %c0_260 = arith.constant 0 : index
    %c0_261 = arith.constant 0 : index
    %386 = vector.load %arg7[%c7_259, %c0_260, %c0_261] : memref<8x32x8xf32, #tpu.memory_space<vmem>>, vector<1x32x8xf32>
    %387 = vector.shape_cast %386 : vector<1x32x8xf32> to vector<32x8xf32>
    %cst_262 = arith.constant dense<0.000000e+00> : vector<16x8xf32>
    %388 = tpu.matmul %263, %387, %cst_262 {dimension_numbers = #tpu.dot_dimension_numbers<[1], [0], [0], [1], [0, 0, 1, 1], [], []>} : vector<16x32xf32>, vector<32x8xf32>, vector<16x8xf32> -> vector<16x8xf32>
    %c7_263 = arith.constant 7 : index
    %c0_264 = arith.constant 0 : index
    %c0_265 = arith.constant 0 : index
    %389 = vector.load %arg8[%c7_263, %c0_264, %c0_265] : memref<8x1x8xf32, #tpu.memory_space<vmem>>, vector<1x1x8xf32>
    %390 = vector.shape_cast %389 : vector<1x1x8xf32> to vector<1x8xf32>
    %391 = vector.broadcast %390 : vector<1x8xf32> to vector<16x8xf32>
    %392 = arith.addf %388, %391 : vector<16x8xf32>
    %c7_266 = arith.constant 7 : index
    %c0_267 = arith.constant 0 : index
    %c0_268 = arith.constant 0 : index
    %393 = vector.load %arg9[%c7_266, %c0_267, %c0_268] : memref<8x32x8xf32, #tpu.memory_space<vmem>>, vector<1x32x8xf32>
    %394 = vector.shape_cast %393 : vector<1x32x8xf32> to vector<32x8xf32>
    %cst_269 = arith.constant dense<0.000000e+00> : vector<16x8xf32>
    %395 = tpu.matmul %263, %394, %cst_269 {dimension_numbers = #tpu.dot_dimension_numbers<[1], [0], [0], [1], [0, 0, 1, 1], [], []>} : vector<16x32xf32>, vector<32x8xf32>, vector<16x8xf32> -> vector<16x8xf32>
    %c7_270 = arith.constant 7 : index
    %c0_271 = arith.constant 0 : index
    %c0_272 = arith.constant 0 : index
    %396 = vector.load %arg10[%c7_270, %c0_271, %c0_272] : memref<8x1x8xf32, #tpu.memory_space<vmem>>, vector<1x1x8xf32>
    %397 = vector.shape_cast %396 : vector<1x1x8xf32> to vector<1x8xf32>
    %398 = vector.broadcast %397 : vector<1x8xf32> to vector<16x8xf32>
    %399 = arith.addf %395, %398 : vector<16x8xf32>
    "tpu.trace_start"() <{level = 10 : i32, message = "qd,kd->qk"}> : () -> ()
    %cst_273 = arith.constant dense<0.000000e+00> : vector<16x16xf32>
    %400 = tpu.matmul %385, %392, %cst_273 {dimension_numbers = #tpu.dot_dimension_numbers<[1], [1], [0], [0], [0, 0, 1, 0], [], []>} : vector<16x8xf32>, vector<16x8xf32>, vector<16x16xf32> -> vector<16x16xf32>
    "tpu.trace_stop"() : () -> ()
    %401 = arith.addf %400, %25 : vector<16x16xf32>
    %cst_274 = arith.constant dense<0xFF800000> : vector<16xf32>
    %402 = vector.multi_reduction <maximumf>, %401, %cst_274 [1] : vector<16x16xf32> to vector<16xf32>
    %403 = vector.shape_cast %402 : vector<16xf32> to vector<16x1xf32>
    %404 = vector.broadcast %403 : vector<16x1xf32> to vector<16x16xf32>
    %405 = arith.subf %401, %404 : vector<16x16xf32>
    %406 = math.exp %405 : vector<16x16xf32>
    %cst_275 = arith.constant dense<0.000000e+00> : vector<16xf32>
    %407 = vector.multi_reduction <add>, %406, %cst_275 [1] : vector<16x16xf32> to vector<16xf32>
    %408 = vector.shape_cast %407 : vector<16xf32> to vector<16x1xf32>
    %409 = tpu.reciprocal %408 {approx = true} : vector<16x1xf32> -> vector<16x1xf32>
    %410 = vector.broadcast %409 : vector<16x1xf32> to vector<16x16xf32>
    %411 = arith.mulf %406, %410 : vector<16x16xf32>
    %cst_276 = arith.constant dense<0.000000e+00> : vector<16x8xf32>
    %412 = tpu.matmul %411, %399, %cst_276 {dimension_numbers = #tpu.dot_dimension_numbers<[1], [0], [0], [1], [0, 0, 1, 1], [], []>} : vector<16x16xf32>, vector<16x8xf32>, vector<16x8xf32> -> vector<16x8xf32>
    %c7_277 = arith.constant 7 : index
    %c0_278 = arith.constant 0 : index
    %c0_279 = arith.constant 0 : index
    %413 = vector.load %arg11[%c7_277, %c0_278, %c0_279] : memref<8x8x32xf32, #tpu.memory_space<vmem>>, vector<1x8x32xf32>
    %414 = vector.shape_cast %413 : vector<1x8x32xf32> to vector<8x32xf32>
    %cst_280 = arith.constant dense<0.000000e+00> : vector<16x32xf32>
    %415 = tpu.matmul %412, %414, %cst_280 {dimension_numbers = #tpu.dot_dimension_numbers<[1], [0], [0], [1], [0, 0, 1, 1], [], []>} : vector<16x8xf32>, vector<8x32xf32>, vector<16x32xf32> -> vector<16x32xf32>
    %416 = arith.addf %378, %415 : vector<16x32xf32>
    %417 = arith.addf %263, %416 : vector<16x32xf32>
    %c1_281 = arith.constant 1 : index
    %c0_282 = arith.constant 0 : index
    %c0_283 = arith.constant 0 : index
    %418 = vector.load %arg12[%c1_281, %c0_282, %c0_283] : memref<2x1x32xf32, #tpu.memory_space<vmem>>, vector<1x1x32xf32>
    %419 = vector.shape_cast %418 : vector<1x1x32xf32> to vector<1x32xf32>
    %420 = vector.broadcast %419 : vector<1x32xf32> to vector<16x32xf32>
    %421 = arith.addf %417, %420 : vector<16x32xf32>
    %c1_284 = arith.constant 1 : index
    %c0_285 = arith.constant 0 : index
    %c0_286 = arith.constant 0 : index
    %422 = vector.load %arg13[%c1_284, %c0_285, %c0_286] : memref<2x1x32xf32, #tpu.memory_space<vmem>>, vector<1x1x32xf32>
    %423 = vector.shape_cast %422 : vector<1x1x32xf32> to vector<1x32xf32>
    %c1_287 = arith.constant 1 : index
    %c0_288 = arith.constant 0 : index
    %c0_289 = arith.constant 0 : index
    %424 = vector.load %arg14[%c1_287, %c0_288, %c0_289] : memref<2x1x32xf32, #tpu.memory_space<vmem>>, vector<1x1x32xf32>
    %425 = vector.shape_cast %424 : vector<1x1x32xf32> to vector<1x32xf32>
    %cst_290 = arith.constant dense<0.000000e+00> : vector<16xf32>
    %426 = vector.multi_reduction <add>, %421, %cst_290 [1] : vector<16x32xf32> to vector<16xf32>
    %427 = vector.shape_cast %426 : vector<16xf32> to vector<16x1xf32>
    %cst_291 = arith.constant 3.200000e+01 : f32
    %428 = vector.broadcast %cst_291 : f32 to vector<16x1xf32>
    %429 = arith.divf %427, %428 : vector<16x1xf32>
    %430 = vector.broadcast %429 : vector<16x1xf32> to vector<16x32xf32>
    %431 = arith.subf %421, %430 : vector<16x32xf32>
    %432 = arith.mulf %431, %431 : vector<16x32xf32>
    %cst_292 = arith.constant dense<0.000000e+00> : vector<16xf32>
    %433 = vector.multi_reduction <add>, %432, %cst_292 [1] : vector<16x32xf32> to vector<16xf32>
    %434 = vector.shape_cast %433 : vector<16xf32> to vector<16x1xf32>
    %cst_293 = arith.constant 3.200000e+01 : f32
    %435 = vector.broadcast %cst_293 : f32 to vector<16x1xf32>
    %436 = arith.divf %434, %435 : vector<16x1xf32>
    %437 = vector.broadcast %429 : vector<16x1xf32> to vector<16x32xf32>
    %438 = arith.subf %421, %437 : vector<16x32xf32>
    %cst_294 = arith.constant 9.99999996E-13 : f32
    %439 = vector.broadcast %cst_294 : f32 to vector<16x1xf32>
    %440 = arith.addf %436, %439 : vector<16x1xf32>
    %441 = math.rsqrt %440 : vector<16x1xf32>
    %442 = vector.broadcast %441 : vector<16x1xf32> to vector<16x32xf32>
    %443 = arith.mulf %438, %442 : vector<16x32xf32>
    %444 = vector.broadcast %423 : vector<1x32xf32> to vector<16x32xf32>
    %445 = arith.mulf %443, %444 : vector<16x32xf32>
    %446 = vector.broadcast %425 : vector<1x32xf32> to vector<16x32xf32>
    %447 = arith.addf %445, %446 : vector<16x32xf32>
    %c1_295 = arith.constant 1 : index
    %c0_296 = arith.constant 0 : index
    %c0_297 = arith.constant 0 : index
    %448 = vector.load %arg15[%c1_295, %c0_296, %c0_297] : memref<2x32x64xf32, #tpu.memory_space<vmem>>, vector<1x32x64xf32>
    %449 = vector.shape_cast %448 : vector<1x32x64xf32> to vector<32x64xf32>
    %cst_298 = arith.constant dense<0.000000e+00> : vector<16x64xf32>
    %450 = tpu.matmul %447, %449, %cst_298 {dimension_numbers = #tpu.dot_dimension_numbers<[1], [0], [0], [1], [0, 0, 1, 1], [], []>} : vector<16x32xf32>, vector<32x64xf32>, vector<16x64xf32> -> vector<16x64xf32>
    %c1_299 = arith.constant 1 : index
    %c0_300 = arith.constant 0 : index
    %c0_301 = arith.constant 0 : index
    %451 = vector.load %arg16[%c1_299, %c0_300, %c0_301] : memref<2x1x64xf32, #tpu.memory_space<vmem>>, vector<1x1x64xf32>
    %452 = vector.shape_cast %451 : vector<1x1x64xf32> to vector<1x64xf32>
    %453 = vector.broadcast %452 : vector<1x64xf32> to vector<16x64xf32>
    %454 = arith.addf %450, %453 : vector<16x64xf32>
    %455 = arith.mulf %454, %454 : vector<16x64xf32>
    %456 = arith.mulf %454, %455 : vector<16x64xf32>
    %cst_302 = arith.constant 4.471500e-02 : f32
    %457 = vector.broadcast %cst_302 : f32 to vector<16x64xf32>
    %458 = arith.mulf %457, %456 : vector<16x64xf32>
    %459 = arith.addf %454, %458 : vector<16x64xf32>
    %cst_303 = arith.constant 0.797884583 : f32
    %460 = vector.broadcast %cst_303 : f32 to vector<16x64xf32>
    %461 = arith.mulf %460, %459 : vector<16x64xf32>
    %462 = math.tanh %461 : vector<16x64xf32>
    %cst_304 = arith.constant 1.000000e+00 : f32
    %463 = vector.broadcast %cst_304 : f32 to vector<16x64xf32>
    %464 = arith.addf %463, %462 : vector<16x64xf32>
    %cst_305 = arith.constant 5.000000e-01 : f32
    %465 = vector.broadcast %cst_305 : f32 to vector<16x64xf32>
    %466 = arith.mulf %465, %464 : vector<16x64xf32>
    %467 = arith.mulf %454, %466 : vector<16x64xf32>
    %c1_306 = arith.constant 1 : index
    %c0_307 = arith.constant 0 : index
    %c0_308 = arith.constant 0 : index
    %468 = vector.load %arg17[%c1_306, %c0_307, %c0_308] : memref<2x64x32xf32, #tpu.memory_space<vmem>>, vector<1x64x32xf32>
    %469 = vector.shape_cast %468 : vector<1x64x32xf32> to vector<64x32xf32>
    %cst_309 = arith.constant dense<0.000000e+00> : vector<16x32xf32>
    %470 = tpu.matmul %467, %469, %cst_309 {dimension_numbers = #tpu.dot_dimension_numbers<[1], [0], [0], [1], [0, 0, 1, 1], [], []>} : vector<16x64xf32>, vector<64x32xf32>, vector<16x32xf32> -> vector<16x32xf32>
    %c1_310 = arith.constant 1 : index
    %c0_311 = arith.constant 0 : index
    %c0_312 = arith.constant 0 : index
    %471 = vector.load %arg18[%c1_310, %c0_311, %c0_312] : memref<2x1x32xf32, #tpu.memory_space<vmem>>, vector<1x1x32xf32>
    %472 = vector.shape_cast %471 : vector<1x1x32xf32> to vector<1x32xf32>
    %473 = vector.broadcast %472 : vector<1x32xf32> to vector<16x32xf32>
    %474 = arith.addf %470, %473 : vector<16x32xf32>
    %475 = arith.addf %447, %474 : vector<16x32xf32>
    %c1_313 = arith.constant 1 : index
    %c0_314 = arith.constant 0 : index
    %c0_315 = arith.constant 0 : index
    %476 = vector.load %arg19[%c1_313, %c0_314, %c0_315] : memref<2x1x32xf32, #tpu.memory_space<vmem>>, vector<1x1x32xf32>
    %477 = vector.shape_cast %476 : vector<1x1x32xf32> to vector<1x32xf32>
    %c1_316 = arith.constant 1 : index
    %c0_317 = arith.constant 0 : index
    %c0_318 = arith.constant 0 : index
    %478 = vector.load %arg20[%c1_316, %c0_317, %c0_318] : memref<2x1x32xf32, #tpu.memory_space<vmem>>, vector<1x1x32xf32>
    %479 = vector.shape_cast %478 : vector<1x1x32xf32> to vector<1x32xf32>
    %cst_319 = arith.constant dense<0.000000e+00> : vector<16xf32>
    %480 = vector.multi_reduction <add>, %475, %cst_319 [1] : vector<16x32xf32> to vector<16xf32>
    %481 = vector.shape_cast %480 : vector<16xf32> to vector<16x1xf32>
    %cst_320 = arith.constant 3.200000e+01 : f32
    %482 = vector.broadcast %cst_320 : f32 to vector<16x1xf32>
    %483 = arith.divf %481, %482 : vector<16x1xf32>
    %484 = vector.broadcast %483 : vector<16x1xf32> to vector<16x32xf32>
    %485 = arith.subf %475, %484 : vector<16x32xf32>
    %486 = arith.mulf %485, %485 : vector<16x32xf32>
    %cst_321 = arith.constant dense<0.000000e+00> : vector<16xf32>
    %487 = vector.multi_reduction <add>, %486, %cst_321 [1] : vector<16x32xf32> to vector<16xf32>
    %488 = vector.shape_cast %487 : vector<16xf32> to vector<16x1xf32>
    %cst_322 = arith.constant 3.200000e+01 : f32
    %489 = vector.broadcast %cst_322 : f32 to vector<16x1xf32>
    %490 = arith.divf %488, %489 : vector<16x1xf32>
    %491 = vector.broadcast %483 : vector<16x1xf32> to vector<16x32xf32>
    %492 = arith.subf %475, %491 : vector<16x32xf32>
    %cst_323 = arith.constant 9.99999996E-13 : f32
    %493 = vector.broadcast %cst_323 : f32 to vector<16x1xf32>
    %494 = arith.addf %490, %493 : vector<16x1xf32>
    %495 = math.rsqrt %494 : vector<16x1xf32>
    %496 = vector.broadcast %495 : vector<16x1xf32> to vector<16x32xf32>
    %497 = arith.mulf %492, %496 : vector<16x32xf32>
    %498 = vector.broadcast %477 : vector<1x32xf32> to vector<16x32xf32>
    %499 = arith.mulf %497, %498 : vector<16x32xf32>
    %500 = vector.broadcast %479 : vector<1x32xf32> to vector<16x32xf32>
    %501 = arith.addf %499, %500 : vector<16x32xf32>
    %c0_324 = arith.constant 0 : index
    %c0_325 = arith.constant 0 : index
    %502 = vector.load %arg2[%c0_324, %c0_325] : memref<2x16xf32, #tpu.memory_space<vmem>>, vector<2x16xf32>
    %cst_326 = arith.constant dense<0.000000e+00> : vector<2x32xf32>
    %503 = tpu.matmul %502, %501, %cst_326 {dimension_numbers = #tpu.dot_dimension_numbers<[1], [0], [0], [1], [0, 0, 1, 1], [], []>} : vector<2x16xf32>, vector<16x32xf32>, vector<2x32xf32> -> vector<2x32xf32>
    %c0_327 = arith.constant 0 : index
    %c0_328 = arith.constant 0 : index
    %504 = vector.load %arg21[%c0_327, %c0_328] : memref<2x32xf32, #tpu.memory_space<vmem>>, vector<2x32xf32>
    tpu.vector_store %arg21[%c0_327, %c0_328], %503 {strides = array<i32>} : memref<2x32xf32, #tpu.memory_space<vmem>>, vector<2x32xf32>,
    return
  }
}

</mosaic_0001>

<bundles_post_ra>
// kernel: antiberty_encoder.1
= control target key start
LH: loop header
LB: loop body
LE: loop exit
PB: predicated region body
PF: predicated region fallthrough
CT: control target
= control target key end

     0   :  { %s3741_s0 = inlined_call_operand.vmem [shape: f32[16,32], index: 0, kind: input, shape index: {}]   ;;  %s3742_s1 = inlined_call_operand.vmem [shape: f32[16,16], index: 1, kind: input, shape index: {}]   ;;  %s3743_s2 = inlined_call_operand.vmem [shape: f32[2,16], index: 2, kind: input, shape index: {}]   ;;  %s3744_s3 = inlined_call_operand.vmem [shape: f32[1,32], index: 3, kind: input, shape index: {}]   ;;  %s3745_s4 = inlined_call_operand.vmem [shape: f32[1,32], index: 4, kind: input, shape index: {}]   ;;  %s3746_s5 = inlined_call_operand.vmem [shape: f32[8,32,8], index: 5, kind: input, shape index: {}]   ;;  %s3747_s6 = inlined_call_operand.vmem [shape: f32[8,1,8], index: 6, kind: input, shape index: {}]   ;;  %s3748_s7 = inlined_call_operand.vmem [shape: f32[8,32,8], index: 7, kind: input, shape index: {}]   ;;  %s3749_s8 = inlined_call_operand.vmem [shape: f32[8,1,8], index: 8, kind: input, shape index: {}]   ;;  %s3750_s9 = inlined_call_operand.vmem [shape: f32[8,32,8], index: 9, kind: input, shape index: {}]   ;;  %s3751_s10 = inlined_call_operand.vmem [shape: f32[8,1,8], index: 10, kind: input, shape index: {}]   ;;  %s3752_s11 = inlined_call_operand.vmem [shape: f32[8,8,32], index: 11, kind: input, shape index: {}]   ;;  %s3753_s12 = inlined_call_operand.vmem [shape: f32[2,1,32], index: 12, kind: input, shape index: {}]   ;;  %s3754_s13 = inlined_call_operand.vmem [shape: f32[2,1,32], index: 13, kind: input, shape index: {}]   ;;  %s3755_s14 = inlined_call_operand.vmem [shape: f32[2,1,32], index: 14, kind: input, shape index: {}]   ;;  %s3756_s15 = inlined_call_operand.vmem [shape: f32[2,32,64], index: 15, kind: input, shape index: {}]   ;;  %s3757_s16 = inlined_call_operand.vmem [shape: f32[2,1,64], index: 16, kind: input, shape index: {}]   ;;  %s3758_s17 = inlined_call_operand.vmem [shape: f32[2,64,32], index: 17, kind: input, shape index: {}]   ;;  %s3759_s18 = inlined_call_operand.vmem [shape: f32[2,1,32], index: 18, kind: input, shape index: {}]   ;;  %s3760_s19 = inlined_call_operand.vmem [shape: f32[2,1,32], index: 19, kind: input, shape index: {}]   ;;  %s3761_s20 = inlined_call_operand.vmem [shape: f32[2,1,32], index: 20, kind: input, shape index: {}]   ;;  %s3762_s21 = inlined_call_operand.hbm [shape: f32[2,32], index: 21, kind: output, shape index: {}]  }
   0x1   :  { %3766 = sst [smem:[#allocation5_spill]] %s3741_s0 }
   0x2   :  { %3767 = sst [smem:[#allocation6_spill]] %s3742_s1 }
   0x3   :  { %3768 = sst [smem:[#allocation7_spill]] %s3743_s2 }
   0x4   :  { %3769 = sst [smem:[#allocation8_spill]] %s3744_s3 }
   0x5   :  { %3770 = sst [smem:[#allocation9_spill]] %s3745_s4 }
   0x6   :  { %3771 = sst [smem:[#allocation10_spill]] %s3746_s5 }
   0x7   :  { %s3772_s26 = sld [smem:[#allocation5_spill]]  ;;  %vm73_vm0 = vcmask 261120  }
   0xd   :  { %v69_v0 = vld [vmem:[%s3772_s26] sm:$0xff]  ;;  %v70_v1 = vld [vmem:[%s3772_s26 + $0x8] sm:$0xff] }
   0xe   :  { %v74_v2 = vsel %vm73_vm0, %v69_v0, 0.0  ;;  %v77_v3 = vsel %vm73_vm0, %v70_v1, 0.0 }
   0xf   :  { %75 = vadd.xlane.f32.xlu0 %v74_v2 }
  0x17   :  { %78 = vadd.xlane.f32.xlu0 %v77_v3 }
  0x18   :  { %26 = vsyncpa [#allocation3], 0  ;;  %v2784_v4 = vmov 32.0   ;;  %s3773_s0 = sld [smem:[#allocation10_spill]]  ;;  %v177_v22 = vld [vmem:[%s3748_s7 + $0x18] sm:$0xff]  ;;  %v176_v25 = vld [vmem:[%s3748_s7 + $0x10] sm:$0xff] }
  0x19   :  { %2662 = vrcp.f32 %v2784_v4  ;;  %v208_v23 = vld [vmem:[%s3750_s9 + $0x18] sm:$0xff]  ;;  %194 = vmatpush.msra.mxu1 %v177_v22  ;;  %v207_v26 = vld [vmem:[%s3750_s9 + $0x10] sm:$0xff]  ;;  %v175_v28 = vld [vmem:[%s3748_s7 + $0x8] sm:$0xff]  ;;  %s3774_s28 = sld [smem:[#allocation8_spill]]  ;;  %vm236_vm8 = vcmask 64512   ;;  %vm272_vm9 = vcmask 130048  }
  0x1a   :  { %225 = vmatpush.msra.mxu2 %v208_v23  ;;  %v206_v29 = vld [vmem:[%s3750_s9 + $0x8] sm:$0xff]  ;;  %v174_v31 = vld [vmem:[%s3748_s7] sm:$0xff]  ;;  %v2390_v37 = vld [vmem:[%s3748_s7 + $0x38] sm:$0xff]  ;;  %s3775_s30 = sld [smem:[#allocation9_spill]] }
  0x1b   :  { %195 = vmatpush.msra.mxu1 %v176_v25  ;;  %v205_v32 = vld [vmem:[%s3750_s9] sm:$0xff]  ;;  %v2389_v39 = vld [vmem:[%s3748_s7 + $0x30] sm:$0xff]  ;;  %v2388_v42 = vld [vmem:[%s3748_s7 + $0x28] sm:$0xff]  ;;  %s3776_s24 = sld [smem:[#allocation6_spill]] }
  0x1c   :  { %226 = vmatpush.msra.mxu2 %v207_v26  ;;  %v2387_v45 = vld [vmem:[%s3748_s7 + $0x20] sm:$0xff]  ;;  %s3777_s3 = sld [smem:[#allocation7_spill]] }
  0x1d   :  { %196 = vmatpush.msra.mxu1 %v175_v28  ;;  %v2394_v22 = vld [vmem:[%s3750_s9 + $0x20] sm:$0xff] }
  0x1e   :  { %v140_v21 = vld [vmem:[%s3773_s0 + $0x18] sm:$0xff]  ;;  %v139_v24 = vld [vmem:[%s3773_s0 + $0x10] sm:$0xff]  ;;  %v138_v27 = vld [vmem:[%s3773_s0 + $0x8] sm:$0xff]  ;;  %227 = vmatpush.msra.mxu2 %v206_v29 }
  0x1f   :  { %v2663_v5 = vpop.eup %2662  ;;  %163 = vmatpush.msra.mxu0 %v140_v21  ;;  %v137_v30 = vld [vmem:[%s3773_s0] sm:$0xff]  ;;  %197 = vmatpush.msra.mxu1 %v174_v31  ;;  %v2383_v36 = vld [vmem:[%s3773_s0 + $0x38] sm:$0xff]  ;;  %v2382_v38 = vld [vmem:[%s3773_s0 + $0x30] sm:$0xff] }
  0x20   :  { %v81_v6 = vmul.f32 32.0, %v2663_v5  ;;  %vm85_vm1 = vweird.f32 %v2663_v5  ;;  %228 = vmatpush.msra.mxu2 %v205_v32  ;;  %v2381_v41 = vld [vmem:[%s3773_s0 + $0x28] sm:$0xff]  ;;  %v2380_v44 = vld [vmem:[%s3773_s0 + $0x20] sm:$0xff] }
  0x21   :  { %164 = vmatpush.msra.mxu0 %v139_v24  ;;  %347 = vmatpush.msrb.mxu1 %v2383_v36  ;;  %v2622_v55 = vld [vmem:[%s3774_s28] ss:$0 sm:$0xff]  ;;  %v2395_v21 = vld [vmem:[%s3750_s9 + $0x28] sm:$0xff]  ;;  %v2628_v26 = vld [vmem:[%s3749_s8 + $0x1] ss:$0 sm:$0xff] }
  0x22   :  { %v82_v7 = vsub.f32 1.0, %v81_v6  ;;  %380 = vmatpush.msrb.mxu2 %v2390_v37  ;;  %v2623_v58 = vld [vmem:[%s3775_s30] ss:$0 sm:$0xff] }
  0x23   :  { %165 = vmatpush.msra.mxu0 %v138_v27  ;;  %348 = vmatpush.msrb.mxu1 %v2382_v38  ;;  %v2625_v6 = vld [vmem:[%s3749_s8] ss:$0 sm:$0xff] }
  0x24   :  { %v83_v8 = vmul.f32 %v2663_v5, %v82_v7  ;;  %381 = vmatpush.msrb.mxu2 %v2389_v39  ;;  %v2629_v39 = vld [vmem:[%s3751_s10 + $0x1] ss:$0 sm:$0xff] }
  0x25   :  { %166 = vmatpush.msra.mxu0 %v137_v30  ;;  %349 = vmatpush.msrb.mxu1 %v2381_v41  ;;  %v3049_v30 = vld [vmem:[%s3776_s24] sm:$0xff] }
  0x26   :  { %v84_v9 = vadd.f32 %v2663_v5, %v83_v8  ;;  %382 = vmatpush.msrb.mxu2 %v2388_v42 }
  0x27   :  { %350 = vmatpush.msrb.mxu1 %v2380_v44 }
  0x28   :  { %v2904_v10 = vsel %vm85_vm1, %v2663_v5, %v84_v9  ;;  %383 = vmatpush.msrb.mxu2 %v2387_v45  ;;  %vm1137_vm1 = vcmask 523264  }
  0x82   :  { %v76_v11 = vpop.xlane.xlu0 %75 }
  0x83   :  { %v87_v12 = vmul.f32 %v2904_v10, %v76_v11 }
  0x85   :  { %v2907_v13 = vsub.f32 %v69_v0, %v87_v12  ;;  %v2624_v12 = vld [vmem:[%s3747_s6] ss:$0 sm:$0xff] }
  0x87   :  { %v91_v14 = vmul.f32 %v2907_v13, %v2907_v13 }
  0x89   :  { %v93_v15 = vsel %vm73_vm0, %v91_v14, 0.0  ;;  %v2397_v14 = vld [vmem:[%s3750_s9 + $0x38] sm:$0xff] }
  0x8a   :  { %94 = vadd.xlane.f32.xlu1 %v93_v15  ;;  %v79_v16 = vpop.xlane.xlu0 %78  ;;  %v2627_v15 = vld [vmem:[%s3751_s10] ss:$0 sm:$0xff] }
  0x8b   :  { %v88_v17 = vmul.f32 %v2904_v10, %v79_v16 }
  0x8d   :  { %v2913_v18 = vsub.f32 %v70_v1, %v88_v17 }
  0x8f   :  { %v92_v19 = vmul.f32 %v2913_v18, %v2913_v18 }
  0x91   :  { %v96_v20 = vsel %vm73_vm0, %v92_v19, 0.0  ;;  %v2396_v19 = vld [vmem:[%s3750_s9 + $0x30] sm:$0xff] }
  0x92   :  { %97 = vadd.xlane.f32.xlu1 %v96_v20 }
  0xfd   :  { %v95_v33 = vpop.xlane.xlu1 %94 }
  0xfe   :  { %v99_v34 = vmul.f32 %v95_v33, %v2904_v10 }
 0x100   :  { %v101_v35 = vadd.f32 1e-12, %v99_v34  ;;  %v3056_v34 = vld [vmem:[%s3776_s24 + $0x8] sm:$0xff] }
 0x102   :  { %2664 = vrsqrt.f32 %v101_v35  ;;  %vm109_vm3 = vweird.f32 %v101_v35 }
 0x105   :  { %v98_v40 = vpop.xlane.xlu1 %97 }
 0x106   :  { %v100_v43 = vmul.f32 %v98_v40, %v2904_v10 }
 0x108   :  { %v2665_v46 = vpop.eup %2664  ;;  %v102_v47 = vadd.f32 1e-12, %v100_v43 }
 0x109   :  { %v104_v48 = vmul.f32 %v2665_v46, %v101_v35  ;;  %vm110_vm2 = vweird.f32 %v2665_v46 }
 0x10a   :  { %2666 = vrsqrt.f32 %v102_v47  ;;  %vm111_vm4 = vmor %vm109_vm3, %vm110_vm2  ;;  %vm119_vm6 = vweird.f32 %v102_v47 }
 0x10b   :  { %v105_v49 = vmul.f32 %v2665_v46, %v104_v48 }
 0x10d   :  { %v106_v50 = vmul.f32 0.5, %v105_v49 }
 0x10f   :  { %v107_v51 = vsub.f32 1.5, %v106_v50 }
 0x110   :  { %v2667_v52 = vpop.eup %2666 }
 0x111   :  { %v108_v53 = vmul.f32 %v2665_v46, %v107_v51  ;;  %v114_v54 = vmul.f32 %v2667_v52, %v102_v47  ;;  %vm120_vm5 = vweird.f32 %v2667_v52 }
 0x112   :  { %vm121_vm7 = vmor %vm119_vm6, %vm120_vm5 }
 0x113   :  { %v112_v56 = vsel %vm111_vm4, %v2665_v46, %v108_v53  ;;  %v115_v57 = vmul.f32 %v2667_v52, %v114_v54 }
 0x114   :  { %v123_v59 = vmul.f32 %v112_v56, %v2907_v13 }
 0x115   :  { %v116_v60 = vmul.f32 0.5, %v115_v57  ;;  %v2415_v57 = vld [vmem:[%s3773_s0 + $0x58] sm:$0xff] }
 0x116   :  { %v128_v61 = vmul.f32 %v2622_v55, %v123_v59  ;;  %v2413_v59 = vld [vmem:[%s3773_s0 + $0x48] sm:$0xff] }
 0x117   :  { %v117_v62 = vsub.f32 1.5, %v116_v60  ;;  %v2412_v60 = vld [vmem:[%s3773_s0 + $0x40] sm:$0xff] }
 0x118   :  { %v2987_v63 = vadd.f32 %v2623_v58, %v128_v61 }
 0x119   :  { %v118_v0 = vmul.f32 %v2667_v52, %v117_v62 }
 0x11a   :  { %2368 = vmatmul.msk.f32.vlgmr.msra.gmra.mxu0 %vm73_vm0, %v2987_v63  ;;  %2370 = vmatmul.msk.f32.vlgmr.msra.gmra.mxu1 %vm73_vm0, %v2987_v63 }
 0x11b   :  { %v122_v1 = vsel %vm121_vm7, %v2667_v52, %v118_v0  ;;  %2372 = vmatmul.msk.f32.vlgmr.msra.gmra.mxu2 %vm73_vm0, %v2987_v63 }
 0x11c   :  { %v124_v2 = vmul.f32 %v122_v1, %v2913_v18  ;;  %v2626_v1 = vld [vmem:[%s3747_s6 + $0x1] ss:$0 sm:$0xff] }
 0x11e   :  { %v129_v3 = vmul.f32 %v2622_v55, %v124_v2 }
 0x120   :  { %v2996_v4 = vadd.f32 %v2623_v58, %v129_v3  ;;  %v2414_v58 = vld [vmem:[%s3773_s0 + $0x50] sm:$0xff] }
 0x122   :  { %2369 = vmatmul.msk.f32.gmra.mxu0 %vm73_vm0, %v2996_v4  ;;  %2371 = vmatmul.msk.f32.gmra.mxu1 %vm73_vm0, %v2996_v4 }
 0x123   :  { %2373 = vmatmul.msk.f32.gmra.mxu2 %vm73_vm0, %v2996_v4 }
 0x12a   :  { %2385 = vmatmul.msk.f32.vlgmr.msrb.gmra.mxu1 %vm73_vm0, %v2987_v63 }
 0x12b   :  { %2392 = vmatmul.msk.f32.vlgmr.msrb.gmra.mxu2 %vm73_vm0, %v2987_v63 }
 0x132   :  { %2386 = vmatmul.msk.f32.gmra.mxu1 %vm73_vm0, %v2996_v4 }
 0x133   :  { %2393 = vmatmul.msk.f32.gmra.mxu2 %vm73_vm0, %v2996_v4 }
 0x197   :  { %v199_v5 = vpop.f32.mrf.mxu1  ;;  %v168_v11 = vpop.f32.mrf.mxu0 }
 0x198   :  { %v200_v13 = vadd.f32 %v2625_v6, %v199_v5  ;;  %v169_v17 = vadd.f32 %v2624_v12, %v168_v11 }
 0x19e   :  { %v230_v7 = vpop.f32.mrf.mxu2 }
 0x19f   :  { %v202_v8 = vpop.f32.mrf.mxu1  ;;  %v231_v20 = vadd.f32 %v2627_v15, %v230_v7  ;;  %v171_v23 = vpop.f32.mrf.mxu0 }
 0x1a0   :  { %v203_v9 = vadd.f32 %v2625_v6, %v202_v8  ;;  %v172_v25 = vadd.f32 %v2624_v12, %v171_v23  ;;  %v324_v6 = vld [vmem:[%s3752_s11] sm:$0xff] }
 0x1a2   :  { %2374 = vmatpush.xpose.msk.msra.mxu3 %vm236_vm8, %v203_v9 }
 0x1a6   :  { %v233_v16 = vpop.f32.mrf.mxu2  ;;  %2375 = vmatpush.xpose.msk.msra.mxu3 %vm236_vm8, %v200_v13 }
 0x1a7   :  { %v234_v18 = vadd.f32 %v2627_v15, %v233_v16  ;;  %v352_v0 = vpop.f32.mrf.mxu1 }
 0x1a8   :  { %v353_v2 = vadd.f32 %v2626_v1, %v352_v0 }
 0x1a9   :  { %315 = vmatpush.msrb.mxu0 %v234_v18  ;;  %2376 = vmatmul.msk.f32.vlgmr.msra.gmra.mxu3 %vm236_vm8, %v169_v17 }
 0x1aa   :  { %413 = vmatpush.msrb.mxu3 %v2397_v14 }
 0x1ab   :  { %316 = vmatpush.msrb.mxu0 %v231_v20 }
 0x1ac   :  { %414 = vmatpush.msrb.mxu3 %v2396_v19 }
 0x1ae   :  { %415 = vmatpush.msrb.mxu3 %v2395_v21  ;;  %v385_v24 = vpop.f32.mrf.mxu2 }
 0x1af   :  { %v386_v29 = vadd.f32 %v2628_v26, %v385_v24  ;;  %v355_v3 = vpop.f32.mrf.mxu1 }
 0x1b0   :  { %416 = vmatpush.msrb.mxu3 %v2394_v22  ;;  %v356_v5 = vadd.f32 %v2626_v1, %v355_v3 }
 0x1b1   :  { %2377 = vmatmul.msk.f32.gmra.mxu3 %vm236_vm8, %v172_v25 }
 0x1b2   :  { %562 = vmatpush.msra.mxu3 %v324_v6 }
 0x1b6   :  { %v388_v27 = vpop.f32.mrf.mxu2 }
 0x1b7   :  { %v389_v28 = vadd.f32 %v2628_v26, %v388_v27  ;;  %v2422_v26 = vld [vmem:[%s3748_s7 + $0x58] sm:$0xff]  ;;  %v2421_v27 = vld [vmem:[%s3748_s7 + $0x50] sm:$0xff] }
 0x1b9   :  { %2401 = vmatpush.xpose.msk.msra.mxu0 %vm236_vm8, %v389_v28  ;;  %2399 = vmatmul.msk.f32.vlgmr.msrb.gmra.mxu3 %vm73_vm0, %v2987_v63  ;;  %v2420_v28 = vld [vmem:[%s3748_s7 + $0x48] sm:$0xff] }
 0x1bd   :  { %2402 = vmatpush.xpose.msk.msra.mxu0 %vm236_vm8, %v386_v29  ;;  %v2419_v29 = vld [vmem:[%s3748_s7 + $0x40] sm:$0xff] }
 0x1c1   :  { %2400 = vmatmul.msk.f32.gmra.mxu3 %vm73_vm0, %v2996_v4 }
 0x22c   :  { %v266_v31 = vpop.f32.mrf.mxu3 }
 0x22d   :  { %v267_v32 = vadd.f32 %v266_v31, %v3049_v30 }
 0x22f   :  { %v273_v33 = vsel %vm272_vm9, %v267_v32, -inf }
 0x230   :  { %274 = vmax.xlane.f32.xlu2 %v273_v33 }
 0x234   :  { %v269_v35 = vpop.f32.mrf.mxu3 }
 0x235   :  { %v270_v36 = vadd.f32 %v269_v35, %v3056_v34 }
 0x237   :  { %v276_v37 = vsel %vm272_vm9, %v270_v36, -inf }
 0x238   :  { %277 = vmax.xlane.f32.xlu2 %v276_v37 }
 0x23c   :  { %v418_v38 = vpop.f32.mrf.mxu3 }
 0x23d   :  { %v419_v42 = vadd.f32 %v2629_v39, %v418_v38  ;;  %v2407_v38 = vld [vmem:[%s3752_s11 + $0x8] sm:$0xff] }
 0x23e   :  { %533 = vmatpush.msra.mxu2 %v2407_v38  ;;  %v2457_v38 = vld [vmem:[%s3750_s9 + $0x68] sm:$0xff] }
 0x244   :  { %v421_v40 = vpop.f32.mrf.mxu3 }
 0x245   :  { %v422_v41 = vadd.f32 %v2629_v39, %v421_v40  ;;  %v2429_v39 = vld [vmem:[%s3750_s9 + $0x58] sm:$0xff]  ;;  %v2428_v40 = vld [vmem:[%s3750_s9 + $0x50] sm:$0xff] }
 0x246   :  { %658 = vmatpush.msrb.mxu2 %v2429_v39  ;;  %v2456_v39 = vld [vmem:[%s3750_s9 + $0x60] sm:$0xff] }
 0x247   :  { %501 = vmatpush.msra.mxu1 %v422_v41  ;;  %v2427_v41 = vld [vmem:[%s3750_s9 + $0x48] sm:$0xff] }
 0x248   :  { %659 = vmatpush.msrb.mxu2 %v2428_v40 }
 0x249   :  { %502 = vmatpush.msra.mxu1 %v419_v42  ;;  %v2426_v42 = vld [vmem:[%s3750_s9 + $0x40] sm:$0xff] }
 0x24a   :  { %660 = vmatpush.msrb.mxu2 %v2427_v41 }
 0x24b   :  { %625 = vmatpush.msrb.mxu1 %v2422_v26 }
 0x24c   :  { %661 = vmatpush.msrb.mxu2 %v2426_v42 }
 0x24d   :  { %626 = vmatpush.msrb.mxu1 %v2421_v27 }
 0x24f   :  { %627 = vmatpush.msrb.mxu1 %v2420_v28 }
 0x251   :  { %628 = vmatpush.msrb.mxu1 %v2419_v29 }
 0x2a3   :  { %v275_v43 = vpop.xlane.xlu2 %274 }
 0x2a4   :  { %v279_v44 = vsub.f32 %v267_v32, %v275_v43  ;;  %v2445_v43 = vld [vmem:[%s3773_s0 + $0x78] sm:$0xff] }
 0x2a6   :  { %v281_v45 = vmul.f32 1.442695, %v279_v44 }
 0x2a8   :  { %2668 = vpow2.f32 %v281_v45  ;;  %v2444_v45 = vld [vmem:[%s3773_s0 + $0x70] sm:$0xff] }
 0x2ab   :  { %v278_v46 = vpop.xlane.xlu2 %277 }
 0x2ac   :  { %v280_v47 = vsub.f32 %v270_v36, %v278_v46  ;;  %v2443_v46 = vld [vmem:[%s3773_s0 + $0x68] sm:$0xff] }
 0x2ae   :  { %v2669_v48 = vpop.eup %2668  ;;  %v283_v49 = vmul.f32 1.442695, %v280_v47  ;;  %v2442_v47 = vld [vmem:[%s3773_s0 + $0x60] sm:$0xff] }
 0x2af   :  { %v285_v50 = vsel %vm272_vm9, %v2669_v48, 0.0 }
 0x2b0   :  { %2670 = vpow2.f32 %v283_v49  ;;  %286 = vadd.xlane.f32.xlu0 %v285_v50  ;;  %v2631_v50 = vld [vmem:[%s3749_s8 + $0x2] ss:$0 sm:$0xff] }
 0x2b6   :  { %v2671_v51 = vpop.eup %2670 }
 0x2b7   :  { %v288_v52 = vsel %vm272_vm9, %v2671_v51, 0.0 }
 0x2b8   :  { %289 = vadd.xlane.f32.xlu1 %v288_v52 }
 0x323   :  { %v287_v53 = vpop.xlane.xlu0 %286 }
 0x324   :  { %2672 = vrcp.f32 %v287_v53 }
 0x32a   :  { %v2673_v54 = vpop.eup %2672 }
 0x32b   :  { %v290_v55 = vpop.xlane.xlu1 %289  ;;  %v293_v56 = vmul.f32 %v2673_v54, %v2669_v48  ;;  %v2630_v54 = vld [vmem:[%s3747_s6 + $0x2] ss:$0 sm:$0xff] }
 0x32c   :  { %2674 = vrcp.f32 %v290_v55 }
 0x32d   :  { %2378 = vmatmul.msk.f32.vlgmr.msrb.gmra.mxu0 %vm272_vm9, %v293_v56  ;;  %v2452_v56 = vld [vmem:[%s3748_s7 + $0x78] sm:$0xff] }
 0x32e   :  { %592 = vmatpush.msrb.mxu0 %v2415_v57 }
 0x330   :  { %593 = vmatpush.msrb.mxu0 %v2414_v58  ;;  %v2451_v58 = vld [vmem:[%s3748_s7 + $0x70] sm:$0xff] }
 0x332   :  { %v2675_v61 = vpop.eup %2674  ;;  %594 = vmatpush.msrb.mxu0 %v2413_v59  ;;  %v2450_v59 = vld [vmem:[%s3748_s7 + $0x68] sm:$0xff] }
 0x333   :  { %v294_v62 = vmul.f32 %v2675_v61, %v2671_v51 }
 0x334   :  { %595 = vmatpush.msrb.mxu0 %v2412_v60  ;;  %v2449_v60 = vld [vmem:[%s3748_s7 + $0x60] sm:$0xff] }
 0x335   :  { %2379 = vmatmul.msk.f32.gmra.mxu0 %vm272_vm9, %v294_v62 }
 0x33d   :  { %2403 = vmatmul.msk.f32.vlgmr.msra.gmra.mxu0 %vm236_vm8, %v353_v2 }
 0x345   :  { %2404 = vmatmul.msk.f32.gmra.mxu0 %vm236_vm8, %v356_v5 }
 0x34d   :  { %2417 = vmatmul.msk.f32.vlgmr.msrb.gmra.mxu0 %vm73_vm0, %v2987_v63 }
 0x355   :  { %2418 = vmatmul.msk.f32.gmra.mxu0 %vm73_vm0, %v2996_v4 }
 0x3aa   :  { %v318_v7 = vpop.f32.mrf.mxu0 }
 0x3ab   :  { %2410 = vmatmul.msk.f32.vlgmr.msra.gmra.mxu3 %vm236_vm8, %v318_v7  ;;  %v2632_v7 = vld [vmem:[%s3751_s10 + $0x2] ss:$0 sm:$0xff] }
 0x3b2   :  { %v321_v8 = vpop.f32.mrf.mxu0 }
 0x3b3   :  { %2411 = vmatmul.msk.f32.gmra.mxu3 %vm236_vm8, %v321_v8 }
 0x3ba   :  { %v453_v9 = vpop.f32.mrf.mxu0 }
 0x3bb   :  { %v454_v11 = vadd.f32 %v453_v9, %v3049_v30 }
 0x3bd   :  { %v459_v12 = vsel %vm272_vm9, %v454_v11, -inf }
 0x3be   :  { %460 = vmax.xlane.f32.xlu2 %v459_v12 }
 0x3c2   :  { %v456_v13 = vpop.f32.mrf.mxu0 }
 0x3c3   :  { %v457_v14 = vadd.f32 %v456_v13, %v3056_v34 }
 0x3c5   :  { %v462_v15 = vsel %vm272_vm9, %v457_v14, -inf }
 0x3c6   :  { %463 = vmax.xlane.f32.xlu0 %v462_v15 }
 0x3ca   :  { %v597_v53 = vpop.f32.mrf.mxu0 }
 0x3cb   :  { %v598_v57 = vadd.f32 %v2630_v54, %v597_v53 }
 0x3d2   :  { %v600_v61 = vpop.f32.mrf.mxu0 }
 0x3d3   :  { %v601_v62 = vadd.f32 %v2630_v54, %v600_v61  ;;  %v2635_v54 = vld [vmem:[%s3751_s10 + $0x3] ss:$0 sm:$0xff] }
 0x42e   :  { %v3180_v0 = vpop.f32.mrf.mxu3 }
 0x431   :  { %v461_v16 = vpop.xlane.xlu2 %460 }
 0x432   :  { %v465_v17 = vsub.f32 %v454_v11, %v461_v16  ;;  %v2439_v11 = vld [vmem:[%s3752_s11 + $0x10] sm:$0xff] }
 0x434   :  { %v467_v18 = vmul.f32 1.442695, %v465_v17 }
 0x436   :  { %2676 = vpow2.f32 %v467_v18  ;;  %v567_v2 = vpop.f32.mrf.mxu3 }
 0x439   :  { %v464_v19 = vpop.xlane.xlu0 %463 }
 0x43a   :  { %v466_v20 = vsub.f32 %v457_v14, %v464_v19 }
 0x43c   :  { %v2677_v21 = vpop.eup %2676  ;;  %v469_v22 = vmul.f32 1.442695, %v466_v20  ;;  %v2634_v20 = vld [vmem:[%s3749_s8 + $0x3] ss:$0 sm:$0xff] }
 0x43d   :  { %v471_v23 = vsel %vm272_vm9, %v2677_v21, 0.0 }
 0x43e   :  { %2678 = vpow2.f32 %v469_v22  ;;  %472 = vadd.xlane.f32.xlu1 %v471_v23 }
 0x444   :  { %v2679_v24 = vpop.eup %2678 }
 0x445   :  { %v474_v25 = vsel %vm272_vm9, %v2679_v24, 0.0 }
 0x446   :  { %475 = vadd.xlane.f32.xlu2 %v474_v25 }
 0x4b1   :  { %v473_v31 = vpop.xlane.xlu1 %472 }
 0x4b2   :  { %2680 = vrcp.f32 %v473_v31 }
 0x4b8   :  { %v2681_v32 = vpop.eup %2680 }
 0x4b9   :  { %v479_v33 = vmul.f32 %v2681_v32, %v2677_v21  ;;  %v476_v35 = vpop.xlane.xlu2 %475 }
 0x4ba   :  { %2682 = vrcp.f32 %v476_v35 }
 0x4bb   :  { %2405 = vmatmul.msk.f32.vlgmr.msra.gmra.mxu1 %vm272_vm9, %v479_v33 }
 0x4bc   :  { %778 = vmatpush.msra.mxu1 %v2439_v11 }
 0x4c0   :  { %v2683_v36 = vpop.eup %2682 }
 0x4c1   :  { %v480_v37 = vmul.f32 %v2683_v36, %v2679_v24  ;;  %v2459_v36 = vld [vmem:[%s3750_s9 + $0x78] sm:$0xff] }
 0x4c3   :  { %2406 = vmatmul.msk.f32.gmra.mxu1 %vm272_vm9, %v480_v37  ;;  %v2458_v37 = vld [vmem:[%s3750_s9 + $0x70] sm:$0xff] }
 0x4cb   :  { %2424 = vmatmul.msk.f32.vlgmr.msrb.gmra.mxu1 %vm73_vm0, %v2987_v63 }
 0x4d3   :  { %2425 = vmatmul.msk.f32.gmra.mxu1 %vm73_vm0, %v2996_v4 }
 0x538   :  { %v504_v44 = vpop.f32.mrf.mxu1 }
 0x539   :  { %2408 = vmatmul.msk.f32.vlgmr.msra.gmra.mxu2 %vm236_vm8, %v504_v44 }
 0x53a   :  { %810 = vmatpush.msra.mxu2 %v2445_v43 }
 0x53c   :  { %811 = vmatpush.msra.mxu2 %v2444_v45 }
 0x53e   :  { %812 = vmatpush.msra.mxu2 %v2443_v46 }
 0x540   :  { %v507_v48 = vpop.f32.mrf.mxu1  ;;  %813 = vmatpush.msra.mxu2 %v2442_v47 }
 0x541   :  { %2409 = vmatmul.msk.f32.gmra.mxu2 %vm236_vm8, %v507_v48 }
 0x548   :  { %v630_v49 = vpop.f32.mrf.mxu1 }
 0x549   :  { %2431 = vmatmul.msk.f32.vlgmr.msrb.gmra.mxu2 %vm73_vm0, %v2987_v63  ;;  %v631_v55 = vadd.f32 %v2631_v50, %v630_v49  ;;  %v2633_v49 = vld [vmem:[%s3747_s6 + $0x3] ss:$0 sm:$0xff] }
 0x550   :  { %v633_v51 = vpop.f32.mrf.mxu1 }
 0x551   :  { %v634_v52 = vadd.f32 %v2631_v50, %v633_v51  ;;  %2432 = vmatmul.msk.f32.gmra.mxu2 %vm73_vm0, %v2996_v4 }
 0x553   :  { %2433 = vmatpush.xpose.msk.msrb.mxu3 %vm236_vm8, %v634_v52 }
 0x557   :  { %2434 = vmatpush.xpose.msk.msrb.mxu3 %vm236_vm8, %v631_v55 }
 0x559   :  { %2447 = vmatmul.msk.f32.vlgmr.msra.gmra.mxu2 %vm73_vm0, %v2987_v63 }
 0x55a   :  { %2435 = vmatmul.msk.f32.vlgmr.msrb.gmra.mxu3 %vm236_vm8, %v598_v57 }
 0x55b   :  { %843 = vmatpush.msra.mxu3 %v2452_v56 }
 0x55d   :  { %844 = vmatpush.msra.mxu3 %v2451_v58 }
 0x55f   :  { %845 = vmatpush.msra.mxu3 %v2450_v59 }
 0x561   :  { %846 = vmatpush.msra.mxu3 %v2449_v60  ;;  %2448 = vmatmul.msk.f32.gmra.mxu2 %vm73_vm0, %v2996_v4 }
 0x562   :  { %2436 = vmatmul.msk.f32.gmra.mxu3 %vm236_vm8, %v601_v62 }
 0x56a   :  { %2454 = vmatmul.msk.f32.vlgmr.msra.gmra.mxu3 %vm73_vm0, %v2987_v63 }
 0x572   :  { %2455 = vmatmul.msk.f32.gmra.mxu3 %vm73_vm0, %v2996_v4 }
 0x5bc   :  { %v3182_v1 = vpop.f32.mrf.mxu2 }
 0x5bd   :  { %v565_v58 = vadd.f32 %v3180_v0, %v3182_v1 }
 0x5c4   :  { %v538_v3 = vpop.f32.mrf.mxu2 }
 0x5c5   :  { %v3184_v5 = vadd.f32 %v567_v2, %v538_v3 }
 0x5cc   :  { %v663_v6 = vpop.f32.mrf.mxu2 }
 0x5cd   :  { %v664_v12 = vadd.f32 %v2632_v7, %v663_v6 }
 0x5d4   :  { %v666_v8 = vpop.f32.mrf.mxu2 }
 0x5d5   :  { %v667_v9 = vadd.f32 %v2632_v7, %v666_v8 }
 0x5d7   :  { %746 = vmatpush.msra.mxu0 %v667_v9 }
 0x5d9   :  { %747 = vmatpush.msra.mxu0 %v664_v12 }
 0x5db   :  { %876 = vmatpush.msrb.mxu0 %v2459_v36 }
 0x5dc   :  { %v815_v48 = vpop.f32.mrf.mxu2 }
 0x5dd   :  { %v698_v13 = vpop.f32.mrf.mxu3  ;;  %877 = vmatpush.msrb.mxu0 %v2458_v37  ;;  %v816_v50 = vadd.f32 %v2633_v49, %v815_v48  ;;  %v1071_v48 = vld [vmem:[%s3756_s15 + $0x8] sm:$0xff] }
 0x5de   :  { %v699_v14 = vadd.f32 %v698_v13, %v3049_v30 }
 0x5df   :  { %878 = vmatpush.msrb.mxu0 %v2457_v38 }
 0x5e0   :  { %v704_v15 = vsel %vm272_vm9, %v699_v14, -inf }
 0x5e1   :  { %705 = vmax.xlane.f32.xlu0 %v704_v15  ;;  %879 = vmatpush.msrb.mxu0 %v2456_v39 }
 0x5e4   :  { %v818_v52 = vpop.f32.mrf.mxu2 }
 0x5e5   :  { %v701_v16 = vpop.f32.mrf.mxu3  ;;  %v819_v53 = vadd.f32 %v2633_v49, %v818_v52  ;;  %v1070_v49 = vld [vmem:[%s3756_s15] sm:$0xff] }
 0x5e6   :  { %v702_v17 = vadd.f32 %v701_v16, %v3056_v34 }
 0x5e8   :  { %v707_v18 = vsel %vm272_vm9, %v702_v17, -inf }
 0x5e9   :  { %708 = vmax.xlane.f32.xlu1 %v707_v18 }
 0x5ed   :  { %v848_v19 = vpop.f32.mrf.mxu3 }
 0x5ee   :  { %v849_v23 = vadd.f32 %v2634_v20, %v848_v19 }
 0x5f5   :  { %v851_v21 = vpop.f32.mrf.mxu3 }
 0x5f6   :  { %v852_v22 = vadd.f32 %v2634_v20, %v851_v21 }
 0x5f8   :  { %2463 = vmatpush.xpose.msk.msrb.mxu1 %vm236_vm8, %v852_v22 }
 0x5fc   :  { %2464 = vmatpush.xpose.msk.msrb.mxu1 %vm236_vm8, %v849_v23 }
 0x654   :  { %v706_v24 = vpop.xlane.xlu0 %705 }
 0x655   :  { %v710_v25 = vsub.f32 %v699_v14, %v706_v24 }
 0x657   :  { %v712_v26 = vmul.f32 1.442695, %v710_v25 }
 0x659   :  { %2684 = vpow2.f32 %v712_v26 }
 0x65c   :  { %v709_v27 = vpop.xlane.xlu1 %708 }
 0x65d   :  { %v711_v28 = vsub.f32 %v702_v17, %v709_v27  ;;  %v2636_v27 = vld [vmem:[%s3753_s12] ss:$0 sm:$0xff] }
 0x65f   :  { %v2685_v29 = vpop.eup %2684  ;;  %v714_v31 = vmul.f32 1.442695, %v711_v28 }
 0x660   :  { %v716_v32 = vsel %vm272_vm9, %v2685_v29, 0.0 }
 0x661   :  { %2686 = vpow2.f32 %v714_v31  ;;  %717 = vadd.xlane.f32.xlu2 %v716_v32 }
 0x667   :  { %v2687_v33 = vpop.eup %2686 }
 0x668   :  { %v719_v35 = vsel %vm272_vm9, %v2687_v33, 0.0 }
 0x669   :  { %720 = vadd.xlane.f32.xlu0 %v719_v35 }
 0x6d4   :  { %v718_v40 = vpop.xlane.xlu2 %717 }
 0x6d5   :  { %2688 = vrcp.f32 %v718_v40 }
 0x6db   :  { %v2689_v41 = vpop.eup %2688 }
 0x6dc   :  { %v724_v42 = vmul.f32 %v2689_v41, %v2685_v29  ;;  %v721_v43 = vpop.xlane.xlu0 %720 }
 0x6dd   :  { %2690 = vrcp.f32 %v721_v43 }
 0x6de   :  { %2437 = vmatmul.msk.f32.vlgmr.msra.gmra.mxu0 %vm272_vm9, %v724_v42 }
 0x6e3   :  { %v2691_v44 = vpop.eup %2690 }
 0x6e4   :  { %v725_v45 = vmul.f32 %v2691_v44, %v2687_v33 }
 0x6e6   :  { %2438 = vmatmul.msk.f32.gmra.mxu0 %vm272_vm9, %v725_v45 }
 0x6ee   :  { %2461 = vmatmul.msk.f32.vlgmr.msrb.gmra.mxu0 %vm73_vm0, %v2987_v63 }
 0x6f6   :  { %2462 = vmatmul.msk.f32.gmra.mxu0 %vm73_vm0, %v2996_v4 }
 0x75b   :  { %v749_v46 = vpop.f32.mrf.mxu0 }
 0x75c   :  { %2440 = vmatmul.msk.f32.vlgmr.msra.gmra.mxu1 %vm236_vm8, %v749_v46 }
 0x763   :  { %v752_v47 = vpop.f32.mrf.mxu0 }
 0x764   :  { %2441 = vmatmul.msk.f32.gmra.mxu1 %vm236_vm8, %v752_v47  ;;  %v1072_v47 = vld [vmem:[%s3756_s15 + $0x10] sm:$0xff] }
 0x76b   :  { %v881_v51 = vpop.f32.mrf.mxu0 }
 0x76c   :  { %2465 = vmatmul.msk.f32.vlgmr.msrb.gmra.mxu1 %vm236_vm8, %v816_v50  ;;  %v882_v57 = vadd.f32 %v2635_v54, %v881_v51 }
 0x773   :  { %v884_v55 = vpop.f32.mrf.mxu0 }
 0x774   :  { %v885_v56 = vadd.f32 %v2635_v54, %v884_v55  ;;  %2466 = vmatmul.msk.f32.gmra.mxu1 %vm236_vm8, %v819_v53 }
 0x776   :  { %964 = vmatpush.msrb.mxu2 %v885_v56 }
 0x778   :  { %965 = vmatpush.msrb.mxu2 %v882_v57 }
 0x7d9   :  { %v780_v59 = vpop.f32.mrf.mxu1 }
 0x7da   :  { %v786_v60 = vadd.f32 %v780_v59, %v565_v58 }
 0x7e1   :  { %v783_v61 = vpop.f32.mrf.mxu1 }
 0x7e2   :  { %v787_v62 = vadd.f32 %v783_v61, %v3184_v5 }
 0x7e9   :  { %v916_v2 = vpop.f32.mrf.mxu1 }
 0x7ea   :  { %v917_v3 = vadd.f32 %v916_v2, %v3049_v30 }
 0x7ec   :  { %v922_v6 = vsel %vm272_vm9, %v917_v3, -inf }
 0x7ed   :  { %923 = vmax.xlane.f32.xlu1 %v922_v6 }
 0x7f1   :  { %v919_v7 = vpop.f32.mrf.mxu1 }
 0x7f2   :  { %v920_v8 = vadd.f32 %v919_v7, %v3056_v34  ;;  %v2469_v34 = vld [vmem:[%s3752_s11 + $0x18] sm:$0xff] }
 0x7f3   :  { %996 = vmatpush.msrb.mxu3 %v2469_v34  ;;  %v1131_v34 = vld [vmem:[%s3758_s17 + $0x30] sm:$0xff] }
 0x7f4   :  { %v925_v9 = vsel %vm272_vm9, %v920_v8, -inf }
 0x7f5   :  { %926 = vmax.xlane.f32.xlu2 %v925_v9  ;;  %v2638_v9 = vld [vmem:[%s3755_s14] ss:$0 sm:$0xff] }
 0x860   :  { %v924_v11 = vpop.xlane.xlu1 %923 }
 0x861   :  { %v928_v12 = vsub.f32 %v917_v3, %v924_v11  ;;  %v2637_v3 = vld [vmem:[%s3754_s13] ss:$0 sm:$0xff] }
 0x863   :  { %v930_v0 = vmul.f32 1.442695, %v928_v12 }
 0x865   :  { %2692 = vpow2.f32 %v930_v0 }
 0x868   :  { %v927_v1 = vpop.xlane.xlu2 %926 }
 0x869   :  { %v929_v13 = vsub.f32 %v920_v8, %v927_v1 }
 0x86b   :  { %v2693_v14 = vpop.eup %2692  ;;  %v932_v5 = vmul.f32 1.442695, %v929_v13 }
 0x86c   :  { %v934_v15 = vsel %vm272_vm9, %v2693_v14, 0.0 }
 0x86d   :  { %2694 = vpow2.f32 %v932_v5  ;;  %935 = vadd.xlane.f32.xlu0 %v934_v15 }
 0x873   :  { %v2695_v30 = vpop.eup %2694 }
 0x874   :  { %v937_v16 = vsel %vm272_vm9, %v2695_v30, 0.0 }
 0x875   :  { %938 = vadd.xlane.f32.xlu1 %v937_v16  ;;  %v1132_v16 = vld [vmem:[%s3758_s17 + $0x38] sm:$0xff] }
 0x876   :  { %1152 = vmatpush.msra.mxu1 %v1132_v16 }
 0x878   :  { %1153 = vmatpush.msra.mxu1 %v1131_v34 }
 0x8e0   :  { %v936_v17 = vpop.xlane.xlu0 %935 }
 0x8e1   :  { %2696 = vrcp.f32 %v936_v17  ;;  %v1130_v17 = vld [vmem:[%s3758_s17 + $0x28] sm:$0xff] }
 0x8e2   :  { %1154 = vmatpush.msra.mxu1 %v1130_v17  ;;  %v2507_v17 = vld [vmem:[%s3773_s0 + $0xb8] sm:$0xff] }
 0x8e7   :  { %v2697_v18 = vpop.eup %2696 }
 0x8e8   :  { %v942_v19 = vmul.f32 %v2697_v18, %v2693_v14  ;;  %v939_v20 = vpop.xlane.xlu1 %938  ;;  %v1129_v18 = vld [vmem:[%s3758_s17 + $0x20] sm:$0xff] }
 0x8e9   :  { %2698 = vrcp.f32 %v939_v20  ;;  %1155 = vmatpush.msra.mxu1 %v1129_v18  ;;  %v1127_v20 = vld [vmem:[%s3758_s17 + $0x10] sm:$0xff]  ;;  %v2514_v18 = vld [vmem:[%s3748_s7 + $0xb8] sm:$0xff] }
 0x8ea   :  { %2467 = vmatmul.msk.f32.vlgmr.msrb.gmra.mxu2 %vm272_vm9, %v942_v19  ;;  %v1128_v19 = vld [vmem:[%s3758_s17 + $0x18] sm:$0xff] }
 0x8eb   :  { %1156 = vmatpush.msra.mxu1 %v1128_v19  ;;  %v2506_v19 = vld [vmem:[%s3773_s0 + $0xb0] sm:$0xff] }
 0x8ed   :  { %1157 = vmatpush.msra.mxu1 %v1127_v20  ;;  %v2513_v20 = vld [vmem:[%s3748_s7 + $0xb0] sm:$0xff] }
 0x8ef   :  { %v2699_v21 = vpop.eup %2698 }
 0x8f0   :  { %v943_v22 = vmul.f32 %v2699_v21, %v2695_v30  ;;  %v1126_v21 = vld [vmem:[%s3758_s17 + $0x8] sm:$0xff] }
 0x8f1   :  { %1158 = vmatpush.msra.mxu1 %v1126_v21 }
 0x8f2   :  { %2468 = vmatmul.msk.f32.gmra.mxu2 %vm272_vm9, %v943_v22  ;;  %v1125_v22 = vld [vmem:[%s3758_s17] sm:$0xff] }
 0x8f3   :  { %1159 = vmatpush.msra.mxu1 %v1125_v22  ;;  %v2505_v22 = vld [vmem:[%s3773_s0 + $0xa8] sm:$0xff] }
 0x96d   :  { %v967_v23 = vpop.f32.mrf.mxu2 }
 0x96e   :  { %2470 = vmatmul.msk.f32.vlgmr.msrb.gmra.mxu3 %vm236_vm8, %v967_v23  ;;  %v2639_v23 = vld [vmem:[%s3757_s16] ss:$0 sm:$0xff] }
 0x975   :  { %v970_v24 = vpop.f32.mrf.mxu2 }
 0x976   :  { %2471 = vmatmul.msk.f32.gmra.mxu3 %vm236_vm8, %v970_v24 }
 0x9f1   :  { %v998_v25 = vpop.f32.mrf.mxu3 }
 0x9f2   :  { %v1004_v26 = vadd.f32 %v998_v25, %v786_v60 }
 0x9f4   :  { %v1006_v28 = vadd.f32 %v1004_v26, %v2987_v63 }
 0x9f6   :  { %v1012_v29 = vadd.f32 %v2636_v27, %v1006_v28 }
 0x9f8   :  { %v1016_v31 = vsel %vm73_vm0, %v1012_v29, 0.0 }
 0x9f9   :  { %1017 = vadd.xlane.f32.xlu2 %v1016_v31  ;;  %v1001_v32 = vpop.f32.mrf.mxu3 }
 0x9fa   :  { %v1005_v33 = vadd.f32 %v1001_v32, %v787_v62 }
 0x9fc   :  { %v1007_v35 = vadd.f32 %v1005_v33, %v2996_v4  ;;  %v1073_v4 = vld [vmem:[%s3756_s15 + $0x18] sm:$0xff] }
 0x9fd   :  { %1096 = vmatpush.msra.mxu0 %v1073_v4  ;;  %v2640_v4 = vld [vmem:[%s3759_s18] ss:$0 sm:$0xff] }
 0x9fe   :  { %v1013_v36 = vadd.f32 %v2636_v27, %v1007_v35 }
 0x9ff   :  { %1097 = vmatpush.msra.mxu0 %v1072_v47 }
 0xa00   :  { %v1019_v37 = vsel %vm73_vm0, %v1013_v36, 0.0 }
 0xa01   :  { %1020 = vadd.xlane.f32.xlu0 %v1019_v37  ;;  %1098 = vmatpush.msra.mxu0 %v1071_v48 }
 0xa03   :  { %1099 = vmatpush.msra.mxu0 %v1070_v49 }
 0xa6c   :  { %v1018_v38 = vpop.xlane.xlu2 %1017 }
 0xa6d   :  { %v1022_v39 = vmul.f32 %v1018_v38, %v2904_v10 }
 0xa6f   :  { %v1024_v40 = vsub.f32 %v1012_v29, %v1022_v39 }
 0xa71   :  { %v1026_v41 = vmul.f32 %v1024_v40, %v1024_v40 }
 0xa73   :  { %v1028_v42 = vsel %vm73_vm0, %v1026_v41, 0.0 }
 0xa74   :  { %1029 = vadd.xlane.f32.xlu1 %v1028_v42  ;;  %v1021_v63 = vpop.xlane.xlu0 %1020 }
 0xa75   :  { %v1023_v43 = vmul.f32 %v1021_v63, %v2904_v10 }
 0xa77   :  { %v1025_v44 = vsub.f32 %v1013_v36, %v1023_v43 }
 0xa79   :  { %v1027_v45 = vmul.f32 %v1025_v44, %v1025_v44 }
 0xa7b   :  { %v1031_v46 = vsel %vm73_vm0, %v1027_v45, 0.0 }
 0xa7c   :  { %1032 = vadd.xlane.f32.xlu2 %v1031_v46 }
 0xae7   :  { %v1030_v50 = vpop.xlane.xlu1 %1029 }
 0xae8   :  { %v1034_v51 = vmul.f32 %v1030_v50, %v2904_v10 }
 0xaea   :  { %v1036_v52 = vadd.f32 1e-12, %v1034_v51 }
 0xaec   :  { %2700 = vrsqrt.f32 %v1036_v52  ;;  %vm1044_vm11 = vweird.f32 %v1036_v52 }
 0xaef   :  { %v1033_v53 = vpop.xlane.xlu2 %1032 }
 0xaf0   :  { %v1035_v54 = vmul.f32 %v1033_v53, %v2904_v10 }
 0xaf2   :  { %v2701_v55 = vpop.eup %2700  ;;  %v1037_v56 = vadd.f32 1e-12, %v1035_v54 }
 0xaf3   :  { %v1039_v57 = vmul.f32 %v2701_v55, %v1036_v52  ;;  %vm1045_vm10 = vweird.f32 %v2701_v55 }
 0xaf4   :  { %2702 = vrsqrt.f32 %v1037_v56  ;;  %vm1046_vm12 = vmor %vm1044_vm11, %vm1045_vm10  ;;  %vm1054_vm14 = vweird.f32 %v1037_v56 }
 0xaf5   :  { %v1040_v58 = vmul.f32 %v2701_v55, %v1039_v57 }
 0xaf7   :  { %v1041_v59 = vmul.f32 0.5, %v1040_v58 }
 0xaf9   :  { %v1042_v60 = vsub.f32 1.5, %v1041_v59 }
 0xafa   :  { %v2703_v61 = vpop.eup %2702 }
 0xafb   :  { %v1043_v62 = vmul.f32 %v2701_v55, %v1042_v60  ;;  %v1049_v2 = vmul.f32 %v2703_v61, %v1037_v56  ;;  %vm1055_vm13 = vweird.f32 %v2703_v61 }
 0xafc   :  { %vm1056_vm15 = vmor %vm1054_vm14, %vm1055_vm13 }
 0xafd   :  { %v1047_v6 = vsel %vm1046_vm12, %v2701_v55, %v1043_v62  ;;  %v1050_v7 = vmul.f32 %v2703_v61, %v1049_v2 }
 0xafe   :  { %v1058_v8 = vmul.f32 %v1047_v6, %v1024_v40  ;;  %v2479_v6 = vld [vmem:[%s3773_s0 + $0x98] sm:$0xff] }
 0xaff   :  { %v1051_v11 = vmul.f32 0.5, %v1050_v7  ;;  %v2486_v7 = vld [vmem:[%s3748_s7 + $0x98] sm:$0xff]  ;;  %1253 = vmatpush.msra.mxu2 %v2479_v6  ;;  %v2520_v6 = vld [vmem:[%s3750_s9 + $0xb0] sm:$0xff] }
 0xb00   :  { %v1063_v12 = vmul.f32 %v2637_v3, %v1058_v8  ;;  %v2493_v8 = vld [vmem:[%s3750_s9 + $0x98] sm:$0xff]  ;;  %1286 = vmatpush.msra.mxu3 %v2486_v7  ;;  %v2646_v7 = vld [vmem:[%s3749_s8 + $0x5] ss:$0 sm:$0xff] }
 0xb01   :  { %v1052_v0 = vsub.f32 1.5, %v1051_v11  ;;  %1319 = vmatpush.msrb.mxu0 %v2493_v8  ;;  %v2485_v11 = vld [vmem:[%s3748_s7 + $0x90] sm:$0xff]  ;;  %v2519_v8 = vld [vmem:[%s3750_s9 + $0xa8] sm:$0xff] }
 0xb02   :  { %v1068_v1 = vadd.f32 %v2638_v9, %v1063_v12  ;;  %v2492_v12 = vld [vmem:[%s3750_s9 + $0x90] sm:$0xff]  ;;  %1287 = vmatpush.msra.mxu3 %v2485_v11 }
 0xb03   :  { %v1053_v13 = vmul.f32 %v2703_v61, %v1052_v0  ;;  %1320 = vmatpush.msrb.mxu0 %v2492_v12  ;;  %v2477_v0 = vld [vmem:[%s3773_s0 + $0x88] sm:$0xff]  ;;  %v2518_v12 = vld [vmem:[%s3750_s9 + $0xa0] sm:$0xff] }
 0xb04   :  { %2472 = vmatmul.msk.f32.vlgmr.msra.gmra.mxu0 %vm73_vm0, %v1068_v1 }
 0xb05   :  { %v1057_v14 = vsel %vm1056_vm15, %v2703_v61, %v1053_v13  ;;  %v2491_v13 = vld [vmem:[%s3750_s9 + $0x88] sm:$0xff] }
 0xb06   :  { %v1059_v5 = vmul.f32 %v1057_v14, %v1025_v44  ;;  %1321 = vmatpush.msrb.mxu0 %v2491_v13  ;;  %v2476_v14 = vld [vmem:[%s3773_s0 + $0x80] sm:$0xff] }
 0xb08   :  { %v1064_v15 = vmul.f32 %v2637_v3, %v1059_v5  ;;  %v2483_v5 = vld [vmem:[%s3748_s7 + $0x80] sm:$0xff] }
 0xb0a   :  { %v1069_v30 = vadd.f32 %v2638_v9, %v1064_v15  ;;  %v2478_v9 = vld [vmem:[%s3773_s0 + $0x90] sm:$0xff]  ;;  %v2490_v15 = vld [vmem:[%s3750_s9 + $0x80] sm:$0xff] }
 0xb0b   :  { %1254 = vmatpush.msra.mxu2 %v2478_v9  ;;  %1322 = vmatpush.msrb.mxu0 %v2490_v15 }
 0xb0c   :  { %2473 = vmatmul.msk.f32.gmra.mxu0 %vm73_vm0, %v1069_v30 }
 0xb0d   :  { %1255 = vmatpush.msra.mxu2 %v2477_v0  ;;  %1473 = vmatpush.msra.mxu0 %v2514_v18 }
 0xb0f   :  { %1256 = vmatpush.msra.mxu2 %v2476_v14  ;;  %1474 = vmatpush.msra.mxu0 %v2513_v20  ;;  %v2648_v20 = vld [vmem:[%s3751_s10 + $0x5] ss:$0 sm:$0xff] }
 0xb81   :  { %v1101_v24 = vpop.f32.mrf.mxu0 }
 0xb82   :  { %v1102_v25 = vadd.f32 %v2639_v23, %v1101_v24 }
 0xb84   :  { %v1107_v26 = vmul.f32 %v1102_v25, %v1102_v25 }
 0xb86   :  { %v1109_v27 = vmul.f32 %v1107_v26, %v1102_v25  ;;  %v2511_v26 = vld [vmem:[%s3748_s7 + $0xa0] sm:$0xff] }
 0xb88   :  { %v1111_v28 = vmul.f32 0.044715, %v1109_v27 }
 0xb89   :  { %v1104_v29 = vpop.f32.mrf.mxu0 }
 0xb8a   :  { %v1113_v31 = vadd.f32 %v1111_v28, %v1102_v25  ;;  %v1105_v32 = vadd.f32 %v2639_v23, %v1104_v29  ;;  %v2512_v23 = vld [vmem:[%s3748_s7 + $0xa8] sm:$0xff] }
 0xb8b   :  { %1475 = vmatpush.msra.mxu0 %v2512_v23 }
 0xb8c   :  { %v1115_v33 = vmul.f32 0.7978846, %v1113_v31  ;;  %v1108_v35 = vmul.f32 %v1105_v32, %v1105_v32 }
 0xb8d   :  { %1476 = vmatpush.msra.mxu0 %v2511_v26 }
 0xb8e   :  { %2704 = vtanh.f32 %v1115_v33  ;;  %v1110_v36 = vmul.f32 %v1108_v35, %v1105_v32 }
 0xb90   :  { %v1112_v37 = vmul.f32 0.044715, %v1110_v36 }
 0xb92   :  { %v1114_v38 = vadd.f32 %v1112_v37, %v1105_v32 }
 0xb94   :  { %v2705_v39 = vpop.eup %2704  ;;  %v1116_v40 = vmul.f32 0.7978846, %v1114_v38  ;;  %v2641_v38 = vld [vmem:[%s3760_s19] ss:$0 sm:$0xff] }
 0xb95   :  { %v1119_v41 = vadd.f32 1.0, %v2705_v39 }
 0xb96   :  { %2706 = vtanh.f32 %v1116_v40 }
 0xb97   :  { %v1121_v42 = vmul.f32 0.5, %v1119_v41  ;;  %v2642_v41 = vld [vmem:[%s3761_s20] ss:$0 sm:$0xff] }
 0xb99   :  { %v1123_v63 = vmul.f32 %v1121_v42, %v1102_v25  ;;  %v2504_v25 = vld [vmem:[%s3773_s0 + $0xa0] sm:$0xff] }
 0xb9b   :  { %2474 = vmatmul.msk.f32.vlgmr.msra.gmra.mxu1 %vm1137_vm1, %v1123_v63 }
 0xb9c   :  { %v2707_v43 = vpop.eup %2706 }
 0xb9d   :  { %v1120_v44 = vadd.f32 1.0, %v2707_v43 }
 0xb9f   :  { %v1122_v45 = vmul.f32 0.5, %v1120_v44 }
 0xba1   :  { %v1124_v46 = vmul.f32 %v1122_v45, %v1105_v32 }
 0xba3   :  { %2475 = vmatmul.msk.f32.gmra.mxu1 %vm1137_vm1, %v1124_v46 }
 0xc18   :  { %v1161_v47 = vpop.f32.mrf.mxu1 }
 0xc19   :  { %v1162_v48 = vadd.f32 %v2640_v4, %v1161_v47 }
 0xc1b   :  { %v1167_v49 = vadd.f32 %v1162_v48, %v1068_v1  ;;  %v2484_v1 = vld [vmem:[%s3748_s7 + $0x88] sm:$0xff] }
 0xc1c   :  { %1288 = vmatpush.msra.mxu3 %v2484_v1 }
 0xc1d   :  { %v1171_v50 = vsel %vm73_vm0, %v1167_v49, 0.0 }
 0xc1e   :  { %1172 = vadd.xlane.f32.xlu0 %v1171_v50  ;;  %1289 = vmatpush.msra.mxu3 %v2483_v5  ;;  %v3457_v5 = vld [vmem:[%s3776_s24] sm:$0xff] }
 0xc20   :  { %v1164_v51 = vpop.f32.mrf.mxu1  ;;  %1440 = vmatpush.msrb.mxu3 %v2507_v17 }
 0xc21   :  { %v1165_v52 = vadd.f32 %v2640_v4, %v1164_v51 }
 0xc22   :  { %1441 = vmatpush.msrb.mxu3 %v2506_v19 }
 0xc23   :  { %v1168_v53 = vadd.f32 %v1165_v52, %v1069_v30  ;;  %v2643_v52 = vld [vmem:[%s3751_s10 + $0x4] ss:$0 sm:$0xff] }
 0xc24   :  { %1442 = vmatpush.msrb.mxu3 %v2505_v22 }
 0xc25   :  { %v1174_v54 = vsel %vm73_vm0, %v1168_v53, 0.0 }
 0xc26   :  { %1175 = vadd.xlane.f32.xlu1 %v1174_v54  ;;  %1443 = vmatpush.msrb.mxu3 %v2504_v25 }
 0xc91   :  { %v1173_v55 = vpop.xlane.xlu0 %1172 }
 0xc92   :  { %v1177_v56 = vmul.f32 %v1173_v55, %v2904_v10 }
 0xc94   :  { %v3315_v57 = vsub.f32 %v1167_v49, %v1177_v56  ;;  %v2645_v56 = vld [vmem:[%s3749_s8 + $0x4] ss:$0 sm:$0xff] }
 0xc96   :  { %v1181_v58 = vmul.f32 %v3315_v57, %v3315_v57 }
 0xc98   :  { %v1183_v59 = vsel %vm73_vm0, %v1181_v58, 0.0 }
 0xc99   :  { %v1176_v60 = vpop.xlane.xlu1 %1175  ;;  %1184 = vadd.xlane.f32.xlu2 %v1183_v59 }
 0xc9a   :  { %v1178_v61 = vmul.f32 %v1176_v60, %v2904_v10 }
 0xc9c   :  { %v3321_v62 = vsub.f32 %v1168_v53, %v1178_v61  ;;  %v2644_v61 = vld [vmem:[%s3747_s6 + $0x4] ss:$0 sm:$0xff] }
 0xc9e   :  { %v1182_v2 = vmul.f32 %v3321_v62, %v3321_v62 }
 0xca0   :  { %v1186_v3 = vsel %vm73_vm0, %v1182_v2, 0.0  ;;  %v2521_v2 = vld [vmem:[%s3750_s9 + $0xb8] sm:$0xff] }
 0xca1   :  { %1187 = vadd.xlane.f32.xlu0 %v1186_v3 }
 0xd0c   :  { %v1185_v30 = vpop.xlane.xlu2 %1184 }
 0xd0d   :  { %v1189_v16 = vmul.f32 %v1185_v30, %v2904_v10 }
 0xd0f   :  { %v1191_v34 = vadd.f32 1e-12, %v1189_v16 }
 0xd11   :  { %2708 = vrsqrt.f32 %v1191_v34  ;;  %vm1199_vm3 = vweird.f32 %v1191_v34 }
 0xd14   :  { %v1188_v21 = vpop.xlane.xlu0 %1187 }
 0xd15   :  { %v1190_v24 = vmul.f32 %v1188_v21, %v2904_v10 }
 0xd17   :  { %v2709_v27 = vpop.eup %2708  ;;  %v1192_v28 = vadd.f32 1e-12, %v1190_v24 }
 0xd18   :  { %v1194_v29 = vmul.f32 %v2709_v27, %v1191_v34  ;;  %vm1200_vm2 = vweird.f32 %v2709_v27  ;;  %v3464_v34 = vld [vmem:[%s3776_s24 + $0x8] sm:$0xff] }
 0xd19   :  { %2710 = vrsqrt.f32 %v1192_v28  ;;  %vm1201_vm4 = vmor %vm1199_vm3, %vm1200_vm2  ;;  %vm1209_vm6 = vweird.f32 %v1192_v28 }
 0xd1a   :  { %v1195_v31 = vmul.f32 %v2709_v27, %v1194_v29 }
 0xd1c   :  { %v1196_v32 = vmul.f32 0.5, %v1195_v31 }
 0xd1e   :  { %v1197_v33 = vsub.f32 1.5, %v1196_v32 }
 0xd1f   :  { %v2711_v35 = vpop.eup %2710 }
 0xd20   :  { %v1198_v36 = vmul.f32 %v2709_v27, %v1197_v33  ;;  %v1204_v37 = vmul.f32 %v2711_v35, %v1192_v28  ;;  %vm1210_vm5 = vweird.f32 %v2711_v35 }
 0xd21   :  { %vm1211_vm7 = vmor %vm1209_vm6, %vm1210_vm5  ;;  %vm2350_vm5 = vcmask 254976  }
 0xd22   :  { %v1202_v39 = vsel %vm1201_vm4, %v2709_v27, %v1198_v36  ;;  %v1205_v40 = vmul.f32 %v2711_v35, %v1204_v37 }
 0xd23   :  { %v1213_v42 = vmul.f32 %v1202_v39, %v3315_v57 }
 0xd24   :  { %v1206_v63 = vmul.f32 0.5, %v1205_v40  ;;  %v2539_v40 = vld [vmem:[%s3773_s0 + $0xd8] sm:$0xff] }
 0xd25   :  { %v1218_v43 = vmul.f32 %v2641_v38, %v1213_v42  ;;  %v2537_v42 = vld [vmem:[%s3773_s0 + $0xc8] sm:$0xff] }
 0xd26   :  { %v1207_v44 = vsub.f32 1.5, %v1206_v63  ;;  %v2536_v63 = vld [vmem:[%s3773_s0 + $0xc0] sm:$0xff] }
 0xd27   :  { %v3395_v45 = vadd.f32 %v2642_v41, %v1218_v43 }
 0xd28   :  { %v1208_v46 = vmul.f32 %v2711_v35, %v1207_v44 }
 0xd29   :  { %2481 = vmatmul.msk.f32.vlgmr.msra.gmra.mxu2 %vm73_vm0, %v3395_v45  ;;  %2488 = vmatmul.msk.f32.vlgmr.msra.gmra.mxu3 %vm73_vm0, %v3395_v45 }
 0xd2a   :  { %v1212_v4 = vsel %vm1211_vm7, %v2711_v35, %v1208_v46  ;;  %2495 = vmatmul.msk.f32.vlgmr.msrb.gmra.mxu0 %vm73_vm0, %v3395_v45 }
 0xd2b   :  { %v1214_v47 = vmul.f32 %v1212_v4, %v3321_v62  ;;  %v2647_v4 = vld [vmem:[%s3747_s6 + $0x5] ss:$0 sm:$0xff] }
 0xd2d   :  { %v1219_v48 = vmul.f32 %v2641_v38, %v1214_v47 }
 0xd2f   :  { %v3404_v49 = vadd.f32 %v2642_v41, %v1219_v48  ;;  %v2538_v41 = vld [vmem:[%s3773_s0 + $0xd0] sm:$0xff] }
 0xd31   :  { %2482 = vmatmul.msk.f32.gmra.mxu2 %vm73_vm0, %v3404_v49  ;;  %2489 = vmatmul.msk.f32.gmra.mxu3 %vm73_vm0, %v3404_v49 }
 0xd32   :  { %2496 = vmatmul.msk.f32.gmra.mxu0 %vm73_vm0, %v3404_v49 }
 0xd39   :  { %2509 = vmatmul.msk.f32.vlgmr.msrb.gmra.mxu3 %vm73_vm0, %v3395_v45 }
 0xd3a   :  { %2516 = vmatmul.msk.f32.vlgmr.msra.gmra.mxu0 %vm73_vm0, %v3395_v45 }
 0xd41   :  { %2510 = vmatmul.msk.f32.gmra.mxu3 %vm73_vm0, %v3404_v49 }
 0xd42   :  { %2517 = vmatmul.msk.f32.gmra.mxu0 %vm73_vm0, %v3404_v49 }
 0xda7   :  { %v1324_v50 = vpop.f32.mrf.mxu0 }
 0xda8   :  { %v1325_v55 = vadd.f32 %v2643_v52, %v1324_v50 }
 0xdac   :  { %v1291_v51 = vpop.f32.mrf.mxu3  ;;  %v1258_v59 = vpop.f32.mrf.mxu2 }
 0xdad   :  { %v1292_v62 = vadd.f32 %v2645_v56, %v1291_v51  ;;  %v1259_v3 = vadd.f32 %v2644_v61, %v1258_v59  ;;  %v2503_v51 = vld [vmem:[%s3752_s11 + $0x20] sm:$0xff] }
 0xdaf   :  { %v1327_v53 = vpop.f32.mrf.mxu0 }
 0xdb0   :  { %v1328_v54 = vadd.f32 %v2643_v52, %v1327_v53 }
 0xdb2   :  { %1407 = vmatpush.msrb.mxu2 %v1328_v54 }
 0xdb4   :  { %1408 = vmatpush.msrb.mxu2 %v1325_v55  ;;  %v1294_v57 = vpop.f32.mrf.mxu3  ;;  %v1261_v0 = vpop.f32.mrf.mxu2 }
 0xdb5   :  { %v1295_v58 = vadd.f32 %v2645_v56, %v1294_v57  ;;  %v1262_v1 = vadd.f32 %v2644_v61, %v1261_v0  ;;  %v2545_v0 = vld [vmem:[%s3748_s7 + $0xd0] sm:$0xff] }
 0xdb7   :  { %v1478_v60 = vpop.f32.mrf.mxu0  ;;  %2497 = vmatpush.xpose.msk.msrb.mxu1 %vm236_vm8, %v1295_v58 }
 0xdb8   :  { %v1479_v13 = vadd.f32 %v2646_v7, %v1478_v60 }
 0xdbb   :  { %2498 = vmatpush.xpose.msk.msrb.mxu1 %vm236_vm8, %v1292_v62 }
 0xdbc   :  { %v1445_v46 = vpop.f32.mrf.mxu3 }
 0xdbd   :  { %v1446_v47 = vadd.f32 %v2647_v4, %v1445_v46 }
 0xdbe   :  { %2499 = vmatmul.msk.f32.vlgmr.msrb.gmra.mxu1 %vm236_vm8, %v1259_v3 }
 0xdbf   :  { %1506 = vmatpush.msra.mxu1 %v2521_v2  ;;  %v1481_v9 = vpop.f32.mrf.mxu0 }
 0xdc0   :  { %v1482_v11 = vadd.f32 %v2646_v7, %v1481_v9 }
 0xdc1   :  { %1507 = vmatpush.msra.mxu1 %v2520_v6 }
 0xdc2   :  { %2525 = vmatpush.xpose.msk.msra.mxu2 %vm236_vm8, %v1482_v11 }
 0xdc3   :  { %1508 = vmatpush.msra.mxu1 %v2519_v8 }
 0xdc4   :  { %v1448_v48 = vpop.f32.mrf.mxu3 }
 0xdc5   :  { %1509 = vmatpush.msra.mxu1 %v2518_v12  ;;  %v1449_v50 = vadd.f32 %v2647_v4, %v1448_v48  ;;  %v2546_v12 = vld [vmem:[%s3748_s7 + $0xd8] sm:$0xff] }
 0xdc6   :  { %2526 = vmatpush.xpose.msk.msra.mxu2 %vm236_vm8, %v1479_v13  ;;  %2500 = vmatmul.msk.f32.gmra.mxu1 %vm236_vm8, %v1262_v1  ;;  %v2544_v1 = vld [vmem:[%s3748_s7 + $0xc8] sm:$0xff]  ;;  %v2543_v13 = vld [vmem:[%s3748_s7 + $0xc0] sm:$0xff] }
 0xdc7   :  { %1655 = vmatpush.msrb.mxu1 %v2503_v51 }
 0xdce   :  { %2523 = vmatmul.msk.f32.vlgmr.msra.gmra.mxu1 %vm73_vm0, %v3395_v45 }
 0xdd6   :  { %2524 = vmatmul.msk.f32.gmra.mxu1 %vm73_vm0, %v3404_v49 }
 0xe3b   :  { %v1359_v14 = vpop.f32.mrf.mxu1 }
 0xe3c   :  { %v1360_v15 = vadd.f32 %v3457_v5, %v1359_v14 }
 0xe3e   :  { %v1365_v30 = vsel %vm272_vm9, %v1360_v15, -inf }
 0xe3f   :  { %1366 = vmax.xlane.f32.xlu1 %v1365_v30 }
 0xe43   :  { %v1362_v16 = vpop.f32.mrf.mxu1 }
 0xe44   :  { %v1363_v17 = vadd.f32 %v3464_v34, %v1362_v16 }
 0xe46   :  { %v1368_v18 = vsel %vm272_vm9, %v1363_v17, -inf }
 0xe47   :  { %1369 = vmax.xlane.f32.xlu2 %v1368_v18 }
 0xe4b   :  { %v1511_v19 = vpop.f32.mrf.mxu1 }
 0xe4c   :  { %v1512_v23 = vadd.f32 %v2648_v20, %v1511_v19  ;;  %v2531_v19 = vld [vmem:[%s3752_s11 + $0x28] sm:$0xff] }
 0xe4d   :  { %1626 = vmatpush.msrb.mxu0 %v2531_v19  ;;  %v2581_v19 = vld [vmem:[%s3750_s9 + $0xe8] sm:$0xff] }
 0xe53   :  { %v1514_v21 = vpop.f32.mrf.mxu1 }
 0xe54   :  { %v1515_v22 = vadd.f32 %v2648_v20, %v1514_v21  ;;  %v2553_v20 = vld [vmem:[%s3750_s9 + $0xd8] sm:$0xff]  ;;  %v2552_v21 = vld [vmem:[%s3750_s9 + $0xd0] sm:$0xff] }
 0xe55   :  { %1751 = vmatpush.msra.mxu0 %v2553_v20  ;;  %v2580_v20 = vld [vmem:[%s3750_s9 + $0xe0] sm:$0xff] }
 0xe56   :  { %1594 = vmatpush.msra.mxu3 %v1515_v22  ;;  %v2551_v22 = vld [vmem:[%s3750_s9 + $0xc8] sm:$0xff] }
 0xe57   :  { %1752 = vmatpush.msra.mxu0 %v2552_v21 }
 0xe58   :  { %1595 = vmatpush.msra.mxu3 %v1512_v23  ;;  %v2550_v23 = vld [vmem:[%s3750_s9 + $0xc0] sm:$0xff] }
 0xe59   :  { %1753 = vmatpush.msra.mxu0 %v2551_v22 }
 0xe5a   :  { %1718 = vmatpush.msrb.mxu3 %v2546_v12 }
 0xe5b   :  { %1754 = vmatpush.msra.mxu0 %v2550_v23 }
 0xe5c   :  { %1719 = vmatpush.msrb.mxu3 %v2545_v0 }
 0xe5e   :  { %1720 = vmatpush.msrb.mxu3 %v2544_v1 }
 0xe60   :  { %1721 = vmatpush.msrb.mxu3 %v2543_v13 }
 0xeb2   :  { %v1367_v24 = vpop.xlane.xlu1 %1366 }
 0xeb3   :  { %v1371_v25 = vsub.f32 %v1360_v15, %v1367_v24  ;;  %v2569_v24 = vld [vmem:[%s3773_s0 + $0xf8] sm:$0xff] }
 0xeb5   :  { %v1373_v26 = vmul.f32 1.442695, %v1371_v25 }
 0xeb7   :  { %2712 = vpow2.f32 %v1373_v26  ;;  %v2568_v26 = vld [vmem:[%s3773_s0 + $0xf0] sm:$0xff] }
 0xeba   :  { %v1370_v27 = vpop.xlane.xlu2 %1369 }
 0xebb   :  { %v1372_v28 = vsub.f32 %v1363_v17, %v1370_v27  ;;  %v2567_v27 = vld [vmem:[%s3773_s0 + $0xe8] sm:$0xff] }
 0xebd   :  { %v2713_v29 = vpop.eup %2712  ;;  %v1375_v31 = vmul.f32 1.442695, %v1372_v28  ;;  %v2566_v28 = vld [vmem:[%s3773_s0 + $0xe0] sm:$0xff] }
 0xebe   :  { %v1377_v32 = vsel %vm272_vm9, %v2713_v29, 0.0 }
 0xebf   :  { %2714 = vpow2.f32 %v1375_v31  ;;  %1378 = vadd.xlane.f32.xlu0 %v1377_v32  ;;  %v2650_v32 = vld [vmem:[%s3749_s8 + $0x6] ss:$0 sm:$0xff] }
 0xec5   :  { %v2715_v33 = vpop.eup %2714 }
 0xec6   :  { %v1380_v35 = vsel %vm272_vm9, %v2715_v33, 0.0 }
 0xec7   :  { %1381 = vadd.xlane.f32.xlu1 %v1380_v35 }
 0xf32   :  { %v1379_v36 = vpop.xlane.xlu0 %1378 }
 0xf33   :  { %2716 = vrcp.f32 %v1379_v36 }
 0xf39   :  { %v2717_v37 = vpop.eup %2716 }
 0xf3a   :  { %v1385_v38 = vmul.f32 %v2717_v37, %v2713_v29  ;;  %v1382_v39 = vpop.xlane.xlu1 %1381  ;;  %v2649_v37 = vld [vmem:[%s3747_s6 + $0x6] ss:$0 sm:$0xff] }
 0xf3b   :  { %2718 = vrcp.f32 %v1382_v39  ;;  %v2576_v39 = vld [vmem:[%s3748_s7 + $0xf8] sm:$0xff] }
 0xf3c   :  { %2501 = vmatmul.msk.f32.vlgmr.msrb.gmra.mxu2 %vm272_vm9, %v1385_v38 }
 0xf3d   :  { %1685 = vmatpush.msrb.mxu2 %v2539_v40 }
 0xf3f   :  { %1686 = vmatpush.msrb.mxu2 %v2538_v41  ;;  %v2575_v41 = vld [vmem:[%s3748_s7 + $0xf0] sm:$0xff] }
 0xf41   :  { %v2719_v43 = vpop.eup %2718  ;;  %1687 = vmatpush.msrb.mxu2 %v2537_v42  ;;  %v2574_v42 = vld [vmem:[%s3748_s7 + $0xe8] sm:$0xff] }
 0xf42   :  { %v1386_v44 = vmul.f32 %v2719_v43, %v2715_v33 }
 0xf43   :  { %1688 = vmatpush.msrb.mxu2 %v2536_v63  ;;  %v2573_v63 = vld [vmem:[%s3748_s7 + $0xe0] sm:$0xff] }
 0xf44   :  { %2502 = vmatmul.msk.f32.gmra.mxu2 %vm272_vm9, %v1386_v44 }
 0xf4c   :  { %2527 = vmatmul.msk.f32.vlgmr.msra.gmra.mxu2 %vm236_vm8, %v1446_v47 }
 0xf54   :  { %2528 = vmatmul.msk.f32.gmra.mxu2 %vm236_vm8, %v1449_v50 }
 0xf5c   :  { %2541 = vmatmul.msk.f32.vlgmr.msrb.gmra.mxu2 %vm73_vm0, %v3395_v45 }
 0xf64   :  { %2542 = vmatmul.msk.f32.gmra.mxu2 %vm73_vm0, %v3404_v49 }
 0xfbf   :  { %v1410_v52 = vpop.f32.mrf.mxu2 }
 0xfc0   :  { %2534 = vmatmul.msk.f32.vlgmr.msrb.gmra.mxu1 %vm236_vm8, %v1410_v52  ;;  %v2651_v52 = vld [vmem:[%s3751_s10 + $0x6] ss:$0 sm:$0xff] }
 0xfc7   :  { %v1413_v53 = vpop.f32.mrf.mxu2 }
 0xfc8   :  { %2535 = vmatmul.msk.f32.gmra.mxu1 %vm236_vm8, %v1413_v53 }
 0xfcf   :  { %v1546_v54 = vpop.f32.mrf.mxu2 }
 0xfd0   :  { %v1547_v55 = vadd.f32 %v3457_v5, %v1546_v54 }
 0xfd2   :  { %v1552_v56 = vsel %vm272_vm9, %v1547_v55, -inf }
 0xfd3   :  { %1553 = vmax.xlane.f32.xlu2 %v1552_v56 }
 0xfd7   :  { %v1549_v57 = vpop.f32.mrf.mxu2 }
 0xfd8   :  { %v1550_v58 = vadd.f32 %v3464_v34, %v1549_v57 }
 0xfda   :  { %v1555_v59 = vsel %vm272_vm9, %v1550_v58, -inf }
 0xfdb   :  { %1556 = vmax.xlane.f32.xlu0 %v1555_v59 }
 0xfdf   :  { %v1690_v36 = vpop.f32.mrf.mxu2 }
 0xfe0   :  { %v1691_v40 = vadd.f32 %v2649_v37, %v1690_v36 }
 0xfe7   :  { %v1693_v43 = vpop.f32.mrf.mxu2 }
 0xfe8   :  { %v1694_v44 = vadd.f32 %v2649_v37, %v1693_v43  ;;  %v2654_v37 = vld [vmem:[%s3751_s10 + $0x7] ss:$0 sm:$0xff] }
0x103d   :  { %v3588_v46 = vpop.f32.mrf.mxu1 }
0x1045   :  { %v1660_v47 = vpop.f32.mrf.mxu1 }
0x1046   :  { %v1554_v60 = vpop.xlane.xlu2 %1553 }
0x1047   :  { %v1558_v61 = vsub.f32 %v1547_v55, %v1554_v60  ;;  %v2563_v55 = vld [vmem:[%s3752_s11 + $0x30] sm:$0xff] }
0x1049   :  { %v1560_v62 = vmul.f32 1.442695, %v1558_v61 }
0x104b   :  { %2720 = vpow2.f32 %v1560_v62 }
0x104e   :  { %v1557_v2 = vpop.xlane.xlu0 %1556 }
0x104f   :  { %v1559_v3 = vsub.f32 %v1550_v58, %v1557_v2 }
0x1051   :  { %v2721_v6 = vpop.eup %2720  ;;  %v1562_v7 = vmul.f32 1.442695, %v1559_v3  ;;  %v2653_v3 = vld [vmem:[%s3749_s8 + $0x7] ss:$0 sm:$0xff] }
0x1052   :  { %v1564_v8 = vsel %vm272_vm9, %v2721_v6, 0.0 }
0x1053   :  { %2722 = vpow2.f32 %v1562_v7  ;;  %1565 = vadd.xlane.f32.xlu1 %v1564_v8 }
0x1059   :  { %v2723_v9 = vpop.eup %2722 }
0x105a   :  { %v1567_v11 = vsel %vm272_vm9, %v2723_v9, 0.0 }
0x105b   :  { %1568 = vadd.xlane.f32.xlu2 %v1567_v11 }
0x10c6   :  { %v1566_v14 = vpop.xlane.xlu1 %1565 }
0x10c7   :  { %2724 = vrcp.f32 %v1566_v14 }
0x10cd   :  { %v2725_v15 = vpop.eup %2724 }
0x10ce   :  { %v1572_v30 = vmul.f32 %v2725_v15, %v2721_v6  ;;  %v1569_v16 = vpop.xlane.xlu2 %1568 }
0x10cf   :  { %2726 = vrcp.f32 %v1569_v16 }
0x10d0   :  { %2529 = vmatmul.msk.f32.vlgmr.msra.gmra.mxu3 %vm272_vm9, %v1572_v30 }
0x10d1   :  { %1871 = vmatpush.msra.mxu3 %v2563_v55 }
0x10d5   :  { %v2727_v17 = vpop.eup %2726 }
0x10d6   :  { %v1573_v18 = vmul.f32 %v2727_v17, %v2723_v9  ;;  %v2583_v17 = vld [vmem:[%s3750_s9 + $0xf8] sm:$0xff] }
0x10d8   :  { %2530 = vmatmul.msk.f32.gmra.mxu3 %vm272_vm9, %v1573_v18  ;;  %v2582_v18 = vld [vmem:[%s3750_s9 + $0xf0] sm:$0xff] }
0x10e0   :  { %2548 = vmatmul.msk.f32.vlgmr.msrb.gmra.mxu3 %vm73_vm0, %v3395_v45 }
0x10e8   :  { %2549 = vmatmul.msk.f32.gmra.mxu3 %vm73_vm0, %v3404_v49 }
0x1153   :  { %v1597_v25 = vpop.f32.mrf.mxu3 }
0x1154   :  { %2532 = vmatmul.msk.f32.vlgmr.msrb.gmra.mxu0 %vm236_vm8, %v1597_v25 }
0x1155   :  { %1903 = vmatpush.msrb.mxu0 %v2569_v24 }
0x1157   :  { %1904 = vmatpush.msrb.mxu0 %v2568_v26 }
0x1159   :  { %1905 = vmatpush.msrb.mxu0 %v2567_v27 }
0x115b   :  { %v1600_v29 = vpop.f32.mrf.mxu3  ;;  %1906 = vmatpush.msrb.mxu0 %v2566_v28 }
0x115c   :  { %2533 = vmatmul.msk.f32.gmra.mxu0 %vm236_vm8, %v1600_v29 }
0x1163   :  { %v1723_v31 = vpop.f32.mrf.mxu3 }
0x1164   :  { %2555 = vmatmul.msk.f32.vlgmr.msra.gmra.mxu0 %vm73_vm0, %v3395_v45  ;;  %v1724_v38 = vadd.f32 %v2650_v32, %v1723_v31  ;;  %v2652_v31 = vld [vmem:[%s3747_s6 + $0x7] ss:$0 sm:$0xff] }
0x116b   :  { %v1726_v33 = vpop.f32.mrf.mxu3 }
0x116c   :  { %v1727_v35 = vadd.f32 %v2650_v32, %v1726_v33  ;;  %2556 = vmatmul.msk.f32.gmra.mxu0 %vm73_vm0, %v3404_v49 }
0x116e   :  { %2557 = vmatpush.xpose.msk.msra.mxu1 %vm236_vm8, %v1727_v35 }
0x1172   :  { %2558 = vmatpush.xpose.msk.msra.mxu1 %vm236_vm8, %v1724_v38 }
0x1174   :  { %2571 = vmatmul.msk.f32.vlgmr.msrb.gmra.mxu0 %vm73_vm0, %v3395_v45 }
0x1175   :  { %2559 = vmatmul.msk.f32.vlgmr.msra.gmra.mxu1 %vm236_vm8, %v1691_v40 }
0x1176   :  { %1936 = vmatpush.msrb.mxu1 %v2576_v39 }
0x1178   :  { %1937 = vmatpush.msrb.mxu1 %v2575_v41 }
0x117a   :  { %1938 = vmatpush.msrb.mxu1 %v2574_v42 }
0x117c   :  { %1939 = vmatpush.msrb.mxu1 %v2573_v63  ;;  %2572 = vmatmul.msk.f32.gmra.mxu0 %vm73_vm0, %v3404_v49 }
0x117d   :  { %2560 = vmatmul.msk.f32.gmra.mxu1 %vm236_vm8, %v1694_v44 }
0x1185   :  { %2578 = vmatmul.msk.f32.vlgmr.msrb.gmra.mxu1 %vm73_vm0, %v3395_v45 }
0x118d   :  { %2579 = vmatmul.msk.f32.gmra.mxu1 %vm73_vm0, %v3404_v49 }
0x11d1   :  { %v3590_v4 = vpop.f32.mrf.mxu0 }
0x11d2   :  { %v1658_v41 = vadd.f32 %v3588_v46, %v3590_v4 }
0x11d9   :  { %v1631_v48 = vpop.f32.mrf.mxu0 }
0x11da   :  { %v3592_v50 = vadd.f32 %v1660_v47, %v1631_v48 }
0x11e1   :  { %v1756_v51 = vpop.f32.mrf.mxu0 }
0x11e2   :  { %v1757_v56 = vadd.f32 %v2651_v52, %v1756_v51 }
0x11e9   :  { %v1759_v53 = vpop.f32.mrf.mxu0 }
0x11ea   :  { %v1760_v54 = vadd.f32 %v2651_v52, %v1759_v53 }
0x11ec   :  { %1839 = vmatpush.msra.mxu2 %v1760_v54 }
0x11ee   :  { %1840 = vmatpush.msra.mxu2 %v1757_v56 }
0x11f0   :  { %1969 = vmatpush.msrb.mxu2 %v2583_v17 }
0x11f1   :  { %v1908_v29 = vpop.f32.mrf.mxu0 }
0x11f2   :  { %v1791_v57 = vpop.f32.mrf.mxu1  ;;  %1970 = vmatpush.msrb.mxu2 %v2582_v18  ;;  %v1909_v32 = vadd.f32 %v2652_v31, %v1908_v29  ;;  %v2600_v29 = vld [vmem:[%s3756_s15 + $0x28] sm:$0xff] }
0x11f3   :  { %v1792_v58 = vadd.f32 %v3457_v5, %v1791_v57 }
0x11f4   :  { %1971 = vmatpush.msrb.mxu2 %v2581_v19 }
0x11f5   :  { %v1797_v59 = vsel %vm272_vm9, %v1792_v58, -inf }
0x11f6   :  { %1798 = vmax.xlane.f32.xlu0 %v1797_v59  ;;  %1972 = vmatpush.msrb.mxu2 %v2580_v20 }
0x11f9   :  { %v1911_v35 = vpop.f32.mrf.mxu0 }
0x11fa   :  { %v1794_v60 = vpop.f32.mrf.mxu1  ;;  %v1912_v36 = vadd.f32 %v2652_v31, %v1911_v35  ;;  %v2599_v31 = vld [vmem:[%s3756_s15 + $0x20] sm:$0xff] }
0x11fb   :  { %v1795_v61 = vadd.f32 %v3464_v34, %v1794_v60 }
0x11fd   :  { %v1800_v62 = vsel %vm272_vm9, %v1795_v61, -inf }
0x11fe   :  { %1801 = vmax.xlane.f32.xlu1 %v1800_v62 }
0x1202   :  { %v1941_v2 = vpop.f32.mrf.mxu1 }
0x1203   :  { %v1942_v8 = vadd.f32 %v2653_v3, %v1941_v2 }
0x120a   :  { %v1944_v6 = vpop.f32.mrf.mxu1 }
0x120b   :  { %v1945_v7 = vadd.f32 %v2653_v3, %v1944_v6 }
0x120d   :  { %2587 = vmatpush.xpose.msk.msrb.mxu3 %vm236_vm8, %v1945_v7 }
0x1211   :  { %2588 = vmatpush.xpose.msk.msrb.mxu3 %vm236_vm8, %v1942_v8 }
0x1269   :  { %v1799_v9 = vpop.xlane.xlu0 %1798 }
0x126a   :  { %v1803_v11 = vsub.f32 %v1792_v58, %v1799_v9 }
0x126c   :  { %v1805_v12 = vmul.f32 1.442695, %v1803_v11 }
0x126e   :  { %2728 = vpow2.f32 %v1805_v12 }
0x1271   :  { %v1802_v0 = vpop.xlane.xlu1 %1801 }
0x1272   :  { %v1804_v1 = vsub.f32 %v1795_v61, %v1802_v0  ;;  %v2655_v0 = vld [vmem:[%s3753_s12 + $0x1] ss:$0 sm:$0xff] }
0x1274   :  { %v2729_v13 = vpop.eup %2728  ;;  %v1807_v14 = vmul.f32 1.442695, %v1804_v1 }
0x1275   :  { %v1809_v15 = vsel %vm272_vm9, %v2729_v13, 0.0 }
0x1276   :  { %2730 = vpow2.f32 %v1807_v14  ;;  %1810 = vadd.xlane.f32.xlu2 %v1809_v15 }
0x127c   :  { %v2731_v30 = vpop.eup %2730 }
0x127d   :  { %v1812_v16 = vsel %vm272_vm9, %v2731_v30, 0.0 }
0x127e   :  { %1813 = vadd.xlane.f32.xlu0 %v1812_v16 }
0x12e9   :  { %v1811_v21 = vpop.xlane.xlu2 %1810 }
0x12ea   :  { %2732 = vrcp.f32 %v1811_v21 }
0x12f0   :  { %v2733_v22 = vpop.eup %2732 }
0x12f1   :  { %v1817_v23 = vmul.f32 %v2733_v22, %v2729_v13  ;;  %v1814_v24 = vpop.xlane.xlu0 %1813 }
0x12f2   :  { %2734 = vrcp.f32 %v1814_v24 }
0x12f3   :  { %2561 = vmatmul.msk.f32.vlgmr.msra.gmra.mxu2 %vm272_vm9, %v1817_v23 }
0x12f8   :  { %v2735_v25 = vpop.eup %2734 }
0x12f9   :  { %v1818_v26 = vmul.f32 %v2735_v25, %v2731_v30 }
0x12fb   :  { %2562 = vmatmul.msk.f32.gmra.mxu2 %vm272_vm9, %v1818_v26 }
0x1303   :  { %2585 = vmatmul.msk.f32.vlgmr.msrb.gmra.mxu2 %vm73_vm0, %v3395_v45 }
0x130b   :  { %2586 = vmatmul.msk.f32.gmra.mxu2 %vm73_vm0, %v3404_v49 }
0x1376   :  { %v1842_v27 = vpop.f32.mrf.mxu2 }
0x1377   :  { %2564 = vmatmul.msk.f32.vlgmr.msra.gmra.mxu3 %vm236_vm8, %v1842_v27 }
0x137e   :  { %v1845_v28 = vpop.f32.mrf.mxu2 }
0x137f   :  { %2565 = vmatmul.msk.f32.gmra.mxu3 %vm236_vm8, %v1845_v28  ;;  %v2601_v28 = vld [vmem:[%s3756_s15 + $0x30] sm:$0xff] }
0x1386   :  { %v1974_v33 = vpop.f32.mrf.mxu2 }
0x1387   :  { %2589 = vmatmul.msk.f32.vlgmr.msrb.gmra.mxu3 %vm236_vm8, %v1909_v32  ;;  %v1975_v40 = vadd.f32 %v2654_v37, %v1974_v33 }
0x138e   :  { %v1977_v38 = vpop.f32.mrf.mxu2 }
0x138f   :  { %v1978_v39 = vadd.f32 %v2654_v37, %v1977_v38  ;;  %2590 = vmatmul.msk.f32.gmra.mxu3 %vm236_vm8, %v1912_v36 }
0x1391   :  { %2057 = vmatpush.msra.mxu0 %v1978_v39 }
0x1393   :  { %2058 = vmatpush.msra.mxu0 %v1975_v40 }
0x13fa   :  { %v1873_v42 = vpop.f32.mrf.mxu3 }
0x13fb   :  { %v1879_v63 = vadd.f32 %v1873_v42, %v1658_v41 }
0x1402   :  { %v1876_v43 = vpop.f32.mrf.mxu3 }
0x1403   :  { %v1880_v44 = vadd.f32 %v1876_v43, %v3592_v50 }
0x140a   :  { %v2009_v47 = vpop.f32.mrf.mxu3 }
0x140b   :  { %v2010_v48 = vadd.f32 %v3457_v5, %v2009_v47 }
0x140d   :  { %v2015_v51 = vsel %vm272_vm9, %v2010_v48, -inf }
0x140e   :  { %2016 = vmax.xlane.f32.xlu1 %v2015_v51 }
0x1412   :  { %v2012_v52 = vpop.f32.mrf.mxu3 }
0x1413   :  { %v2013_v53 = vadd.f32 %v3464_v34, %v2012_v52  ;;  %v2593_v34 = vld [vmem:[%s3752_s11 + $0x38] sm:$0xff] }
0x1414   :  { %2089 = vmatpush.msra.mxu1 %v2593_v34  ;;  %v2612_v34 = vld [vmem:[%s3758_s17 + $0x70] sm:$0xff] }
0x1415   :  { %v2018_v54 = vsel %vm272_vm9, %v2013_v53, -inf }
0x1416   :  { %2019 = vmax.xlane.f32.xlu2 %v2018_v54 }
0x1481   :  { %v2017_v55 = vpop.xlane.xlu1 %2016 }
0x1482   :  { %v2021_v56 = vsub.f32 %v2010_v48, %v2017_v55  ;;  %v2656_v48 = vld [vmem:[%s3754_s13 + $0x1] ss:$0 sm:$0xff] }
0x1484   :  { %v2023_v46 = vmul.f32 1.442695, %v2021_v56 }
0x1486   :  { %2736 = vpow2.f32 %v2023_v46 }
0x1489   :  { %v2020_v4 = vpop.xlane.xlu2 %2019 }
0x148a   :  { %v2022_v57 = vsub.f32 %v2013_v53, %v2020_v4  ;;  %v2657_v53 = vld [vmem:[%s3755_s14 + $0x1] ss:$0 sm:$0xff]  ;;  %s2359_s14 = sshll.u32 %s3762_s21, 4  ;;  %s2360_s14 = int_to_ptr.hbm [resolvable:$true] %s2359_s14 }
0x148c   :  { %v2737_v58 = vpop.eup %2736  ;;  %v2025_v50 = vmul.f32 1.442695, %v2022_v57 }
0x148d   :  { %v2027_v59 = vsel %vm272_vm9, %v2737_v58, 0.0 }
0x148e   :  { %2738 = vpow2.f32 %v2025_v50  ;;  %2028 = vadd.xlane.f32.xlu0 %v2027_v59 }
0x1494   :  { %v2739_v5 = vpop.eup %2738 }
0x1495   :  { %v2030_v60 = vsel %vm272_vm9, %v2739_v5, 0.0 }
0x1496   :  { %2031 = vadd.xlane.f32.xlu1 %v2030_v60  ;;  %v2613_v60 = vld [vmem:[%s3758_s17 + $0x78] sm:$0xff] }
0x1497   :  { %2251 = vmatpush.msra.mxu3 %v2613_v60 }
0x1499   :  { %2252 = vmatpush.msra.mxu3 %v2612_v34 }
0x1501   :  { %v2029_v61 = vpop.xlane.xlu0 %2028 }
0x1502   :  { %2740 = vrcp.f32 %v2029_v61  ;;  %v2611_v61 = vld [vmem:[%s3758_s17 + $0x68] sm:$0xff] }
0x1503   :  { %2253 = vmatpush.msra.mxu3 %v2611_v61 }
0x1508   :  { %v2741_v62 = vpop.eup %2740 }
0x1509   :  { %v2035_v2 = vmul.f32 %v2741_v62, %v2737_v58  ;;  %v2032_v3 = vpop.xlane.xlu1 %2031  ;;  %v2610_v62 = vld [vmem:[%s3758_s17 + $0x60] sm:$0xff] }
0x150a   :  { %2742 = vrcp.f32 %v2032_v3  ;;  %2254 = vmatpush.msra.mxu3 %v2610_v62  ;;  %v2608_v3 = vld [vmem:[%s3758_s17 + $0x50] sm:$0xff] }
0x150b   :  { %2591 = vmatmul.msk.f32.vlgmr.msra.gmra.mxu0 %vm272_vm9, %v2035_v2  ;;  %v2609_v2 = vld [vmem:[%s3758_s17 + $0x58] sm:$0xff] }
0x150c   :  { %2255 = vmatpush.msra.mxu3 %v2609_v2 }
0x150e   :  { %2256 = vmatpush.msra.mxu3 %v2608_v3 }
0x1510   :  { %v2743_v6 = vpop.eup %2742 }
0x1511   :  { %v2036_v7 = vmul.f32 %v2743_v6, %v2739_v5  ;;  %v2607_v6 = vld [vmem:[%s3758_s17 + $0x48] sm:$0xff] }
0x1512   :  { %2257 = vmatpush.msra.mxu3 %v2607_v6 }
0x1513   :  { %2592 = vmatmul.msk.f32.gmra.mxu0 %vm272_vm9, %v2036_v7  ;;  %v2606_v7 = vld [vmem:[%s3758_s17 + $0x40] sm:$0xff] }
0x1514   :  { %2258 = vmatpush.msra.mxu3 %v2606_v7 }
0x1588   :  { %v2060_v8 = vpop.f32.mrf.mxu0 }
0x1589   :  { %2594 = vmatmul.msk.f32.vlgmr.msra.gmra.mxu1 %vm236_vm8, %v2060_v8  ;;  %v2658_v8 = vld [vmem:[%s3757_s16 + $0x1] ss:$0 sm:$0xff] }
0x1590   :  { %v2063_v9 = vpop.f32.mrf.mxu0 }
0x1591   :  { %2595 = vmatmul.msk.f32.gmra.mxu1 %vm236_vm8, %v2063_v9 }
0x1606   :  { %v2091_v11 = vpop.f32.mrf.mxu1 }
0x1607   :  { %v2097_v12 = vadd.f32 %v2091_v11, %v1879_v63 }
0x1609   :  { %v2099_v1 = vadd.f32 %v2097_v12, %v3395_v45 }
0x160b   :  { %v2106_v13 = vadd.f32 %v2655_v0, %v2099_v1 }
0x160d   :  { %v2112_v14 = vsel %vm73_vm0, %v2106_v13, 0.0 }
0x160e   :  { %2113 = vadd.xlane.f32.xlu2 %v2112_v14  ;;  %v2094_v15 = vpop.f32.mrf.mxu1 }
0x160f   :  { %v2098_v30 = vadd.f32 %v2094_v15, %v1880_v44 }
0x1611   :  { %v2100_v16 = vadd.f32 %v2098_v30, %v3404_v49  ;;  %v2602_v49 = vld [vmem:[%s3756_s15 + $0x38] sm:$0xff] }
0x1612   :  { %2194 = vmatpush.msra.mxu2 %v2602_v49  ;;  %v2659_v49 = vld [vmem:[%s3759_s18 + $0x1] ss:$0 sm:$0xff] }
0x1613   :  { %v2107_v17 = vadd.f32 %v2655_v0, %v2100_v16 }
0x1614   :  { %2195 = vmatpush.msra.mxu2 %v2601_v28 }
0x1615   :  { %v2115_v18 = vsel %vm73_vm0, %v2107_v17, 0.0 }
0x1616   :  { %2116 = vadd.xlane.f32.xlu0 %v2115_v18  ;;  %2196 = vmatpush.msra.mxu2 %v2600_v29 }
0x1618   :  { %2197 = vmatpush.msra.mxu2 %v2599_v31 }
0x1681   :  { %v2114_v19 = vpop.xlane.xlu2 %2113 }
0x1682   :  { %v2118_v20 = vmul.f32 %v2114_v19, %v2904_v10 }
0x1684   :  { %v2120_v21 = vsub.f32 %v2106_v13, %v2118_v20 }
0x1686   :  { %v2122_v22 = vmul.f32 %v2120_v21, %v2120_v21 }
0x1688   :  { %v2124_v23 = vsel %vm73_vm0, %v2122_v22, 0.0 }
0x1689   :  { %2125 = vadd.xlane.f32.xlu1 %v2124_v23  ;;  %v2117_v45 = vpop.xlane.xlu0 %2116 }
0x168a   :  { %v2119_v24 = vmul.f32 %v2117_v45, %v2904_v10 }
0x168c   :  { %v2121_v25 = vsub.f32 %v2107_v17, %v2119_v24 }
0x168e   :  { %v2123_v26 = vmul.f32 %v2121_v25, %v2121_v25 }
0x1690   :  { %v2127_v27 = vsel %vm73_vm0, %v2123_v26, 0.0 }
0x1691   :  { %2128 = vadd.xlane.f32.xlu2 %v2127_v27 }
0x16fc   :  { %v2126_v32 = vpop.xlane.xlu1 %2125 }
0x16fd   :  { %v2130_v33 = vmul.f32 %v2126_v32, %v2904_v10 }
0x16ff   :  { %v2132_v35 = vadd.f32 1e-12, %v2130_v33 }
0x1701   :  { %2744 = vrsqrt.f32 %v2132_v35  ;;  %vm2140_vm10 = vweird.f32 %v2132_v35 }
0x1704   :  { %v2129_v36 = vpop.xlane.xlu2 %2128 }
0x1705   :  { %v2131_v37 = vmul.f32 %v2129_v36, %v2904_v10 }
0x1707   :  { %v2745_v38 = vpop.eup %2744  ;;  %v2133_v39 = vadd.f32 1e-12, %v2131_v37 }
0x1708   :  { %v2135_v40 = vmul.f32 %v2745_v38, %v2132_v35  ;;  %vm2141_vm8 = vweird.f32 %v2745_v38 }
0x1709   :  { %2746 = vrsqrt.f32 %v2133_v39  ;;  %vm2142_vm11 = vmor %vm2140_vm10, %vm2141_vm8  ;;  %vm2150_vm13 = vweird.f32 %v2133_v39 }
0x170a   :  { %v2136_v41 = vmul.f32 %v2745_v38, %v2135_v40 }
0x170c   :  { %v2137_v42 = vmul.f32 0.5, %v2136_v41 }
0x170e   :  { %v2138_v63 = vsub.f32 1.5, %v2137_v42 }
0x170f   :  { %v2747_v43 = vpop.eup %2746 }
0x1710   :  { %v2139_v44 = vmul.f32 %v2745_v38, %v2138_v63  ;;  %v2145_v47 = vmul.f32 %v2747_v43, %v2133_v39  ;;  %vm2151_vm12 = vweird.f32 %v2747_v43 }
0x1711   :  { %vm2152_vm14 = vmor %vm2150_vm13, %vm2151_vm12 }
0x1712   :  { %v2143_v51 = vsel %vm2142_vm11, %v2745_v38, %v2139_v44  ;;  %v2146_v52 = vmul.f32 %v2747_v43, %v2145_v47 }
0x1713   :  { %v2154_v54 = vmul.f32 %v2143_v51, %v2120_v21 }
0x1714   :  { %v2147_v55 = vmul.f32 0.5, %v2146_v52 }
0x1715   :  { %v2159_v56 = vmul.f32 %v2656_v48, %v2154_v54 }
0x1716   :  { %v2148_v46 = vsub.f32 1.5, %v2147_v55 }
0x1717   :  { %v2164_v4 = vadd.f32 %v2657_v53, %v2159_v56 }
0x1718   :  { %v2149_v57 = vmul.f32 %v2747_v43, %v2148_v46 }
0x1719   :  { %2604 = vmatmul.msk.f32.vlgmr.msra.gmra.mxu2 %vm73_vm0, %v2164_v4 }
0x171a   :  { %v2153_v58 = vsel %vm2152_vm14, %v2747_v43, %v2149_v57 }
0x171b   :  { %v2155_v50 = vmul.f32 %v2153_v58, %v2121_v25 }
0x171d   :  { %v2160_v59 = vmul.f32 %v2656_v48, %v2155_v50 }
0x171f   :  { %v2165_v5 = vadd.f32 %v2657_v53, %v2160_v59 }
0x1721   :  { %2605 = vmatmul.msk.f32.gmra.mxu2 %vm73_vm0, %v2165_v5 }
0x179c   :  { %v2199_v9 = vpop.f32.mrf.mxu2 }
0x179d   :  { %v2200_v11 = vadd.f32 %v2658_v8, %v2199_v9 }
0x179f   :  { %v2205_v12 = vmul.f32 %v2200_v11, %v2200_v11 }
0x17a1   :  { %v2207_v0 = vmul.f32 %v2205_v12, %v2200_v11 }
0x17a3   :  { %v2209_v1 = vmul.f32 0.044715, %v2207_v0 }
0x17a4   :  { %v2202_v13 = vpop.f32.mrf.mxu2 }
0x17a5   :  { %v2211_v14 = vadd.f32 %v2209_v1, %v2200_v11  ;;  %v2203_v15 = vadd.f32 %v2658_v8, %v2202_v13  ;;  %v2326_v13 = vld [vmem:[%s3777_s3] sm:$0x3] }
0x17a7   :  { %v2213_v30 = vmul.f32 0.7978846, %v2211_v14  ;;  %v2206_v16 = vmul.f32 %v2203_v15, %v2203_v15 }
0x17a9   :  { %2748 = vtanh.f32 %v2213_v30  ;;  %v2208_v17 = vmul.f32 %v2206_v16, %v2203_v15 }
0x17ab   :  { %v2210_v18 = vmul.f32 0.044715, %v2208_v17 }
0x17ad   :  { %v2212_v19 = vadd.f32 %v2210_v18, %v2203_v15 }
0x17af   :  { %v2749_v20 = vpop.eup %2748  ;;  %v2214_v21 = vmul.f32 0.7978846, %v2212_v19 }
0x17b0   :  { %v2217_v22 = vadd.f32 1.0, %v2749_v20 }
0x17b1   :  { %2750 = vtanh.f32 %v2214_v21 }
0x17b2   :  { %v2219_v23 = vmul.f32 0.5, %v2217_v22 }
0x17b4   :  { %v2221_v45 = vmul.f32 %v2219_v23, %v2200_v11  ;;  %v2661_v11 = vld [vmem:[%s3761_s20 + $0x1] ss:$0 sm:$0xff] }
0x17b6   :  { %2615 = vmatmul.msk.f32.vlgmr.msra.gmra.mxu3 %vm1137_vm1, %v2221_v45 }
0x17b7   :  { %v2751_v24 = vpop.eup %2750 }
0x17b8   :  { %v2218_v25 = vadd.f32 1.0, %v2751_v24 }
0x17ba   :  { %v2220_v26 = vmul.f32 0.5, %v2218_v25 }
0x17bc   :  { %v2222_v27 = vmul.f32 %v2220_v26, %v2203_v15 }
0x17be   :  { %2616 = vmatmul.msk.f32.gmra.mxu3 %vm1137_vm1, %v2222_v27 }
0x1839   :  { %v2260_v28 = vpop.f32.mrf.mxu3 }
0x183a   :  { %v2261_v29 = vadd.f32 %v2659_v49, %v2260_v28 }
0x183c   :  { %v2266_v31 = vadd.f32 %v2261_v29, %v2164_v4 }
0x183e   :  { %v2272_v32 = vsel %vm73_vm0, %v2266_v31, 0.0 }
0x183f   :  { %2273 = vadd.xlane.f32.xlu1 %v2272_v32 }
0x1841   :  { %v2263_v33 = vpop.f32.mrf.mxu3 }
0x1842   :  { %v2264_v35 = vadd.f32 %v2659_v49, %v2263_v33 }
0x1844   :  { %v2267_v36 = vadd.f32 %v2264_v35, %v2165_v5 }
0x1846   :  { %v2275_v37 = vsel %vm73_vm0, %v2267_v36, 0.0 }
0x1847   :  { %2276 = vadd.xlane.f32.xlu0 %v2275_v37 }
0x18b2   :  { %v2274_v38 = vpop.xlane.xlu1 %2273 }
0x18b3   :  { %v2278_v39 = vmul.f32 %v2274_v38, %v2904_v10 }
0x18b5   :  { %v2280_v40 = vsub.f32 %v2266_v31, %v2278_v39 }
0x18b7   :  { %v2282_v41 = vmul.f32 %v2280_v40, %v2280_v40 }
0x18b9   :  { %v2284_v42 = vsel %vm73_vm0, %v2282_v41, 0.0 }
0x18ba   :  { %2285 = vadd.xlane.f32.xlu0 %v2284_v42  ;;  %v2277_v63 = vpop.xlane.xlu0 %2276 }
0x18bb   :  { %v2279_v43 = vmul.f32 %v2277_v63, %v2904_v10 }
0x18bd   :  { %v2281_v44 = vsub.f32 %v2267_v36, %v2279_v43 }
0x18bf   :  { %v2283_v47 = vmul.f32 %v2281_v44, %v2281_v44 }
0x18c1   :  { %v2287_v48 = vsel %vm73_vm0, %v2283_v47, 0.0 }
0x18c2   :  { %2288 = vadd.xlane.f32.xlu2 %v2287_v48 }
0x192d   :  { %v2286_v51 = vpop.xlane.xlu0 %2285 }
0x192e   :  { %v2290_v52 = vmul.f32 %v2286_v51, %v2904_v10 }
0x1930   :  { %v2292_v53 = vadd.f32 1e-12, %v2290_v52 }
0x1932   :  { %2752 = vrsqrt.f32 %v2292_v53  ;;  %vm2300_vm15 = vweird.f32 %v2292_v53 }
0x1935   :  { %v2289_v54 = vpop.xlane.xlu2 %2288 }
0x1936   :  { %v2291_v55 = vmul.f32 %v2289_v54, %v2904_v10  ;;  %v2660_v10 = vld [vmem:[%s3760_s19 + $0x1] ss:$0 sm:$0xff]  ;;  %s2785_s19 = smov [#allocation2]  }
0x1937   :  { %s2357_s24 = sshll.u32 %s2785_s19, 4  ;;  %s2358_s24 = int_to_ptr.vmem [resolvable:$true] %s2357_s24 }
0x1938   :  { %v2753_v56 = vpop.eup %2752  ;;  %v2293_v46 = vadd.f32 1e-12, %v2291_v55 }
0x1939   :  { %v2295_v4 = vmul.f32 %v2753_v56, %v2292_v53  ;;  %vm2301_vm0 = vweird.f32 %v2753_v56 }
0x193a   :  { %2754 = vrsqrt.f32 %v2293_v46  ;;  %vm2302_vm1 = vmor %vm2300_vm15, %vm2301_vm0  ;;  %vm2310_vm3 = vweird.f32 %v2293_v46 }
0x193b   :  { %v2296_v57 = vmul.f32 %v2753_v56, %v2295_v4 }
0x193d   :  { %v2297_v58 = vmul.f32 0.5, %v2296_v57 }
0x193f   :  { %v2298_v50 = vsub.f32 1.5, %v2297_v58 }
0x1940   :  { %v2755_v59 = vpop.eup %2754 }
0x1941   :  { %v2305_v5 = vmul.f32 %v2755_v59, %v2293_v46  ;;  %v2299_v60 = vmul.f32 %v2753_v56, %v2298_v50  ;;  %vm2311_vm2 = vweird.f32 %v2755_v59 }
0x1942   :  { %vm2312_vm4 = vmor %vm2310_vm3, %vm2311_vm2 }
0x1943   :  { %v2306_v34 = vmul.f32 %v2755_v59, %v2305_v5  ;;  %v2303_v62 = vsel %vm2302_vm1, %v2753_v56, %v2299_v60 }
0x1944   :  { %v2314_v6 = vmul.f32 %v2303_v62, %v2280_v40 }
0x1945   :  { %v2307_v61 = vmul.f32 0.5, %v2306_v34 }
0x1946   :  { %v2319_v12 = vmul.f32 %v2660_v10, %v2314_v6 }
0x1947   :  { %v2308_v2 = vsub.f32 1.5, %v2307_v61 }
0x1948   :  { %v2324_v1 = vadd.f32 %v2661_v11, %v2319_v12 }
0x1949   :  { %v2309_v3 = vmul.f32 %v2755_v59, %v2308_v2 }
0x194b   :  { %v2313_v7 = vsel %vm2312_vm4, %v2755_v59, %v2309_v3 }
0x194c   :  { %v2315_v8 = vmul.f32 %v2313_v7, %v2281_v44 }
0x194e   :  { %v2320_v9 = vmul.f32 %v2660_v10, %v2315_v8 }
0x1950   :  { %v2325_v0 = vadd.f32 %v2661_v11, %v2320_v9 }
0x1952   :  { %2344 = vmatpush.msrb.mxu0 %v2325_v0 }
0x1954   :  { %2345 = vmatpush.msrb.mxu0 %v2324_v1 }
0x1955   :  { %2619 = vmatmul.msk.f32.vlgmr.msrb.gmra.mxu0 %vm272_vm9, %v2326_v13 }
0x19d2   :  { %v2347_v14 = vpop.f32.mrf.mxu0 }
0x19d3   :  { %2351 = vst.msk [vmem:[#allocation2] sm:$0x3] %vm2350_vm5, %v2347_v14 }
0x19d4   :  { %2362 = dma.vmem_to_hbm [thread:$0]  %s2358_s24, 32, %s2360_s14, [#allocation3]  }
0x19d5   :  { %2782 = dma.done.wait [#allocation3], 32  }
0x19d6   :  { %2783 = vsyncadd [#allocation3], 4294967264 }
0x19d7   :  { %2367 = vsyncpa [#allocation3], 1 }

</bundles_post_ra>
